<compile_context>
chip_gen: v7x
topology: tpu7x:2x2x1
jax: 0.10.0
libtpu: 0.0.40
codegen_flags: <defaults>
</compile_context>

<pallas_src>
import jax
import jax.numpy as jnp
import numpy as np
from jax.experimental import pallas as pl
from jax.experimental.pallas import tpu as pltpu

EPS = 1e-5  # nn.BatchNorm1d default eps


def _round_up(n, m):
    return ((n + m - 1) // m) * m


# ----------------------------- Pallas kernel --------------------------------

def make_encoder_kernel(B, cin, c1, K, L1, L2, NE, NO, eps):
    """Whole Encoder forward in one kernel.

    Inputs (all full-array VMEM blocks):
      xp_ref : (B, cin*4, LQP)  4-phase de-interleaved input, zero-padded lanes
      w1_ref : (c1, cin*K)      conv1 weights, column j = ci*K + k
      w2_ref : (c1, K)          conv2 weights (single output channel)
      g1_ref, b1_ref : (c1, 1)  bn1 gamma / beta
      g2_ref, b2_ref : (1, 1)   bn2 gamma / beta
      wf_ref : (Fp, Op)         folded fc1·fc2 weight (zero-padded)
      bf_ref : (1, Op)          folded fc bias (zero-padded)
    Output:
      out_ref: (B, Op)
    Scratch:
      w3_ref : (B, Fp)          flattened, zero-padded fc input
    """
    NPH = 4  # input phases = stride**2 (two stacked stride-2 convs)

    def kernel(xp_ref, w1_ref, w2_ref, g1_ref, b1_ref, g2_ref, b2_ref,
               wf_ref, bf_ref, out_ref, w3_ref):
        f32 = jnp.float32
        lane = jax.lax.broadcasted_iota(jnp.int32, (1, NE), 1)
        odd_mask = (lane < NO).astype(f32)   # zero the invalid tail of the odd slab

        # ---- conv1 on the VPU (bias omitted: cancelled by BN1) -------------
        # y1 is kept split by output parity (even: NE cols, odd: NO valid cols)
        # so conv2's stride-2 reads are unit-stride as well.
        y1e, y1o = [], []
        s1 = jnp.zeros((c1, 1), f32)
        s2 = jnp.zeros((c1, 1), f32)
        for b in range(B):
            xb = xp_ref[b]                                  # (cin*4, LQP)
            ye = jnp.zeros((c1, NE), f32)
            yo = jnp.zeros((c1, NE), f32)
            for ci in range(cin):
                for k in range(K):
                    w_col = w1_ref[:, ci * K + k: ci * K + k + 1]        # (c1, 1)
                    pe, se = k % NPH, k // NPH                           # even outs: x[4u + k]
                    ye = ye + w_col * xb[ci * NPH + pe: ci * NPH + pe + 1, se: se + NE]
                    po, so = (k + 2) % NPH, (k + 2) // NPH               # odd outs: x[4u + 2 + k]
                    yo = yo + w_col * xb[ci * NPH + po: ci * NPH + po + 1, so: so + NE]
            yo = yo * odd_mask
            # BN1 one-pass statistics (per channel, over batch x length).
            s1 = s1 + jnp.sum(ye, axis=1, keepdims=True) + jnp.sum(yo, axis=1, keepdims=True)
            s2 = s2 + jnp.sum(ye * ye, axis=1, keepdims=True) + jnp.sum(yo * yo, axis=1, keepdims=True)
            y1e.append(ye)
            y1o.append(yo)

        inv_n1 = 1.0 / float(B * L1)
        mean1 = s1 * inv_n1
        var1 = s2 * inv_n1 - mean1 * mean1
        scale1 = g1_ref[...] * jax.lax.rsqrt(var1 + eps)    # (c1, 1)
        shift1 = b1_ref[...] - mean1 * scale1               # (c1, 1)

        # ---- conv2 (Cout = 1) + BN2 statistics ------------------------------
        y2 = []
        t1 = jnp.zeros((1, 1), f32)
        t2 = jnp.zeros((1, 1), f32)
        for b in range(B):
            e = y1e[b] * scale1 + shift1                    # bn1 applied (folded scale/shift)
            o = y1o[b] * scale1 + shift1
            z = jnp.zeros((c1, L2), f32)
            for k in range(K):                              # y2[t] = sum_{c,k} w2[c,k]*yhat1[c,2t+k]
                w_col = w2_ref[:, k: k + 1]                 # (c1, 1)
                src = e if k % 2 == 0 else o
                sh = k // 2
                z = z + w_col * src[:, sh: sh + L2]
            yb = jnp.sum(z, axis=0, keepdims=True)          # (1, L2) sublane reduce (XLU)
            t1 = t1 + jnp.sum(yb, axis=1, keepdims=True)
            t2 = t2 + jnp.sum(yb * yb, axis=1, keepdims=True)
            y2.append(yb)

        inv_n2 = 1.0 / float(B * L2)
        mean2 = t1 * inv_n2
        var2 = t2 * inv_n2 - mean2 * mean2
        scale2 = g2_ref[...] * jax.lax.rsqrt(var2 + eps)    # (1, 1)
        shift2 = b2_ref[...] - mean2 * scale2

        # ---- flatten (C2 == 1) + folded fc1·fc2 (one MXU matmul) ------------
        w3_ref[...] = jnp.zeros(w3_ref.shape, f32)
        for b in range(B):
            w3_ref[b:b + 1, 0:L2] = y2[b] * scale2 + shift2
        out = jnp.dot(w3_ref[...], wf_ref[...], preferred_element_type=jnp.float32)
        out_ref[...] = (out + bf_ref[...]).astype(out_ref.dtype)

    return kernel


# ------------------------------ wrapper -------------------------------------

def encoder_forward(params, x, kernel_size, stride):
    """Single fused Pallas kernel for the whole Encoder forward pass."""
    B, cin, L = x.shape
    c1 = params["conv1_w"].shape[0]
    c2 = params["conv2_w"].shape[0]
    assert stride == 2 and kernel_size == 4, "fused kernel assumes the module's stride=2, K=4"
    assert c2 == 1 and L % 4 == 0

    L1 = (L - kernel_size) // stride + 1
    L2 = (L1 - kernel_size) // stride + 1
    NE = (L1 + 1) // 2              # number of even conv1 outputs
    NO = L1 - NE                    # number of odd conv1 outputs
    LQ = L // 4
    LQP = _round_up(LQ, 128)        # lane-dense quarter length
    assert LQP >= NE + 1

    # 4-phase de-interleave of the input (absorbs the stride-2 access pattern so
    # all in-kernel slices are unit-stride); row index = ci*4 + phase.
    xp = x.reshape(B, cin, LQ, 4).transpose(0, 1, 3, 2).reshape(B, cin * 4, LQ)
    xp = jnp.pad(xp, ((0, 0), (0, 0), (0, LQP - LQ)))

    # Conv weights in lane-friendly 2-D form (conv biases dropped: cancelled by BN).
    w1m = params["conv1_w"].reshape(c1, cin * kernel_size)        # (c1, cin*K)
    w2m = params["conv2_w"].reshape(c1, kernel_size)              # (c1, K) since c2 == 1

    # Fold fc1·fc2 (no nonlinearity between them) and zero-pad to lane multiples.
    wf = params["fc1_w"].T @ params["fc2_w"].T                    # (after_2, after_2//4)
    bf = params["fc1_b"] @ params["fc2_w"].T + params["fc2_b"]    # (after_2//4,)
    F_in, F_out = wf.shape
    assert F_in == c2 * L2
    Fp, Op = _round_up(F_in, 128), _round_up(F_out, 128)
    wf_p = jnp.zeros((Fp, Op), jnp.float32).at[:F_in, :F_out].set(wf)
    bf_p = jnp.zeros((1, Op), jnp.float32).at[0, :F_out].set(bf)

    kernel = make_encoder_kernel(B, cin, c1, kernel_size, L1, L2, NE, NO, EPS)
    flops = 2 * B * (L1 * c1 * cin * kernel_size + L2 * c1 * kernel_size + Fp * Op)
    bytes_accessed = 4 * (xp.size + w1m.size + w2m.size + wf_p.size + bf_p.size
                          + 2 * (c1 + 1) + B * Op)

    out = pl.pallas_call(
        kernel,
        out_shape=jax.ShapeDtypeStruct((B, Op), jnp.float32),
        in_specs=[pl.BlockSpec(memory_space=pltpu.MemorySpace.VMEM)] * 9,
        out_specs=pl.BlockSpec(memory_space=pltpu.MemorySpace.VMEM),
        scratch_shapes=[pltpu.VMEM((B, Fp), jnp.float32)],
        cost_estimate=pl.CostEstimate(flops=flops, transcendentals=c1 + 1,
                                      bytes_accessed=bytes_accessed),
    )(xp, w1m, w2m,
      params["bn1_g"].reshape(c1, 1), params["bn1_b"].reshape(c1, 1),
      params["bn2_g"].reshape(1, 1), params["bn2_b"].reshape(1, 1),
      wf_p, bf_p)
    return out[:, :F_out]


# ------------------------- pure-JAX reference -------------------------------

def reference_forward(params, x, K, s):
    def conv1d(z, w, b):
        dn = jax.lax.conv_dimension_numbers(z.shape, w.shape, ("NCH", "OIH", "NCH"))
        return jax.lax.conv_general_dilated(z, w, (s,), "VALID",
                                            dimension_numbers=dn) + b[None, :, None]

    def bn(z, g, b):
        mean = z.mean(axis=(0, 2), keepdims=True)
        var = ((z - mean) ** 2).mean(axis=(0, 2), keepdims=True)
        return (z - mean) / jnp.sqrt(var + EPS) * g[None, :, None] + b[None, :, None]

    y1 = bn(conv1d(x, params["conv1_w"], params["conv1_b"]),
            params["bn1_g"], params["bn1_b"])
    y2 = bn(conv1d(y1, params["conv2_w"], params["conv2_b"]),
            params["bn2_g"], params["bn2_b"])
    w3 = y2.reshape(y2.shape[0], -1)
    l1 = w3 @ params["fc1_w"].T + params["fc1_b"]
    return l1 @ params["fc2_w"].T + params["fc2_b"]


# ---------------------------------- main ------------------------------------

def init_params(key, in_channel, out_channel_lst, kernel_size, stride):
    c1, c2 = out_channel_lst
    after_1 = int((2000 - kernel_size) // stride + 1)
    after_2 = int((after_1 - kernel_size) // stride + 1)
    ks = jax.random.split(key, 8)

    def uni(k, shape, fan_in):
        bound = 1.0 / np.sqrt(fan_in)
        return jax.random.uniform(k, shape, jnp.float32, -bound, bound)

    params = {
        "conv1_w": uni(ks[0], (c1, in_channel, kernel_size), in_channel * kernel_size),
        "conv1_b": uni(ks[1], (c1,), in_channel * kernel_size),
        "conv2_w": uni(ks[2], (c2, c1, kernel_size), c1 * kernel_size),
        "conv2_b": uni(ks[3], (c2,), c1 * kernel_size),
        "bn1_g": 1.0 + 0.1 * jax.random.normal(ks[4], (c1,), jnp.float32),
        "bn1_b": 0.1 * jax.random.normal(ks[5], (c1,), jnp.float32),
        "bn2_g": 1.0 + 0.1 * jax.random.normal(ks[6], (c2,), jnp.float32),
        "bn2_b": 0.1 * jax.random.normal(ks[7], (c2,), jnp.float32),
    }
    k_fc = jax.random.split(ks[0], 4)
    params["fc1_w"] = uni(k_fc[0], (after_2 // 2, after_2), after_2)
    params["fc1_b"] = uni(k_fc[1], (after_2 // 2,), after_2)
    params["fc2_w"] = uni(k_fc[2], (after_2 // 4, after_2 // 2), after_2 // 2)
    params["fc2_b"] = uni(k_fc[3], (after_2 // 4,), after_2 // 2)
    return params, after_2
    # TODO(synk): BatchNorm running_mean/running_var updates (training-mode side
    # effect) are not reproduced; they do not affect the forward output.


if __name__ == "__main__":
    in_channel, out_channel_lst = 4, [8, 1]
    kernel_size, stride = 4, 2
    B, L = 2, 2000  # L must be 2000 (module hard-codes 2000 for the fc1 size)

    key = jax.random.PRNGKey(0)
    k_par, k_x = jax.random.split(key)
    params, after_2 = init_params(k_par, in_channel, out_channel_lst,
                                  kernel_size, stride)
    x = jax.random.normal(k_x, (B, in_channel, L), jnp.float32)

    fwd = jax.jit(lambda p, xx: encoder_forward(p, xx, kernel_size, stride))
    out = jax.block_until_ready(fwd(params, x))
    assert out.shape == (B, after_2 // 4), out.shape

    ref = jax.block_until_ready(reference_forward(params, x, kernel_size, stride))
    assert np.allclose(np.asarray(out), np.asarray(ref), rtol=5e-2, atol=5e-2), \
        float(np.max(np.abs(np.asarray(out) - np.asarray(ref))))

    print("KERNEL_OK")
</pallas_src>

<mosaic_0001>
module attributes {stable_mosaic.version = 11 : i64} {
  func.func @kernel(%arg0: memref<2x16x512xf32, #tpu.memory_space<vmem>>, %arg1: memref<8x16xf32, #tpu.memory_space<vmem>>, %arg2: memref<8x4xf32, #tpu.memory_space<vmem>>, %arg3: memref<8x1xf32, #tpu.memory_space<vmem>>, %arg4: memref<8x1xf32, #tpu.memory_space<vmem>>, %arg5: memref<1x1xf32, #tpu.memory_space<vmem>>, %arg6: memref<1x1xf32, #tpu.memory_space<vmem>>, %arg7: memref<512x128xf32, #tpu.memory_space<vmem>>, %arg8: memref<1x128xf32, #tpu.memory_space<vmem>>, %arg9: memref<2x128xf32, #tpu.memory_space<vmem>>, %arg10: memref<2x512xf32, #tpu.memory_space<vmem>>) attributes {dimension_semantics = [], scalar_prefetch = 0 : i64, scratch_operands = 1 : i64, tpu.core_type = #tpu.core_type<tc>} {
    %0 = tpu.iota {dimensions = array<i32: 1>} : vector<1x500xi32>
    %c499_i32 = arith.constant 499 : i32
    %1 = vector.broadcast %c499_i32 : i32 to vector<1x500xi32>
    %2 = arith.cmpi slt, %0, %1 : vector<1x500xi32>
    %3 = arith.extui %2 : vector<1x500xi1> to vector<1x500xi32>
    %4 = arith.sitofp %3 : vector<1x500xi32> to vector<1x500xf32>
    %cst = arith.constant 0.000000e+00 : f32
    %5 = vector.broadcast %cst : f32 to vector<8x1xf32>
    %cst_0 = arith.constant 0.000000e+00 : f32
    %6 = vector.broadcast %cst_0 : f32 to vector<8x1xf32>
    %c0 = arith.constant 0 : index
    %c0_1 = arith.constant 0 : index
    %c0_2 = arith.constant 0 : index
    %7 = vector.load %arg0[%c0, %c0_1, %c0_2] : memref<2x16x512xf32, #tpu.memory_space<vmem>>, vector<1x16x512xf32>
    %8 = vector.shape_cast %7 : vector<1x16x512xf32> to vector<16x512xf32>
    %cst_3 = arith.constant 0.000000e+00 : f32
    %9 = vector.broadcast %cst_3 : f32 to vector<8x500xf32>
    %cst_4 = arith.constant 0.000000e+00 : f32
    %10 = vector.broadcast %cst_4 : f32 to vector<8x500xf32>
    %c0_5 = arith.constant 0 : index
    %c0_6 = arith.constant 0 : index
    %11 = vector.load %arg1[%c0_5, %c0_6] : memref<8x16xf32, #tpu.memory_space<vmem>>, vector<8x1xf32>
    %12 = vector.extract_strided_slice %8 {offsets = [0, 0], sizes = [1, 500], strides = [1, 1]} : vector<16x512xf32> to vector<1x500xf32>
    %13 = vector.broadcast %11 : vector<8x1xf32> to vector<8x500xf32>
    %14 = vector.broadcast %12 : vector<1x500xf32> to vector<8x500xf32>
    %15 = arith.mulf %13, %14 : vector<8x500xf32>
    %16 = arith.addf %9, %15 : vector<8x500xf32>
    %17 = vector.extract_strided_slice %8 {offsets = [2, 0], sizes = [1, 500], strides = [1, 1]} : vector<16x512xf32> to vector<1x500xf32>
    %18 = vector.broadcast %11 : vector<8x1xf32> to vector<8x500xf32>
    %19 = vector.broadcast %17 : vector<1x500xf32> to vector<8x500xf32>
    %20 = arith.mulf %18, %19 : vector<8x500xf32>
    %21 = arith.addf %10, %20 : vector<8x500xf32>
    %c0_7 = arith.constant 0 : index
    %c1 = arith.constant 1 : index
    %22 = vector.load %arg1[%c0_7, %c1] : memref<8x16xf32, #tpu.memory_space<vmem>>, vector<8x1xf32>
    %23 = vector.extract_strided_slice %8 {offsets = [1, 0], sizes = [1, 500], strides = [1, 1]} : vector<16x512xf32> to vector<1x500xf32>
    %24 = vector.broadcast %22 : vector<8x1xf32> to vector<8x500xf32>
    %25 = vector.broadcast %23 : vector<1x500xf32> to vector<8x500xf32>
    %26 = arith.mulf %24, %25 : vector<8x500xf32>
    %27 = arith.addf %16, %26 : vector<8x500xf32>
    %28 = vector.extract_strided_slice %8 {offsets = [3, 0], sizes = [1, 500], strides = [1, 1]} : vector<16x512xf32> to vector<1x500xf32>
    %29 = vector.broadcast %22 : vector<8x1xf32> to vector<8x500xf32>
    %30 = vector.broadcast %28 : vector<1x500xf32> to vector<8x500xf32>
    %31 = arith.mulf %29, %30 : vector<8x500xf32>
    %32 = arith.addf %21, %31 : vector<8x500xf32>
    %c0_8 = arith.constant 0 : index
    %c2 = arith.constant 2 : index
    %33 = vector.load %arg1[%c0_8, %c2] : memref<8x16xf32, #tpu.memory_space<vmem>>, vector<8x1xf32>
    %34 = vector.extract_strided_slice %8 {offsets = [2, 0], sizes = [1, 500], strides = [1, 1]} : vector<16x512xf32> to vector<1x500xf32>
    %35 = vector.broadcast %33 : vector<8x1xf32> to vector<8x500xf32>
    %36 = vector.broadcast %34 : vector<1x500xf32> to vector<8x500xf32>
    %37 = arith.mulf %35, %36 : vector<8x500xf32>
    %38 = arith.addf %27, %37 : vector<8x500xf32>
    %39 = vector.extract_strided_slice %8 {offsets = [0, 1], sizes = [1, 500], strides = [1, 1]} : vector<16x512xf32> to vector<1x500xf32>
    %40 = vector.broadcast %33 : vector<8x1xf32> to vector<8x500xf32>
    %41 = vector.broadcast %39 : vector<1x500xf32> to vector<8x500xf32>
    %42 = arith.mulf %40, %41 : vector<8x500xf32>
    %43 = arith.addf %32, %42 : vector<8x500xf32>
    %c0_9 = arith.constant 0 : index
    %c3 = arith.constant 3 : index
    %44 = vector.load %arg1[%c0_9, %c3] : memref<8x16xf32, #tpu.memory_space<vmem>>, vector<8x1xf32>
    %45 = vector.extract_strided_slice %8 {offsets = [3, 0], sizes = [1, 500], strides = [1, 1]} : vector<16x512xf32> to vector<1x500xf32>
    %46 = vector.broadcast %44 : vector<8x1xf32> to vector<8x500xf32>
    %47 = vector.broadcast %45 : vector<1x500xf32> to vector<8x500xf32>
    %48 = arith.mulf %46, %47 : vector<8x500xf32>
    %49 = arith.addf %38, %48 : vector<8x500xf32>
    %50 = vector.extract_strided_slice %8 {offsets = [1, 1], sizes = [1, 500], strides = [1, 1]} : vector<16x512xf32> to vector<1x500xf32>
    %51 = vector.broadcast %44 : vector<8x1xf32> to vector<8x500xf32>
    %52 = vector.broadcast %50 : vector<1x500xf32> to vector<8x500xf32>
    %53 = arith.mulf %51, %52 : vector<8x500xf32>
    %54 = arith.addf %43, %53 : vector<8x500xf32>
    %c0_10 = arith.constant 0 : index
    %c4 = arith.constant 4 : index
    %55 = vector.load %arg1[%c0_10, %c4] : memref<8x16xf32, #tpu.memory_space<vmem>>, vector<8x1xf32>
    %56 = vector.extract_strided_slice %8 {offsets = [4, 0], sizes = [1, 500], strides = [1, 1]} : vector<16x512xf32> to vector<1x500xf32>
    %57 = vector.broadcast %55 : vector<8x1xf32> to vector<8x500xf32>
    %58 = vector.broadcast %56 : vector<1x500xf32> to vector<8x500xf32>
    %59 = arith.mulf %57, %58 : vector<8x500xf32>
    %60 = arith.addf %49, %59 : vector<8x500xf32>
    %61 = vector.extract_strided_slice %8 {offsets = [6, 0], sizes = [1, 500], strides = [1, 1]} : vector<16x512xf32> to vector<1x500xf32>
    %62 = vector.broadcast %55 : vector<8x1xf32> to vector<8x500xf32>
    %63 = vector.broadcast %61 : vector<1x500xf32> to vector<8x500xf32>
    %64 = arith.mulf %62, %63 : vector<8x500xf32>
    %65 = arith.addf %54, %64 : vector<8x500xf32>
    %c0_11 = arith.constant 0 : index
    %c5 = arith.constant 5 : index
    %66 = vector.load %arg1[%c0_11, %c5] : memref<8x16xf32, #tpu.memory_space<vmem>>, vector<8x1xf32>
    %67 = vector.extract_strided_slice %8 {offsets = [5, 0], sizes = [1, 500], strides = [1, 1]} : vector<16x512xf32> to vector<1x500xf32>
    %68 = vector.broadcast %66 : vector<8x1xf32> to vector<8x500xf32>
    %69 = vector.broadcast %67 : vector<1x500xf32> to vector<8x500xf32>
    %70 = arith.mulf %68, %69 : vector<8x500xf32>
    %71 = arith.addf %60, %70 : vector<8x500xf32>
    %72 = vector.extract_strided_slice %8 {offsets = [7, 0], sizes = [1, 500], strides = [1, 1]} : vector<16x512xf32> to vector<1x500xf32>
    %73 = vector.broadcast %66 : vector<8x1xf32> to vector<8x500xf32>
    %74 = vector.broadcast %72 : vector<1x500xf32> to vector<8x500xf32>
    %75 = arith.mulf %73, %74 : vector<8x500xf32>
    %76 = arith.addf %65, %75 : vector<8x500xf32>
    %c0_12 = arith.constant 0 : index
    %c6 = arith.constant 6 : index
    %77 = vector.load %arg1[%c0_12, %c6] : memref<8x16xf32, #tpu.memory_space<vmem>>, vector<8x1xf32>
    %78 = vector.extract_strided_slice %8 {offsets = [6, 0], sizes = [1, 500], strides = [1, 1]} : vector<16x512xf32> to vector<1x500xf32>
    %79 = vector.broadcast %77 : vector<8x1xf32> to vector<8x500xf32>
    %80 = vector.broadcast %78 : vector<1x500xf32> to vector<8x500xf32>
    %81 = arith.mulf %79, %80 : vector<8x500xf32>
    %82 = arith.addf %71, %81 : vector<8x500xf32>
    %83 = vector.extract_strided_slice %8 {offsets = [4, 1], sizes = [1, 500], strides = [1, 1]} : vector<16x512xf32> to vector<1x500xf32>
    %84 = vector.broadcast %77 : vector<8x1xf32> to vector<8x500xf32>
    %85 = vector.broadcast %83 : vector<1x500xf32> to vector<8x500xf32>
    %86 = arith.mulf %84, %85 : vector<8x500xf32>
    %87 = arith.addf %76, %86 : vector<8x500xf32>
    %c0_13 = arith.constant 0 : index
    %c7 = arith.constant 7 : index
    %88 = vector.load %arg1[%c0_13, %c7] : memref<8x16xf32, #tpu.memory_space<vmem>>, vector<8x1xf32>
    %89 = vector.extract_strided_slice %8 {offsets = [7, 0], sizes = [1, 500], strides = [1, 1]} : vector<16x512xf32> to vector<1x500xf32>
    %90 = vector.broadcast %88 : vector<8x1xf32> to vector<8x500xf32>
    %91 = vector.broadcast %89 : vector<1x500xf32> to vector<8x500xf32>
    %92 = arith.mulf %90, %91 : vector<8x500xf32>
    %93 = arith.addf %82, %92 : vector<8x500xf32>
    %94 = vector.extract_strided_slice %8 {offsets = [5, 1], sizes = [1, 500], strides = [1, 1]} : vector<16x512xf32> to vector<1x500xf32>
    %95 = vector.broadcast %88 : vector<8x1xf32> to vector<8x500xf32>
    %96 = vector.broadcast %94 : vector<1x500xf32> to vector<8x500xf32>
    %97 = arith.mulf %95, %96 : vector<8x500xf32>
    %98 = arith.addf %87, %97 : vector<8x500xf32>
    %c0_14 = arith.constant 0 : index
    %c8 = arith.constant 8 : index
    %99 = vector.load %arg1[%c0_14, %c8] : memref<8x16xf32, #tpu.memory_space<vmem>>, vector<8x1xf32>
    %100 = vector.extract_strided_slice %8 {offsets = [8, 0], sizes = [1, 500], strides = [1, 1]} : vector<16x512xf32> to vector<1x500xf32>
    %101 = vector.broadcast %99 : vector<8x1xf32> to vector<8x500xf32>
    %102 = vector.broadcast %100 : vector<1x500xf32> to vector<8x500xf32>
    %103 = arith.mulf %101, %102 : vector<8x500xf32>
    %104 = arith.addf %93, %103 : vector<8x500xf32>
    %105 = vector.extract_strided_slice %8 {offsets = [10, 0], sizes = [1, 500], strides = [1, 1]} : vector<16x512xf32> to vector<1x500xf32>
    %106 = vector.broadcast %99 : vector<8x1xf32> to vector<8x500xf32>
    %107 = vector.broadcast %105 : vector<1x500xf32> to vector<8x500xf32>
    %108 = arith.mulf %106, %107 : vector<8x500xf32>
    %109 = arith.addf %98, %108 : vector<8x500xf32>
    %c0_15 = arith.constant 0 : index
    %c9 = arith.constant 9 : index
    %110 = vector.load %arg1[%c0_15, %c9] : memref<8x16xf32, #tpu.memory_space<vmem>>, vector<8x1xf32>
    %111 = vector.extract_strided_slice %8 {offsets = [9, 0], sizes = [1, 500], strides = [1, 1]} : vector<16x512xf32> to vector<1x500xf32>
    %112 = vector.broadcast %110 : vector<8x1xf32> to vector<8x500xf32>
    %113 = vector.broadcast %111 : vector<1x500xf32> to vector<8x500xf32>
    %114 = arith.mulf %112, %113 : vector<8x500xf32>
    %115 = arith.addf %104, %114 : vector<8x500xf32>
    %116 = vector.extract_strided_slice %8 {offsets = [11, 0], sizes = [1, 500], strides = [1, 1]} : vector<16x512xf32> to vector<1x500xf32>
    %117 = vector.broadcast %110 : vector<8x1xf32> to vector<8x500xf32>
    %118 = vector.broadcast %116 : vector<1x500xf32> to vector<8x500xf32>
    %119 = arith.mulf %117, %118 : vector<8x500xf32>
    %120 = arith.addf %109, %119 : vector<8x500xf32>
    %c0_16 = arith.constant 0 : index
    %c10 = arith.constant 10 : index
    %121 = vector.load %arg1[%c0_16, %c10] : memref<8x16xf32, #tpu.memory_space<vmem>>, vector<8x1xf32>
    %122 = vector.extract_strided_slice %8 {offsets = [10, 0], sizes = [1, 500], strides = [1, 1]} : vector<16x512xf32> to vector<1x500xf32>
    %123 = vector.broadcast %121 : vector<8x1xf32> to vector<8x500xf32>
    %124 = vector.broadcast %122 : vector<1x500xf32> to vector<8x500xf32>
    %125 = arith.mulf %123, %124 : vector<8x500xf32>
    %126 = arith.addf %115, %125 : vector<8x500xf32>
    %127 = vector.extract_strided_slice %8 {offsets = [8, 1], sizes = [1, 500], strides = [1, 1]} : vector<16x512xf32> to vector<1x500xf32>
    %128 = vector.broadcast %121 : vector<8x1xf32> to vector<8x500xf32>
    %129 = vector.broadcast %127 : vector<1x500xf32> to vector<8x500xf32>
    %130 = arith.mulf %128, %129 : vector<8x500xf32>
    %131 = arith.addf %120, %130 : vector<8x500xf32>
    %c0_17 = arith.constant 0 : index
    %c11 = arith.constant 11 : index
    %132 = vector.load %arg1[%c0_17, %c11] : memref<8x16xf32, #tpu.memory_space<vmem>>, vector<8x1xf32>
    %133 = vector.extract_strided_slice %8 {offsets = [11, 0], sizes = [1, 500], strides = [1, 1]} : vector<16x512xf32> to vector<1x500xf32>
    %134 = vector.broadcast %132 : vector<8x1xf32> to vector<8x500xf32>
    %135 = vector.broadcast %133 : vector<1x500xf32> to vector<8x500xf32>
    %136 = arith.mulf %134, %135 : vector<8x500xf32>
    %137 = arith.addf %126, %136 : vector<8x500xf32>
    %138 = vector.extract_strided_slice %8 {offsets = [9, 1], sizes = [1, 500], strides = [1, 1]} : vector<16x512xf32> to vector<1x500xf32>
    %139 = vector.broadcast %132 : vector<8x1xf32> to vector<8x500xf32>
    %140 = vector.broadcast %138 : vector<1x500xf32> to vector<8x500xf32>
    %141 = arith.mulf %139, %140 : vector<8x500xf32>
    %142 = arith.addf %131, %141 : vector<8x500xf32>
    %c0_18 = arith.constant 0 : index
    %c12 = arith.constant 12 : index
    %143 = vector.load %arg1[%c0_18, %c12] : memref<8x16xf32, #tpu.memory_space<vmem>>, vector<8x1xf32>
    %144 = vector.extract_strided_slice %8 {offsets = [12, 0], sizes = [1, 500], strides = [1, 1]} : vector<16x512xf32> to vector<1x500xf32>
    %145 = vector.broadcast %143 : vector<8x1xf32> to vector<8x500xf32>
    %146 = vector.broadcast %144 : vector<1x500xf32> to vector<8x500xf32>
    %147 = arith.mulf %145, %146 : vector<8x500xf32>
    %148 = arith.addf %137, %147 : vector<8x500xf32>
    %149 = vector.extract_strided_slice %8 {offsets = [14, 0], sizes = [1, 500], strides = [1, 1]} : vector<16x512xf32> to vector<1x500xf32>
    %150 = vector.broadcast %143 : vector<8x1xf32> to vector<8x500xf32>
    %151 = vector.broadcast %149 : vector<1x500xf32> to vector<8x500xf32>
    %152 = arith.mulf %150, %151 : vector<8x500xf32>
    %153 = arith.addf %142, %152 : vector<8x500xf32>
    %c0_19 = arith.constant 0 : index
    %c13 = arith.constant 13 : index
    %154 = vector.load %arg1[%c0_19, %c13] : memref<8x16xf32, #tpu.memory_space<vmem>>, vector<8x1xf32>
    %155 = vector.extract_strided_slice %8 {offsets = [13, 0], sizes = [1, 500], strides = [1, 1]} : vector<16x512xf32> to vector<1x500xf32>
    %156 = vector.broadcast %154 : vector<8x1xf32> to vector<8x500xf32>
    %157 = vector.broadcast %155 : vector<1x500xf32> to vector<8x500xf32>
    %158 = arith.mulf %156, %157 : vector<8x500xf32>
    %159 = arith.addf %148, %158 : vector<8x500xf32>
    %160 = vector.extract_strided_slice %8 {offsets = [15, 0], sizes = [1, 500], strides = [1, 1]} : vector<16x512xf32> to vector<1x500xf32>
    %161 = vector.broadcast %154 : vector<8x1xf32> to vector<8x500xf32>
    %162 = vector.broadcast %160 : vector<1x500xf32> to vector<8x500xf32>
    %163 = arith.mulf %161, %162 : vector<8x500xf32>
    %164 = arith.addf %153, %163 : vector<8x500xf32>
    %c0_20 = arith.constant 0 : index
    %c14 = arith.constant 14 : index
    %165 = vector.load %arg1[%c0_20, %c14] : memref<8x16xf32, #tpu.memory_space<vmem>>, vector<8x1xf32>
    %166 = vector.extract_strided_slice %8 {offsets = [14, 0], sizes = [1, 500], strides = [1, 1]} : vector<16x512xf32> to vector<1x500xf32>
    %167 = vector.broadcast %165 : vector<8x1xf32> to vector<8x500xf32>
    %168 = vector.broadcast %166 : vector<1x500xf32> to vector<8x500xf32>
    %169 = arith.mulf %167, %168 : vector<8x500xf32>
    %170 = arith.addf %159, %169 : vector<8x500xf32>
    %171 = vector.extract_strided_slice %8 {offsets = [12, 1], sizes = [1, 500], strides = [1, 1]} : vector<16x512xf32> to vector<1x500xf32>
    %172 = vector.broadcast %165 : vector<8x1xf32> to vector<8x500xf32>
    %173 = vector.broadcast %171 : vector<1x500xf32> to vector<8x500xf32>
    %174 = arith.mulf %172, %173 : vector<8x500xf32>
    %175 = arith.addf %164, %174 : vector<8x500xf32>
    %c0_21 = arith.constant 0 : index
    %c15 = arith.constant 15 : index
    %176 = vector.load %arg1[%c0_21, %c15] : memref<8x16xf32, #tpu.memory_space<vmem>>, vector<8x1xf32>
    %177 = vector.extract_strided_slice %8 {offsets = [15, 0], sizes = [1, 500], strides = [1, 1]} : vector<16x512xf32> to vector<1x500xf32>
    %178 = vector.broadcast %176 : vector<8x1xf32> to vector<8x500xf32>
    %179 = vector.broadcast %177 : vector<1x500xf32> to vector<8x500xf32>
    %180 = arith.mulf %178, %179 : vector<8x500xf32>
    %181 = arith.addf %170, %180 : vector<8x500xf32>
    %182 = vector.extract_strided_slice %8 {offsets = [13, 1], sizes = [1, 500], strides = [1, 1]} : vector<16x512xf32> to vector<1x500xf32>
    %183 = vector.broadcast %176 : vector<8x1xf32> to vector<8x500xf32>
    %184 = vector.broadcast %182 : vector<1x500xf32> to vector<8x500xf32>
    %185 = arith.mulf %183, %184 : vector<8x500xf32>
    %186 = arith.addf %175, %185 : vector<8x500xf32>
    %187 = vector.broadcast %4 : vector<1x500xf32> to vector<8x500xf32>
    %188 = arith.mulf %186, %187 : vector<8x500xf32>
    %cst_22 = arith.constant dense<0.000000e+00> : vector<8xf32>
    %189 = vector.multi_reduction <add>, %181, %cst_22 [1] : vector<8x500xf32> to vector<8xf32>
    %190 = vector.shape_cast %189 : vector<8xf32> to vector<8x1xf32>
    %191 = arith.addf %5, %190 : vector<8x1xf32>
    %cst_23 = arith.constant dense<0.000000e+00> : vector<8xf32>
    %192 = vector.multi_reduction <add>, %188, %cst_23 [1] : vector<8x500xf32> to vector<8xf32>
    %193 = vector.shape_cast %192 : vector<8xf32> to vector<8x1xf32>
    %194 = arith.addf %191, %193 : vector<8x1xf32>
    %195 = arith.mulf %181, %181 : vector<8x500xf32>
    %cst_24 = arith.constant dense<0.000000e+00> : vector<8xf32>
    %196 = vector.multi_reduction <add>, %195, %cst_24 [1] : vector<8x500xf32> to vector<8xf32>
    %197 = vector.shape_cast %196 : vector<8xf32> to vector<8x1xf32>
    %198 = arith.addf %6, %197 : vector<8x1xf32>
    %199 = arith.mulf %188, %188 : vector<8x500xf32>
    %cst_25 = arith.constant dense<0.000000e+00> : vector<8xf32>
    %200 = vector.multi_reduction <add>, %199, %cst_25 [1] : vector<8x500xf32> to vector<8xf32>
    %201 = vector.shape_cast %200 : vector<8xf32> to vector<8x1xf32>
    %202 = arith.addf %198, %201 : vector<8x1xf32>
    %c1_26 = arith.constant 1 : index
    %c0_27 = arith.constant 0 : index
    %c0_28 = arith.constant 0 : index
    %203 = vector.load %arg0[%c1_26, %c0_27, %c0_28] : memref<2x16x512xf32, #tpu.memory_space<vmem>>, vector<1x16x512xf32>
    %204 = vector.shape_cast %203 : vector<1x16x512xf32> to vector<16x512xf32>
    %cst_29 = arith.constant 0.000000e+00 : f32
    %205 = vector.broadcast %cst_29 : f32 to vector<8x500xf32>
    %cst_30 = arith.constant 0.000000e+00 : f32
    %206 = vector.broadcast %cst_30 : f32 to vector<8x500xf32>
    %c0_31 = arith.constant 0 : index
    %c0_32 = arith.constant 0 : index
    %207 = vector.load %arg1[%c0_31, %c0_32] : memref<8x16xf32, #tpu.memory_space<vmem>>, vector<8x1xf32>
    %208 = vector.extract_strided_slice %204 {offsets = [0, 0], sizes = [1, 500], strides = [1, 1]} : vector<16x512xf32> to vector<1x500xf32>
    %209 = vector.broadcast %207 : vector<8x1xf32> to vector<8x500xf32>
    %210 = vector.broadcast %208 : vector<1x500xf32> to vector<8x500xf32>
    %211 = arith.mulf %209, %210 : vector<8x500xf32>
    %212 = arith.addf %205, %211 : vector<8x500xf32>
    %213 = vector.extract_strided_slice %204 {offsets = [2, 0], sizes = [1, 500], strides = [1, 1]} : vector<16x512xf32> to vector<1x500xf32>
    %214 = vector.broadcast %207 : vector<8x1xf32> to vector<8x500xf32>
    %215 = vector.broadcast %213 : vector<1x500xf32> to vector<8x500xf32>
    %216 = arith.mulf %214, %215 : vector<8x500xf32>
    %217 = arith.addf %206, %216 : vector<8x500xf32>
    %c0_33 = arith.constant 0 : index
    %c1_34 = arith.constant 1 : index
    %218 = vector.load %arg1[%c0_33, %c1_34] : memref<8x16xf32, #tpu.memory_space<vmem>>, vector<8x1xf32>
    %219 = vector.extract_strided_slice %204 {offsets = [1, 0], sizes = [1, 500], strides = [1, 1]} : vector<16x512xf32> to vector<1x500xf32>
    %220 = vector.broadcast %218 : vector<8x1xf32> to vector<8x500xf32>
    %221 = vector.broadcast %219 : vector<1x500xf32> to vector<8x500xf32>
    %222 = arith.mulf %220, %221 : vector<8x500xf32>
    %223 = arith.addf %212, %222 : vector<8x500xf32>
    %224 = vector.extract_strided_slice %204 {offsets = [3, 0], sizes = [1, 500], strides = [1, 1]} : vector<16x512xf32> to vector<1x500xf32>
    %225 = vector.broadcast %218 : vector<8x1xf32> to vector<8x500xf32>
    %226 = vector.broadcast %224 : vector<1x500xf32> to vector<8x500xf32>
    %227 = arith.mulf %225, %226 : vector<8x500xf32>
    %228 = arith.addf %217, %227 : vector<8x500xf32>
    %c0_35 = arith.constant 0 : index
    %c2_36 = arith.constant 2 : index
    %229 = vector.load %arg1[%c0_35, %c2_36] : memref<8x16xf32, #tpu.memory_space<vmem>>, vector<8x1xf32>
    %230 = vector.extract_strided_slice %204 {offsets = [2, 0], sizes = [1, 500], strides = [1, 1]} : vector<16x512xf32> to vector<1x500xf32>
    %231 = vector.broadcast %229 : vector<8x1xf32> to vector<8x500xf32>
    %232 = vector.broadcast %230 : vector<1x500xf32> to vector<8x500xf32>
    %233 = arith.mulf %231, %232 : vector<8x500xf32>
    %234 = arith.addf %223, %233 : vector<8x500xf32>
    %235 = vector.extract_strided_slice %204 {offsets = [0, 1], sizes = [1, 500], strides = [1, 1]} : vector<16x512xf32> to vector<1x500xf32>
    %236 = vector.broadcast %229 : vector<8x1xf32> to vector<8x500xf32>
    %237 = vector.broadcast %235 : vector<1x500xf32> to vector<8x500xf32>
    %238 = arith.mulf %236, %237 : vector<8x500xf32>
    %239 = arith.addf %228, %238 : vector<8x500xf32>
    %c0_37 = arith.constant 0 : index
    %c3_38 = arith.constant 3 : index
    %240 = vector.load %arg1[%c0_37, %c3_38] : memref<8x16xf32, #tpu.memory_space<vmem>>, vector<8x1xf32>
    %241 = vector.extract_strided_slice %204 {offsets = [3, 0], sizes = [1, 500], strides = [1, 1]} : vector<16x512xf32> to vector<1x500xf32>
    %242 = vector.broadcast %240 : vector<8x1xf32> to vector<8x500xf32>
    %243 = vector.broadcast %241 : vector<1x500xf32> to vector<8x500xf32>
    %244 = arith.mulf %242, %243 : vector<8x500xf32>
    %245 = arith.addf %234, %244 : vector<8x500xf32>
    %246 = vector.extract_strided_slice %204 {offsets = [1, 1], sizes = [1, 500], strides = [1, 1]} : vector<16x512xf32> to vector<1x500xf32>
    %247 = vector.broadcast %240 : vector<8x1xf32> to vector<8x500xf32>
    %248 = vector.broadcast %246 : vector<1x500xf32> to vector<8x500xf32>
    %249 = arith.mulf %247, %248 : vector<8x500xf32>
    %250 = arith.addf %239, %249 : vector<8x500xf32>
    %c0_39 = arith.constant 0 : index
    %c4_40 = arith.constant 4 : index
    %251 = vector.load %arg1[%c0_39, %c4_40] : memref<8x16xf32, #tpu.memory_space<vmem>>, vector<8x1xf32>
    %252 = vector.extract_strided_slice %204 {offsets = [4, 0], sizes = [1, 500], strides = [1, 1]} : vector<16x512xf32> to vector<1x500xf32>
    %253 = vector.broadcast %251 : vector<8x1xf32> to vector<8x500xf32>
    %254 = vector.broadcast %252 : vector<1x500xf32> to vector<8x500xf32>
    %255 = arith.mulf %253, %254 : vector<8x500xf32>
    %256 = arith.addf %245, %255 : vector<8x500xf32>
    %257 = vector.extract_strided_slice %204 {offsets = [6, 0], sizes = [1, 500], strides = [1, 1]} : vector<16x512xf32> to vector<1x500xf32>
    %258 = vector.broadcast %251 : vector<8x1xf32> to vector<8x500xf32>
    %259 = vector.broadcast %257 : vector<1x500xf32> to vector<8x500xf32>
    %260 = arith.mulf %258, %259 : vector<8x500xf32>
    %261 = arith.addf %250, %260 : vector<8x500xf32>
    %c0_41 = arith.constant 0 : index
    %c5_42 = arith.constant 5 : index
    %262 = vector.load %arg1[%c0_41, %c5_42] : memref<8x16xf32, #tpu.memory_space<vmem>>, vector<8x1xf32>
    %263 = vector.extract_strided_slice %204 {offsets = [5, 0], sizes = [1, 500], strides = [1, 1]} : vector<16x512xf32> to vector<1x500xf32>
    %264 = vector.broadcast %262 : vector<8x1xf32> to vector<8x500xf32>
    %265 = vector.broadcast %263 : vector<1x500xf32> to vector<8x500xf32>
    %266 = arith.mulf %264, %265 : vector<8x500xf32>
    %267 = arith.addf %256, %266 : vector<8x500xf32>
    %268 = vector.extract_strided_slice %204 {offsets = [7, 0], sizes = [1, 500], strides = [1, 1]} : vector<16x512xf32> to vector<1x500xf32>
    %269 = vector.broadcast %262 : vector<8x1xf32> to vector<8x500xf32>
    %270 = vector.broadcast %268 : vector<1x500xf32> to vector<8x500xf32>
    %271 = arith.mulf %269, %270 : vector<8x500xf32>
    %272 = arith.addf %261, %271 : vector<8x500xf32>
    %c0_43 = arith.constant 0 : index
    %c6_44 = arith.constant 6 : index
    %273 = vector.load %arg1[%c0_43, %c6_44] : memref<8x16xf32, #tpu.memory_space<vmem>>, vector<8x1xf32>
    %274 = vector.extract_strided_slice %204 {offsets = [6, 0], sizes = [1, 500], strides = [1, 1]} : vector<16x512xf32> to vector<1x500xf32>
    %275 = vector.broadcast %273 : vector<8x1xf32> to vector<8x500xf32>
    %276 = vector.broadcast %274 : vector<1x500xf32> to vector<8x500xf32>
    %277 = arith.mulf %275, %276 : vector<8x500xf32>
    %278 = arith.addf %267, %277 : vector<8x500xf32>
    %279 = vector.extract_strided_slice %204 {offsets = [4, 1], sizes = [1, 500], strides = [1, 1]} : vector<16x512xf32> to vector<1x500xf32>
    %280 = vector.broadcast %273 : vector<8x1xf32> to vector<8x500xf32>
    %281 = vector.broadcast %279 : vector<1x500xf32> to vector<8x500xf32>
    %282 = arith.mulf %280, %281 : vector<8x500xf32>
    %283 = arith.addf %272, %282 : vector<8x500xf32>
    %c0_45 = arith.constant 0 : index
    %c7_46 = arith.constant 7 : index
    %284 = vector.load %arg1[%c0_45, %c7_46] : memref<8x16xf32, #tpu.memory_space<vmem>>, vector<8x1xf32>
    %285 = vector.extract_strided_slice %204 {offsets = [7, 0], sizes = [1, 500], strides = [1, 1]} : vector<16x512xf32> to vector<1x500xf32>
    %286 = vector.broadcast %284 : vector<8x1xf32> to vector<8x500xf32>
    %287 = vector.broadcast %285 : vector<1x500xf32> to vector<8x500xf32>
    %288 = arith.mulf %286, %287 : vector<8x500xf32>
    %289 = arith.addf %278, %288 : vector<8x500xf32>
    %290 = vector.extract_strided_slice %204 {offsets = [5, 1], sizes = [1, 500], strides = [1, 1]} : vector<16x512xf32> to vector<1x500xf32>
    %291 = vector.broadcast %284 : vector<8x1xf32> to vector<8x500xf32>
    %292 = vector.broadcast %290 : vector<1x500xf32> to vector<8x500xf32>
    %293 = arith.mulf %291, %292 : vector<8x500xf32>
    %294 = arith.addf %283, %293 : vector<8x500xf32>
    %c0_47 = arith.constant 0 : index
    %c8_48 = arith.constant 8 : index
    %295 = vector.load %arg1[%c0_47, %c8_48] : memref<8x16xf32, #tpu.memory_space<vmem>>, vector<8x1xf32>
    %296 = vector.extract_strided_slice %204 {offsets = [8, 0], sizes = [1, 500], strides = [1, 1]} : vector<16x512xf32> to vector<1x500xf32>
    %297 = vector.broadcast %295 : vector<8x1xf32> to vector<8x500xf32>
    %298 = vector.broadcast %296 : vector<1x500xf32> to vector<8x500xf32>
    %299 = arith.mulf %297, %298 : vector<8x500xf32>
    %300 = arith.addf %289, %299 : vector<8x500xf32>
    %301 = vector.extract_strided_slice %204 {offsets = [10, 0], sizes = [1, 500], strides = [1, 1]} : vector<16x512xf32> to vector<1x500xf32>
    %302 = vector.broadcast %295 : vector<8x1xf32> to vector<8x500xf32>
    %303 = vector.broadcast %301 : vector<1x500xf32> to vector<8x500xf32>
    %304 = arith.mulf %302, %303 : vector<8x500xf32>
    %305 = arith.addf %294, %304 : vector<8x500xf32>
    %c0_49 = arith.constant 0 : index
    %c9_50 = arith.constant 9 : index
    %306 = vector.load %arg1[%c0_49, %c9_50] : memref<8x16xf32, #tpu.memory_space<vmem>>, vector<8x1xf32>
    %307 = vector.extract_strided_slice %204 {offsets = [9, 0], sizes = [1, 500], strides = [1, 1]} : vector<16x512xf32> to vector<1x500xf32>
    %308 = vector.broadcast %306 : vector<8x1xf32> to vector<8x500xf32>
    %309 = vector.broadcast %307 : vector<1x500xf32> to vector<8x500xf32>
    %310 = arith.mulf %308, %309 : vector<8x500xf32>
    %311 = arith.addf %300, %310 : vector<8x500xf32>
    %312 = vector.extract_strided_slice %204 {offsets = [11, 0], sizes = [1, 500], strides = [1, 1]} : vector<16x512xf32> to vector<1x500xf32>
    %313 = vector.broadcast %306 : vector<8x1xf32> to vector<8x500xf32>
    %314 = vector.broadcast %312 : vector<1x500xf32> to vector<8x500xf32>
    %315 = arith.mulf %313, %314 : vector<8x500xf32>
    %316 = arith.addf %305, %315 : vector<8x500xf32>
    %c0_51 = arith.constant 0 : index
    %c10_52 = arith.constant 10 : index
    %317 = vector.load %arg1[%c0_51, %c10_52] : memref<8x16xf32, #tpu.memory_space<vmem>>, vector<8x1xf32>
    %318 = vector.extract_strided_slice %204 {offsets = [10, 0], sizes = [1, 500], strides = [1, 1]} : vector<16x512xf32> to vector<1x500xf32>
    %319 = vector.broadcast %317 : vector<8x1xf32> to vector<8x500xf32>
    %320 = vector.broadcast %318 : vector<1x500xf32> to vector<8x500xf32>
    %321 = arith.mulf %319, %320 : vector<8x500xf32>
    %322 = arith.addf %311, %321 : vector<8x500xf32>
    %323 = vector.extract_strided_slice %204 {offsets = [8, 1], sizes = [1, 500], strides = [1, 1]} : vector<16x512xf32> to vector<1x500xf32>
    %324 = vector.broadcast %317 : vector<8x1xf32> to vector<8x500xf32>
    %325 = vector.broadcast %323 : vector<1x500xf32> to vector<8x500xf32>
    %326 = arith.mulf %324, %325 : vector<8x500xf32>
    %327 = arith.addf %316, %326 : vector<8x500xf32>
    %c0_53 = arith.constant 0 : index
    %c11_54 = arith.constant 11 : index
    %328 = vector.load %arg1[%c0_53, %c11_54] : memref<8x16xf32, #tpu.memory_space<vmem>>, vector<8x1xf32>
    %329 = vector.extract_strided_slice %204 {offsets = [11, 0], sizes = [1, 500], strides = [1, 1]} : vector<16x512xf32> to vector<1x500xf32>
    %330 = vector.broadcast %328 : vector<8x1xf32> to vector<8x500xf32>
    %331 = vector.broadcast %329 : vector<1x500xf32> to vector<8x500xf32>
    %332 = arith.mulf %330, %331 : vector<8x500xf32>
    %333 = arith.addf %322, %332 : vector<8x500xf32>
    %334 = vector.extract_strided_slice %204 {offsets = [9, 1], sizes = [1, 500], strides = [1, 1]} : vector<16x512xf32> to vector<1x500xf32>
    %335 = vector.broadcast %328 : vector<8x1xf32> to vector<8x500xf32>
    %336 = vector.broadcast %334 : vector<1x500xf32> to vector<8x500xf32>
    %337 = arith.mulf %335, %336 : vector<8x500xf32>
    %338 = arith.addf %327, %337 : vector<8x500xf32>
    %c0_55 = arith.constant 0 : index
    %c12_56 = arith.constant 12 : index
    %339 = vector.load %arg1[%c0_55, %c12_56] : memref<8x16xf32, #tpu.memory_space<vmem>>, vector<8x1xf32>
    %340 = vector.extract_strided_slice %204 {offsets = [12, 0], sizes = [1, 500], strides = [1, 1]} : vector<16x512xf32> to vector<1x500xf32>
    %341 = vector.broadcast %339 : vector<8x1xf32> to vector<8x500xf32>
    %342 = vector.broadcast %340 : vector<1x500xf32> to vector<8x500xf32>
    %343 = arith.mulf %341, %342 : vector<8x500xf32>
    %344 = arith.addf %333, %343 : vector<8x500xf32>
    %345 = vector.extract_strided_slice %204 {offsets = [14, 0], sizes = [1, 500], strides = [1, 1]} : vector<16x512xf32> to vector<1x500xf32>
    %346 = vector.broadcast %339 : vector<8x1xf32> to vector<8x500xf32>
    %347 = vector.broadcast %345 : vector<1x500xf32> to vector<8x500xf32>
    %348 = arith.mulf %346, %347 : vector<8x500xf32>
    %349 = arith.addf %338, %348 : vector<8x500xf32>
    %c0_57 = arith.constant 0 : index
    %c13_58 = arith.constant 13 : index
    %350 = vector.load %arg1[%c0_57, %c13_58] : memref<8x16xf32, #tpu.memory_space<vmem>>, vector<8x1xf32>
    %351 = vector.extract_strided_slice %204 {offsets = [13, 0], sizes = [1, 500], strides = [1, 1]} : vector<16x512xf32> to vector<1x500xf32>
    %352 = vector.broadcast %350 : vector<8x1xf32> to vector<8x500xf32>
    %353 = vector.broadcast %351 : vector<1x500xf32> to vector<8x500xf32>
    %354 = arith.mulf %352, %353 : vector<8x500xf32>
    %355 = arith.addf %344, %354 : vector<8x500xf32>
    %356 = vector.extract_strided_slice %204 {offsets = [15, 0], sizes = [1, 500], strides = [1, 1]} : vector<16x512xf32> to vector<1x500xf32>
    %357 = vector.broadcast %350 : vector<8x1xf32> to vector<8x500xf32>
    %358 = vector.broadcast %356 : vector<1x500xf32> to vector<8x500xf32>
    %359 = arith.mulf %357, %358 : vector<8x500xf32>
    %360 = arith.addf %349, %359 : vector<8x500xf32>
    %c0_59 = arith.constant 0 : index
    %c14_60 = arith.constant 14 : index
    %361 = vector.load %arg1[%c0_59, %c14_60] : memref<8x16xf32, #tpu.memory_space<vmem>>, vector<8x1xf32>
    %362 = vector.extract_strided_slice %204 {offsets = [14, 0], sizes = [1, 500], strides = [1, 1]} : vector<16x512xf32> to vector<1x500xf32>
    %363 = vector.broadcast %361 : vector<8x1xf32> to vector<8x500xf32>
    %364 = vector.broadcast %362 : vector<1x500xf32> to vector<8x500xf32>
    %365 = arith.mulf %363, %364 : vector<8x500xf32>
    %366 = arith.addf %355, %365 : vector<8x500xf32>
    %367 = vector.extract_strided_slice %204 {offsets = [12, 1], sizes = [1, 500], strides = [1, 1]} : vector<16x512xf32> to vector<1x500xf32>
    %368 = vector.broadcast %361 : vector<8x1xf32> to vector<8x500xf32>
    %369 = vector.broadcast %367 : vector<1x500xf32> to vector<8x500xf32>
    %370 = arith.mulf %368, %369 : vector<8x500xf32>
    %371 = arith.addf %360, %370 : vector<8x500xf32>
    %c0_61 = arith.constant 0 : index
    %c15_62 = arith.constant 15 : index
    %372 = vector.load %arg1[%c0_61, %c15_62] : memref<8x16xf32, #tpu.memory_space<vmem>>, vector<8x1xf32>
    %373 = vector.extract_strided_slice %204 {offsets = [15, 0], sizes = [1, 500], strides = [1, 1]} : vector<16x512xf32> to vector<1x500xf32>
    %374 = vector.broadcast %372 : vector<8x1xf32> to vector<8x500xf32>
    %375 = vector.broadcast %373 : vector<1x500xf32> to vector<8x500xf32>
    %376 = arith.mulf %374, %375 : vector<8x500xf32>
    %377 = arith.addf %366, %376 : vector<8x500xf32>
    %378 = vector.extract_strided_slice %204 {offsets = [13, 1], sizes = [1, 500], strides = [1, 1]} : vector<16x512xf32> to vector<1x500xf32>
    %379 = vector.broadcast %372 : vector<8x1xf32> to vector<8x500xf32>
    %380 = vector.broadcast %378 : vector<1x500xf32> to vector<8x500xf32>
    %381 = arith.mulf %379, %380 : vector<8x500xf32>
    %382 = arith.addf %371, %381 : vector<8x500xf32>
    %383 = vector.broadcast %4 : vector<1x500xf32> to vector<8x500xf32>
    %384 = arith.mulf %382, %383 : vector<8x500xf32>
    %cst_63 = arith.constant dense<0.000000e+00> : vector<8xf32>
    %385 = vector.multi_reduction <add>, %377, %cst_63 [1] : vector<8x500xf32> to vector<8xf32>
    %386 = vector.shape_cast %385 : vector<8xf32> to vector<8x1xf32>
    %387 = arith.addf %194, %386 : vector<8x1xf32>
    %cst_64 = arith.constant dense<0.000000e+00> : vector<8xf32>
    %388 = vector.multi_reduction <add>, %384, %cst_64 [1] : vector<8x500xf32> to vector<8xf32>
    %389 = vector.shape_cast %388 : vector<8xf32> to vector<8x1xf32>
    %390 = arith.addf %387, %389 : vector<8x1xf32>
    %391 = arith.mulf %377, %377 : vector<8x500xf32>
    %cst_65 = arith.constant dense<0.000000e+00> : vector<8xf32>
    %392 = vector.multi_reduction <add>, %391, %cst_65 [1] : vector<8x500xf32> to vector<8xf32>
    %393 = vector.shape_cast %392 : vector<8xf32> to vector<8x1xf32>
    %394 = arith.addf %202, %393 : vector<8x1xf32>
    %395 = arith.mulf %384, %384 : vector<8x500xf32>
    %cst_66 = arith.constant dense<0.000000e+00> : vector<8xf32>
    %396 = vector.multi_reduction <add>, %395, %cst_66 [1] : vector<8x500xf32> to vector<8xf32>
    %397 = vector.shape_cast %396 : vector<8xf32> to vector<8x1xf32>
    %398 = arith.addf %394, %397 : vector<8x1xf32>
    %cst_67 = arith.constant 5.00500493E-4 : f32
    %399 = vector.broadcast %cst_67 : f32 to vector<8x1xf32>
    %400 = arith.mulf %390, %399 : vector<8x1xf32>
    %cst_68 = arith.constant 5.00500493E-4 : f32
    %401 = vector.broadcast %cst_68 : f32 to vector<8x1xf32>
    %402 = arith.mulf %398, %401 : vector<8x1xf32>
    %403 = arith.mulf %400, %400 : vector<8x1xf32>
    %404 = arith.subf %402, %403 : vector<8x1xf32>
    %c0_69 = arith.constant 0 : index
    %c0_70 = arith.constant 0 : index
    %405 = vector.load %arg3[%c0_69, %c0_70] : memref<8x1xf32, #tpu.memory_space<vmem>>, vector<8x1xf32>
    %cst_71 = arith.constant 9.99999974E-6 : f32
    %406 = vector.broadcast %cst_71 : f32 to vector<8x1xf32>
    %407 = arith.addf %404, %406 : vector<8x1xf32>
    %408 = math.rsqrt %407 : vector<8x1xf32>
    %409 = arith.mulf %405, %408 : vector<8x1xf32>
    %c0_72 = arith.constant 0 : index
    %c0_73 = arith.constant 0 : index
    %410 = vector.load %arg4[%c0_72, %c0_73] : memref<8x1xf32, #tpu.memory_space<vmem>>, vector<8x1xf32>
    %411 = arith.mulf %400, %409 : vector<8x1xf32>
    %412 = arith.subf %410, %411 : vector<8x1xf32>
    %cst_74 = arith.constant 0.000000e+00 : f32
    %413 = vector.broadcast %cst_74 : f32 to vector<1x1xf32>
    %cst_75 = arith.constant 0.000000e+00 : f32
    %414 = vector.broadcast %cst_75 : f32 to vector<1x1xf32>
    %415 = vector.broadcast %409 : vector<8x1xf32> to vector<8x500xf32>
    %416 = arith.mulf %181, %415 : vector<8x500xf32>
    %417 = vector.broadcast %412 : vector<8x1xf32> to vector<8x500xf32>
    %418 = arith.addf %416, %417 : vector<8x500xf32>
    %419 = vector.broadcast %409 : vector<8x1xf32> to vector<8x500xf32>
    %420 = arith.mulf %188, %419 : vector<8x500xf32>
    %421 = vector.broadcast %412 : vector<8x1xf32> to vector<8x500xf32>
    %422 = arith.addf %420, %421 : vector<8x500xf32>
    %cst_76 = arith.constant 0.000000e+00 : f32
    %423 = vector.broadcast %cst_76 : f32 to vector<8x498xf32>
    %c0_77 = arith.constant 0 : index
    %c0_78 = arith.constant 0 : index
    %424 = vector.load %arg2[%c0_77, %c0_78] : memref<8x4xf32, #tpu.memory_space<vmem>>, vector<8x1xf32>
    %425 = vector.extract_strided_slice %418 {offsets = [0, 0], sizes = [8, 498], strides = [1, 1]} : vector<8x500xf32> to vector<8x498xf32>
    %426 = vector.broadcast %424 : vector<8x1xf32> to vector<8x498xf32>
    %427 = arith.mulf %426, %425 : vector<8x498xf32>
    %428 = arith.addf %423, %427 : vector<8x498xf32>
    %c0_79 = arith.constant 0 : index
    %c1_80 = arith.constant 1 : index
    %429 = vector.load %arg2[%c0_79, %c1_80] : memref<8x4xf32, #tpu.memory_space<vmem>>, vector<8x1xf32>
    %430 = vector.extract_strided_slice %422 {offsets = [0, 0], sizes = [8, 498], strides = [1, 1]} : vector<8x500xf32> to vector<8x498xf32>
    %431 = vector.broadcast %429 : vector<8x1xf32> to vector<8x498xf32>
    %432 = arith.mulf %431, %430 : vector<8x498xf32>
    %433 = arith.addf %428, %432 : vector<8x498xf32>
    %c0_81 = arith.constant 0 : index
    %c2_82 = arith.constant 2 : index
    %434 = vector.load %arg2[%c0_81, %c2_82] : memref<8x4xf32, #tpu.memory_space<vmem>>, vector<8x1xf32>
    %435 = vector.extract_strided_slice %418 {offsets = [0, 1], sizes = [8, 498], strides = [1, 1]} : vector<8x500xf32> to vector<8x498xf32>
    %436 = vector.broadcast %434 : vector<8x1xf32> to vector<8x498xf32>
    %437 = arith.mulf %436, %435 : vector<8x498xf32>
    %438 = arith.addf %433, %437 : vector<8x498xf32>
    %c0_83 = arith.constant 0 : index
    %c3_84 = arith.constant 3 : index
    %439 = vector.load %arg2[%c0_83, %c3_84] : memref<8x4xf32, #tpu.memory_space<vmem>>, vector<8x1xf32>
    %440 = vector.extract_strided_slice %422 {offsets = [0, 1], sizes = [8, 498], strides = [1, 1]} : vector<8x500xf32> to vector<8x498xf32>
    %441 = vector.broadcast %439 : vector<8x1xf32> to vector<8x498xf32>
    %442 = arith.mulf %441, %440 : vector<8x498xf32>
    %443 = arith.addf %438, %442 : vector<8x498xf32>
    %cst_85 = arith.constant dense<0.000000e+00> : vector<498xf32>
    %444 = vector.multi_reduction <add>, %443, %cst_85 [0] : vector<8x498xf32> to vector<498xf32>
    %445 = vector.shape_cast %444 : vector<498xf32> to vector<1x498xf32>
    %cst_86 = arith.constant dense<0.000000e+00> : vector<1xf32>
    %446 = vector.multi_reduction <add>, %445, %cst_86 [1] : vector<1x498xf32> to vector<1xf32>
    %447 = vector.shape_cast %446 : vector<1xf32> to vector<1x1xf32>
    %448 = arith.addf %413, %447 : vector<1x1xf32>
    %449 = arith.mulf %445, %445 : vector<1x498xf32>
    %cst_87 = arith.constant dense<0.000000e+00> : vector<1xf32>
    %450 = vector.multi_reduction <add>, %449, %cst_87 [1] : vector<1x498xf32> to vector<1xf32>
    %451 = vector.shape_cast %450 : vector<1xf32> to vector<1x1xf32>
    %452 = arith.addf %414, %451 : vector<1x1xf32>
    %453 = vector.broadcast %409 : vector<8x1xf32> to vector<8x500xf32>
    %454 = arith.mulf %377, %453 : vector<8x500xf32>
    %455 = vector.broadcast %412 : vector<8x1xf32> to vector<8x500xf32>
    %456 = arith.addf %454, %455 : vector<8x500xf32>
    %457 = vector.broadcast %409 : vector<8x1xf32> to vector<8x500xf32>
    %458 = arith.mulf %384, %457 : vector<8x500xf32>
    %459 = vector.broadcast %412 : vector<8x1xf32> to vector<8x500xf32>
    %460 = arith.addf %458, %459 : vector<8x500xf32>
    %cst_88 = arith.constant 0.000000e+00 : f32
    %461 = vector.broadcast %cst_88 : f32 to vector<8x498xf32>
    %c0_89 = arith.constant 0 : index
    %c0_90 = arith.constant 0 : index
    %462 = vector.load %arg2[%c0_89, %c0_90] : memref<8x4xf32, #tpu.memory_space<vmem>>, vector<8x1xf32>
    %463 = vector.extract_strided_slice %456 {offsets = [0, 0], sizes = [8, 498], strides = [1, 1]} : vector<8x500xf32> to vector<8x498xf32>
    %464 = vector.broadcast %462 : vector<8x1xf32> to vector<8x498xf32>
    %465 = arith.mulf %464, %463 : vector<8x498xf32>
    %466 = arith.addf %461, %465 : vector<8x498xf32>
    %c0_91 = arith.constant 0 : index
    %c1_92 = arith.constant 1 : index
    %467 = vector.load %arg2[%c0_91, %c1_92] : memref<8x4xf32, #tpu.memory_space<vmem>>, vector<8x1xf32>
    %468 = vector.extract_strided_slice %460 {offsets = [0, 0], sizes = [8, 498], strides = [1, 1]} : vector<8x500xf32> to vector<8x498xf32>
    %469 = vector.broadcast %467 : vector<8x1xf32> to vector<8x498xf32>
    %470 = arith.mulf %469, %468 : vector<8x498xf32>
    %471 = arith.addf %466, %470 : vector<8x498xf32>
    %c0_93 = arith.constant 0 : index
    %c2_94 = arith.constant 2 : index
    %472 = vector.load %arg2[%c0_93, %c2_94] : memref<8x4xf32, #tpu.memory_space<vmem>>, vector<8x1xf32>
    %473 = vector.extract_strided_slice %456 {offsets = [0, 1], sizes = [8, 498], strides = [1, 1]} : vector<8x500xf32> to vector<8x498xf32>
    %474 = vector.broadcast %472 : vector<8x1xf32> to vector<8x498xf32>
    %475 = arith.mulf %474, %473 : vector<8x498xf32>
    %476 = arith.addf %471, %475 : vector<8x498xf32>
    %c0_95 = arith.constant 0 : index
    %c3_96 = arith.constant 3 : index
    %477 = vector.load %arg2[%c0_95, %c3_96] : memref<8x4xf32, #tpu.memory_space<vmem>>, vector<8x1xf32>
    %478 = vector.extract_strided_slice %460 {offsets = [0, 1], sizes = [8, 498], strides = [1, 1]} : vector<8x500xf32> to vector<8x498xf32>
    %479 = vector.broadcast %477 : vector<8x1xf32> to vector<8x498xf32>
    %480 = arith.mulf %479, %478 : vector<8x498xf32>
    %481 = arith.addf %476, %480 : vector<8x498xf32>
    %cst_97 = arith.constant dense<0.000000e+00> : vector<498xf32>
    %482 = vector.multi_reduction <add>, %481, %cst_97 [0] : vector<8x498xf32> to vector<498xf32>
    %483 = vector.shape_cast %482 : vector<498xf32> to vector<1x498xf32>
    %cst_98 = arith.constant dense<0.000000e+00> : vector<1xf32>
    %484 = vector.multi_reduction <add>, %483, %cst_98 [1] : vector<1x498xf32> to vector<1xf32>
    %485 = vector.shape_cast %484 : vector<1xf32> to vector<1x1xf32>
    %486 = arith.addf %448, %485 : vector<1x1xf32>
    %487 = arith.mulf %483, %483 : vector<1x498xf32>
    %cst_99 = arith.constant dense<0.000000e+00> : vector<1xf32>
    %488 = vector.multi_reduction <add>, %487, %cst_99 [1] : vector<1x498xf32> to vector<1xf32>
    %489 = vector.shape_cast %488 : vector<1xf32> to vector<1x1xf32>
    %490 = arith.addf %452, %489 : vector<1x1xf32>
    %cst_100 = arith.constant 0.00100401603 : f32
    %491 = vector.broadcast %cst_100 : f32 to vector<1x1xf32>
    %492 = arith.mulf %486, %491 : vector<1x1xf32>
    %cst_101 = arith.constant 0.00100401603 : f32
    %493 = vector.broadcast %cst_101 : f32 to vector<1x1xf32>
    %494 = arith.mulf %490, %493 : vector<1x1xf32>
    %495 = arith.mulf %492, %492 : vector<1x1xf32>
    %496 = arith.subf %494, %495 : vector<1x1xf32>
    %c0_102 = arith.constant 0 : index
    %c0_103 = arith.constant 0 : index
    %497 = vector.load %arg5[%c0_102, %c0_103] : memref<1x1xf32, #tpu.memory_space<vmem>>, vector<1x1xf32>
    %cst_104 = arith.constant 9.99999974E-6 : f32
    %498 = vector.broadcast %cst_104 : f32 to vector<1x1xf32>
    %499 = arith.addf %496, %498 : vector<1x1xf32>
    %500 = math.rsqrt %499 : vector<1x1xf32>
    %501 = arith.mulf %497, %500 : vector<1x1xf32>
    %c0_105 = arith.constant 0 : index
    %c0_106 = arith.constant 0 : index
    %502 = vector.load %arg6[%c0_105, %c0_106] : memref<1x1xf32, #tpu.memory_space<vmem>>, vector<1x1xf32>
    %503 = arith.mulf %492, %501 : vector<1x1xf32>
    %504 = arith.subf %502, %503 : vector<1x1xf32>
    %cst_107 = arith.constant 0.000000e+00 : f32
    %505 = vector.broadcast %cst_107 : f32 to vector<2x512xf32>
    %c0_108 = arith.constant 0 : index
    %c0_109 = arith.constant 0 : index
    %506 = vector.load %arg10[%c0_108, %c0_109] : memref<2x512xf32, #tpu.memory_space<vmem>>, vector<2x512xf32>
    tpu.vector_store %arg10[%c0_108, %c0_109], %505 {strides = array<i32>} : memref<2x512xf32, #tpu.memory_space<vmem>>, vector<2x512xf32>,
    %507 = vector.broadcast %501 : vector<1x1xf32> to vector<1x498xf32>
    %508 = arith.mulf %445, %507 : vector<1x498xf32>
    %509 = vector.broadcast %504 : vector<1x1xf32> to vector<1x498xf32>
    %510 = arith.addf %508, %509 : vector<1x498xf32>
    %c0_110 = arith.constant 0 : index
    %c0_111 = arith.constant 0 : index
    %511 = vector.load %arg10[%c0_110, %c0_111] : memref<2x512xf32, #tpu.memory_space<vmem>>, vector<1x498xf32>
    tpu.vector_store %arg10[%c0_110, %c0_111], %510 {strides = array<i32>} : memref<2x512xf32, #tpu.memory_space<vmem>>, vector<1x498xf32>,
    %512 = vector.broadcast %501 : vector<1x1xf32> to vector<1x498xf32>
    %513 = arith.mulf %483, %512 : vector<1x498xf32>
    %514 = vector.broadcast %504 : vector<1x1xf32> to vector<1x498xf32>
    %515 = arith.addf %513, %514 : vector<1x498xf32>
    %c1_112 = arith.constant 1 : index
    %c0_113 = arith.constant 0 : index
    %516 = vector.load %arg10[%c1_112, %c0_113] : memref<2x512xf32, #tpu.memory_space<vmem>>, vector<1x498xf32>
    tpu.vector_store %arg10[%c1_112, %c0_113], %515 {strides = array<i32>} : memref<2x512xf32, #tpu.memory_space<vmem>>, vector<1x498xf32>,
    %c0_114 = arith.constant 0 : index
    %c0_115 = arith.constant 0 : index
    %517 = vector.load %arg10[%c0_114, %c0_115] : memref<2x512xf32, #tpu.memory_space<vmem>>, vector<2x512xf32>
    %c0_116 = arith.constant 0 : index
    %c0_117 = arith.constant 0 : index
    %518 = vector.load %arg7[%c0_116, %c0_117] : memref<512x128xf32, #tpu.memory_space<vmem>>, vector<512x128xf32>
    %cst_118 = arith.constant dense<0.000000e+00> : vector<2x128xf32>
    %519 = tpu.matmul %517, %518, %cst_118 {dimension_numbers = #tpu.dot_dimension_numbers<[1], [0], [0], [1], [0, 0, 1, 1], [], []>} : vector<2x512xf32>, vector<512x128xf32>, vector<2x128xf32> -> vector<2x128xf32>
    %c0_119 = arith.constant 0 : index
    %c0_120 = arith.constant 0 : index
    %520 = vector.load %arg8[%c0_119, %c0_120] : memref<1x128xf32, #tpu.memory_space<vmem>>, vector<1x128xf32>
    %521 = vector.broadcast %520 : vector<1x128xf32> to vector<2x128xf32>
    %522 = arith.addf %519, %521 : vector<2x128xf32>
    %c0_121 = arith.constant 0 : index
    %c0_122 = arith.constant 0 : index
    %523 = vector.load %arg9[%c0_121, %c0_122] : memref<2x128xf32, #tpu.memory_space<vmem>>, vector<2x128xf32>
    tpu.vector_store %arg9[%c0_121, %c0_122], %522 {strides = array<i32>} : memref<2x128xf32, #tpu.memory_space<vmem>>, vector<2x128xf32>,
    return
  }
}

</mosaic_0001>

<bundles_post_ra>
// kernel: _lambda_.1
= control target key start
LH: loop header
LB: loop body
LE: loop exit
PB: predicated region body
PF: predicated region fallthrough
CT: control target
= control target key end

     0   :  { %s4508_s0 = inlined_call_operand.vmem [shape: f32[2,16,512], index: 0, kind: input, shape index: {}]   ;;  %s4509_s1 = inlined_call_operand.vmem [shape: f32[8,16], index: 1, kind: input, shape index: {}]   ;;  %s4510_s2 = inlined_call_operand.vmem [shape: f32[8,4], index: 2, kind: input, shape index: {}]   ;;  %s4511_s3 = inlined_call_operand.vmem [shape: f32[8,1], index: 3, kind: input, shape index: {}]   ;;  %s4512_s4 = inlined_call_operand.vmem [shape: f32[8,1], index: 4, kind: input, shape index: {}]   ;;  %s4513_s5 = inlined_call_operand.<no memory space> [shape: f32[1,1], index: 5, kind: input, shape index: {}]   ;;  %s4514_s7 = inlined_call_operand.vmem [shape: f32[512,128], index: 7, kind: input, shape index: {}]   ;;  %s4515_s8 = inlined_call_operand.vmem [shape: f32[1,128], index: 8, kind: input, shape index: {}]   ;;  %s4516_s9 = inlined_call_operand.hbm [shape: f32[2,128], index: 9, kind: output, shape index: {}]   ;;  %s4517_s6 = inlined_call_operand.<no memory space> [shape: f32[1,1], index: 6, kind: input, shape index: {}]  }
   0x1   :  { %v14_v0 = vstv %s4513_s5  ;;  %v16_v1 = vstv %s4517_s6 }
   0x2   :  { %15 = vst [vmem:[#allocation3] sm:$0x1] %v14_v0  ;;  %17 = vst [vmem:[#allocation4] sm:$0x1] %v16_v1 }
   0x3   :  { %v62_v2 = vld [vmem:[%s4509_s1] sm:$0xff]  ;;  %v2421_v3 = vmov 6   ;;  %v2422_v4 = vmov 2  }
   0x4   :  { %2372 = vset.pattern.permute.xlu1 %v2421_v3  ;;  %2370 = vset.pattern.permute.xlu0 %v2422_v4 }
   0x5   :  { %352 = vperm.xlu1 %2372, %v62_v2   ;;  %169 = vperm.xlu0 %2370, %v62_v2  }
   0x6   :  { %18 = vsyncpa [#allocation6], 0  ;;  %v2423_v5 = vmov 7   ;;  %v4519_v6 = vmov 3   ;;  %v2425_v7 = vmov 10   ;;  %v2426_v8 = vmov 11  }
   0x7   :  { %v2427_v9 = vmov 14   ;;  %v2428_v10 = vmov 5   ;;  %v2429_v11 = vmov 15   ;;  %v2430_v12 = vmov 8   ;;  %v2513_v22 = vld [vmem:[%s4508_s0 + $0x10] sm:$0xff]  ;;  %v2518_v23 = vld [vmem:[%s4508_s0] sm:$0xff] }
   0x8   :  { %v4518_v13 = vmov 1   ;;  %v4520_v14 = vmov 0   ;;  %v2433_v15 = vmov 4   ;;  %v2434_v16 = vmov 9   ;;  %v2523_v24 = vld [vmem:[%s4508_s0 + $0x8] sm:$0xff]  ;;  %v2531_v26 = vld [vmem:[%s4508_s0 + $0x18] sm:$0xff] }
   0x9   :  { %2373 = vset.pattern.permute.xlu1 %v2423_v5  ;;  %2371 = vset.pattern.permute.xlu0 %v4519_v6  ;;  %v2435_v17 = vmov 12   ;;  %v2436_v18 = vmov 13   ;;  %v4522_v19 = vlaneseq  ;;  %v2536_v27 = vld [vmem:[%s4508_s0 + $0x50] sm:$0xff]  ;;  %v2541_v28 = vld [vmem:[%s4508_s0 + $0x58] sm:$0xff]  ;;  %v2546_v29 = vld [vmem:[%s4508_s0 + $0x40] sm:$0xff]  ;;  %vm196_vm0 = vcmask 1039360  }
   0xa   :  { %391 = vperm.xlu1 %2373, %v62_v2   ;;  %209 = vperm.xlu0 %2371, %v62_v2   ;;  %v2566_v34 = vld [vmem:[%s4508_s0 + $0x48] sm:$0xff]  ;;  %vm799_vm1 = vcmask 949248   ;;  %vm1690_vm3 = vcmask 932864   ;;  %s2441_s16 = smov [#allocation5]  }
   0xb   :  { %v2505_v20 = vshrl.u32 %v4522_v19, 7  ;;  %v2752_v6 = vld [vmem:[%s4508_s0 + $0x28] sm:$0xff]  ;;  %v2762_v19 = vld [vmem:[%s4508_s0 + $0x38] sm:$0xff]  ;;  %s2197_s17 = sshll.u32 %s2441_s16, 4  ;;  %s2198_s17 = int_to_ptr.vmem [resolvable:$true] %s2197_s17 }
   0xc   :  { %s2397_s18 = scalar_lea.vmem %s2198_s17, 32  ;;  %p2402_p1 = scmp.lt.s32.totalorder %s2198_s17, %s2198_s17 }
   0xd   :  { %4648 = vst [vmem:[#allocation8_spill] sm:$0xff] %v2505_v20  ;;  %v2508_v21 = vsub.s32 0, %v2505_v20  ;;  %v2526_v25 = vsub.s32 1, %v2505_v20  ;;  %v2549_v30 = vsub.s32 2, %v2505_v20  ;;  %v2569_v35 = vsub.s32 3, %v2505_v20  ;;  %p2398_p0 = scmp.ne.s32.totalorder %s2198_s17, %s2397_s18  ;;  %p2403_p2 = scmp.lt.s32.totalorder %s2397_s18, %s2397_s18 }
   0xe   :  { %2374 = vset.pattern.permute.xlu1 %v2425_v7  ;;  %2375 = vset.pattern.permute.xlu0 %v2426_v8  ;;  %v2620_v48 = vsub.s32 4, %v2505_v20  ;;  %v2667_v60 = vsub.s32 5, %v2505_v20  ;;  %v2710_v8 = vsub.s32 6, %v2505_v20 }
   0xf   :  { %534 = vperm.xlu1 %2374, %v62_v2   ;;  %573 = vperm.xlu0 %2375, %v62_v2   ;;  %4649 = vst [vmem:[#allocation9_spill] sm:$0xff] %v2508_v21  ;;  %v2553_v31 = vrot.slane %v2513_v22, %v2508_v21  ;;  %v2557_v32 = vrot.slane %v2518_v23, %v2508_v21  ;;  %p2404_p3 = por %p2403_p2, %p2402_p1 }
  0x10   :  { %v2561_v33 = vrot.slane %v2523_v24, %v2508_v21  ;;  %v2573_v36 = vrot.slane %v2518_v23, %v2526_v25  ;;  %v2577_v37 = vrot.slane %v2531_v26, %v2508_v21  ;;  %v2581_v38 = vrot.slane %v2513_v22, %v2526_v25 }
  0x11   :  { %v2585_v39 = vrot.slane %v2523_v24, %v2526_v25  ;;  %v2589_v40 = vrot.slane %v2536_v27, %v2508_v21  ;;  %v2593_v41 = vrot.slane %v2531_v26, %v2526_v25  ;;  %v2597_v42 = vrot.slane %v2541_v28, %v2508_v21  ;;  %p2405_p4 = pnand %p2404_p3, %p2398_p0 }
  0x12   :  { %4650 = vst [vmem:[#allocation10_spill] sm:$0xff] %v2577_v37  ;;  %v2601_v43 = vrot.slane %v2546_v29, %v2508_v21  ;;  %v2605_v44 = vrot.slane %v2566_v34, %v2526_v25  ;;  %v2609_v45 = vrot.slane %v2566_v34, %v2508_v21  ;;  %v2613_v46 = vrot.slane %v2546_v29, %v2526_v25 }
  0x13   :  { %2376 = vset.pattern.permute.xlu1 %v2427_v9  ;;  %2380 = vset.pattern.permute.xlu0 %v2428_v10  ;;  %4651 = vst [vmem:[#allocation11_spill] sm:$0xff] %v2593_v41  ;;  %v2617_v47 = vrot.slane %v2513_v22, %v2549_v30  ;;  %v2624_v49 = vrot.slane %v2513_v22, %v2569_v35 }
  0x14   :  { %716 = vperm.xlu1 %2376, %v62_v2   ;;  %300 = vperm.xlu0 %2380, %v62_v2   ;;  %v2628_v50 = vrot.slane %v2536_v27, %v2526_v25  ;;  %v2632_v51 = vrot.slane %v2523_v24, %v2549_v30  ;;  %v2636_v52 = vrot.slane %v2523_v24, %v2569_v35 }
  0x15   :  { %4652 = vst [vmem:[#allocation12_spill] sm:$0xff] %v2617_v47  ;;  %4653 = vst [vmem:[#allocation13_spill] sm:$0xff] %v2624_v49  ;;  %v2640_v53 = vrot.slane %v2541_v28, %v2526_v25  ;;  %v2644_v54 = vrot.slane %v2518_v23, %v2549_v30  ;;  %v2648_v55 = vrot.slane %v2518_v23, %v2569_v35 }
  0x16   :  { %v2652_v56 = vrot.slane %v2531_v26, %v2549_v30  ;;  %v2656_v57 = vrot.slane %v2536_v27, %v2549_v30  ;;  %v2660_v58 = vrot.slane %v2541_v28, %v2549_v30  ;;  %v2664_v59 = vrot.slane %v2546_v29, %v2549_v30 }
  0x17   :  { %v2671_v61 = vrot.slane %v2531_v26, %v2569_v35  ;;  %v2675_v62 = vrot.slane %v2536_v27, %v2569_v35  ;;  %v2679_v63 = vrot.slane %v2566_v34, %v2549_v30  ;;  %v2683_v0 = vrot.slane %v2518_v23, %v2620_v48 }
  0x18   :  { %2377 = vset.pattern.permute.xlu1 %v2429_v11  ;;  %2381 = vset.pattern.permute.xlu0 %v2430_v12  ;;  %4654 = vst [vmem:[#allocation14_spill] sm:$0xff] %v2652_v56  ;;  %4655 = vst [vmem:[#allocation15_spill] sm:$0xff] %v2656_v57  ;;  %v2687_v1 = vrot.slane %v2541_v28, %v2569_v35  ;;  %v2695_v3 = vrot.slane %v2566_v34, %v2569_v35  ;;  %v2798_v57 = vld [vmem:[%s4508_s0 + $0x78] sm:$0xff] }
  0x19   :  { %755 = vperm.xlu1 %2377, %v62_v2   ;;  %430 = vperm.xlu0 %2381, %v62_v2   ;;  %4656 = vst [vmem:[#allocation16_spill] sm:$0xff] %v2660_v58  ;;  %4657 = vst [vmem:[#allocation17_spill] sm:$0xff] %v2664_v59  ;;  %v2703_v5 = vrot.slane %v2531_v26, %v2620_v48  ;;  %v2707_v7 = vrot.slane %v2523_v24, %v2620_v48  ;;  %v2793_v58 = vld [vmem:[%s4508_s0 + $0x70] sm:$0xff] }
  0x1a   :  { %4658 = vst [vmem:[#allocation18_spill] sm:$0xff] %v2671_v61  ;;  %4659 = vst [vmem:[#allocation19_spill] sm:$0xff] %v2675_v62  ;;  %v2714_v9 = vrot.slane %v2546_v29, %v2620_v48  ;;  %v2718_v10 = vrot.slane %v2536_v27, %v2620_v48  ;;  %v2722_v11 = vrot.slane %v2566_v34, %v2620_v48  ;;  %v2788_v62 = vld [vmem:[%s4508_s0 + $0x68] sm:$0xff] }
  0x1b   :  { %4660 = vst [vmem:[#allocation20_spill] sm:$0xff] %v2679_v63  ;;  %4661 = vst [vmem:[#allocation21_spill] sm:$0xff] %v2687_v1  ;;  %v2726_v12 = vrot.slane %v2541_v28, %v2620_v48  ;;  %v2774_v63 = vrot.slane %v2536_v27, %v2667_v60  ;;  %v2778_v59 = vrot.slane %v2541_v28, %v2667_v60  ;;  %v2783_v1 = vld [vmem:[%s4508_s0 + $0x60] sm:$0xff] }
  0x1c   :  { %4663 = vst [vmem:[#allocation23_spill] sm:$0xff] %v2695_v3  ;;  %4664 = vst [vmem:[#allocation24_spill] sm:$0xff] %v2703_v5  ;;  %v2766_v3 = vrot.slane %v2546_v29, %v2667_v60  ;;  %v2802_v61 = vrot.slane %v2518_v23, %v2710_v8  ;;  %v2806_v56 = vrot.slane %v2523_v24, %v2710_v8 }
  0x1d   :  { %2378 = vset.pattern.permute.xlu1 %v4518_v13  ;;  %2382 = vset.pattern.permute.xlu0 %v4520_v14  ;;  %4665 = vst [vmem:[#allocation25_spill] sm:$0xff] %v2714_v9  ;;  %4666 = vst [vmem:[#allocation26_spill] sm:$0xff] %v2718_v10  ;;  %v2747_v13 = vrot.slane %v2513_v22, %v2667_v60  ;;  %v2757_v14 = vld [vmem:[%s4508_s0 + $0x30] sm:$0xff] }
  0x1e   :  { %117 = vperm.xlu1 %2378, %v62_v2   ;;  %65 = vperm.xlu0 %2382, %v62_v2   ;;  %4667 = vst [vmem:[#allocation27_spill] sm:$0xff] %v2722_v11  ;;  %4668 = vst [vmem:[#allocation28_spill] sm:$0xff] %v2726_v12 }
  0x1f   :  { %4669 = vst [vmem:[#allocation29_spill] sm:$0xff] %v2766_v3  ;;  %4671 = vst [vmem:[#allocation31_spill] sm:$0xff] %v2774_v63  ;;  %v2814_v63 = vrot.slane %v2531_v26, %v2710_v8  ;;  %v2822_v3 = vrot.slane %v2752_v6, %v2508_v21 }
  0x20   :  { %4672 = vst [vmem:[#allocation32_spill] sm:$0xff] %v2778_v59  ;;  %4673 = vst [vmem:[#allocation33_spill] sm:$0xff] %v2802_v61  ;;  %v2810_v59 = vrot.slane %v2513_v22, %v2710_v8  ;;  %v2826_v61 = vrot.slane %v2757_v14, %v2508_v21 }
  0x21   :  { %4674 = vst [vmem:[#allocation34_spill] sm:$0xff] %v2806_v56  ;;  %4676 = vst [vmem:[#allocation36_spill] sm:$0xff] %v2814_v63  ;;  %v2830_v56 = vrot.slane %v2762_v19, %v2508_v21  ;;  %v2838_v63 = vrot.slane %v2752_v6, %v2526_v25 }
  0x22   :  { %2379 = vset.pattern.permute.xlu1 %v2433_v15  ;;  %v2731_v15 = vld [vmem:[%s4508_s0 + $0x20] sm:$0xff]  ;;  %4675 = vst [vmem:[#allocation35_spill] sm:$0xff] %v2810_v59  ;;  %4678 = vst [vmem:[#allocation38_spill] sm:$0xff] %v2822_v3  ;;  %v2846_v3 = vrot.slane %v2788_v62, %v2508_v21  ;;  %s2437_s0 = smov 127  }
  0x23   :  { %248 = vperm.xlu1 %2379, %v62_v2   ;;  %4679 = vst [vmem:[#allocation39_spill] sm:$0xff] %v2826_v61  ;;  %4680 = vst [vmem:[#allocation40_spill] sm:$0xff] %v2830_v56  ;;  %v2834_v59 = vrot.slane %v2731_v15, %v2526_v25  ;;  %v2850_v61 = vrot.slane %v2757_v14, %v2526_v25  ;;  %v2854_v56 = vrot.slane %v2762_v19, %v2526_v25 }
  0x24   :  { %4682 = vst [vmem:[#allocation42_spill] sm:$0xff] %v2838_v63  ;;  %4684 = vst [vmem:[#allocation44_spill] sm:$0xff] %v2846_v3  ;;  %v2862_v63 = vrot.slane %v2798_v57, %v2508_v21  ;;  %v2870_v3 = vrot.slane %v2788_v62, %v2526_v25 }
  0x25   :  { %4681 = vst [vmem:[#allocation41_spill] sm:$0xff] %v2834_v59  ;;  %4685 = vst [vmem:[#allocation45_spill] sm:$0xff] %v2850_v61  ;;  %v2858_v59 = vrot.slane %v2793_v58, %v2508_v21  ;;  %v2874_v61 = vrot.slane %v2793_v58, %v2526_v25 }
  0x26   :  { %4686 = vst [vmem:[#allocation46_spill] sm:$0xff] %v2854_v56  ;;  %4687 = vst [vmem:[#allocation47_spill] sm:$0xff] %v2862_v63  ;;  %v2878_v56 = vrot.slane %v2798_v57, %v2526_v25  ;;  %v2886_v63 = vrot.slane %v2752_v6, %v2620_v48 }
  0x27   :  { %2383 = vset.pattern.permute.xlu1 %v2434_v16  ;;  %v2735_v16 = vrot.slane %v2523_v24, %v2667_v60  ;;  %4689 = vst [vmem:[#allocation49_spill] sm:$0xff] %v2870_v3  ;;  %4690 = vst [vmem:[#allocation50_spill] sm:$0xff] %v2874_v61  ;;  %v2894_v3 = vrot.slane %v2762_v19, %v2620_v48 }
  0x28   :  { %482 = vperm.xlu1 %2383, %v62_v2   ;;  %4691 = vst [vmem:[#allocation51_spill] sm:$0xff] %v2878_v56  ;;  %4693 = vst [vmem:[#allocation53_spill] sm:$0xff] %v2886_v63  ;;  %v2902_v56 = vrot.slane %v2788_v62, %v2620_v48  ;;  %v2909_v63 = vsub.s32 7, %v2505_v20  ;;  %v2929_v20 = vrot.slane %v2762_v19, %v2667_v60 }
  0x29   :  { %4695 = vst [vmem:[#allocation55_spill] sm:$0xff] %v2894_v3  ;;  %v2917_v3 = vrot.slane %v2752_v6, %v2667_v60 }
  0x2a   :  { %4697 = vst [vmem:[#allocation57_spill] sm:$0xff] %v2902_v56  ;;  %v2925_v56 = vrot.slane %v2798_v57, %v2620_v48  ;;  %4703 = vst [vmem:[#allocation63_spill] sm:$0xff] %v2929_v20  ;;  %v2953_v20 = vrot.slane %v2546_v29, %v2710_v8 }
  0x2b   :  { %4700 = vst [vmem:[#allocation60_spill] sm:$0xff] %v2917_v3  ;;  %v2941_v3 = vrot.slane %v2793_v58, %v2667_v60 }
  0x2c   :  { %2384 = vset.pattern.permute.xlu1 %v2435_v17  ;;  %v2739_v17 = vrot.slane %v2531_v26, %v2667_v60  ;;  %4702 = vst [vmem:[#allocation62_spill] sm:$0xff] %v2925_v56  ;;  %v2949_v56 = vrot.slane %v2798_v57, %v2667_v60  ;;  %4708 = vst [vmem:[#allocation68_spill] sm:$0xff] %v2953_v20  ;;  %v2985_v20 = vrot.slane %v2531_v26, %v2909_v63 }
  0x2d   :  { %612 = vperm.xlu1 %2384, %v62_v2   ;;  %4706 = vst [vmem:[#allocation66_spill] sm:$0xff] %v2941_v3  ;;  %v3003_v26 = vrot.slane %v2541_v28, %v2909_v63 }
  0x2e   :  { %4707 = vst [vmem:[#allocation67_spill] sm:$0xff] %v2949_v56  ;;  %v2973_v56 = vrot.slane %v2541_v28, %v2710_v8  ;;  %4715 = vst [vmem:[#allocation75_spill] sm:$0xff] %v2985_v20 }
  0x2f   :  { %4719 = vst [vmem:[#allocation79_spill] sm:$0xff] %v3003_v26 }
  0x30   :  { %4712 = vst [vmem:[#allocation72_spill] sm:$0xff] %v2973_v56  ;;  %v3033_v56 = vrot.slane %v2788_v62, %v2549_v30 }
  0x31   :  { %2385 = vset.pattern.permute.xlu1 %v2436_v18  ;;  %v2743_v18 = vrot.slane %v2518_v23, %v2667_v60 }
  0x32   :  { %664 = vperm.xlu1 %2385, %v62_v2   ;;  %v2691_v2 = vrot.slane %v2546_v29, %v2569_v35  ;;  %4726 = vst [vmem:[#allocation86_spill] sm:$0xff] %v3033_v56  ;;  %v3060_v56 = vrot.slane %v2757_v14, %v2569_v35 }
  0x34   :  { %4662 = vst [vmem:[#allocation22_spill] sm:$0xff] %v2691_v2  ;;  %v2770_v2 = vrot.slane %v2566_v34, %v2667_v60  ;;  %4732 = vst [vmem:[#allocation92_spill] sm:$0xff] %v3060_v56  ;;  %v3109_v56 = vrot.slane %v2788_v62, %v2710_v8 }
  0x36   :  { %2386 = vset.pattern.permute.xlu1 %v2422_v4  ;;  %v2699_v4 = vrot.slane %v2513_v22, %v2620_v48  ;;  %4670 = vst [vmem:[#allocation30_spill] sm:$0xff] %v2770_v2  ;;  %v2818_v2 = vrot.slane %v2731_v15, %v2508_v21  ;;  %4744 = vst [vmem:[#allocation104_spill] sm:$0xff] %v3109_v56  ;;  %v3130_v56 = vrot.slane %v2757_v14, %v2909_v63 }
  0x38   :  { %4677 = vst [vmem:[#allocation37_spill] sm:$0xff] %v2818_v2  ;;  %v2842_v2 = vrot.slane %v2783_v1, %v2508_v21  ;;  %v2882_v21 = vrot.slane %v2731_v15, %v2620_v48  ;;  %4749 = vst [vmem:[#allocation109_spill] sm:$0xff] %v3130_v56 }
  0x3a   :  { %4683 = vst [vmem:[#allocation43_spill] sm:$0xff] %v2842_v2  ;;  %v2866_v2 = vrot.slane %v2783_v1, %v2526_v25  ;;  %4692 = vst [vmem:[#allocation52_spill] sm:$0xff] %v2882_v21  ;;  %v2898_v25 = vrot.slane %v2783_v1, %v2620_v48  ;;  %v2906_v21 = vrot.slane %v2793_v58, %v2620_v48 }
  0x3c   :  { %4688 = vst [vmem:[#allocation48_spill] sm:$0xff] %v2866_v2  ;;  %v2890_v2 = vrot.slane %v2757_v14, %v2620_v48  ;;  %4696 = vst [vmem:[#allocation56_spill] sm:$0xff] %v2898_v25  ;;  %v2921_v25 = vrot.slane %v2757_v14, %v2667_v60 }
  0x3d   :  { %4698 = vst [vmem:[#allocation58_spill] sm:$0xff] %v2906_v21  ;;  %v2933_v21 = vrot.slane %v2783_v1, %v2667_v60 }
  0x3e   :  { %4694 = vst [vmem:[#allocation54_spill] sm:$0xff] %v2890_v2  ;;  %v2913_v2 = vrot.slane %v2731_v15, %v2667_v60  ;;  %4701 = vst [vmem:[#allocation61_spill] sm:$0xff] %v2921_v25 }
  0x3f   :  { %4704 = vst [vmem:[#allocation64_spill] sm:$0xff] %v2933_v21  ;;  %v2957_v21 = vrot.slane %v2566_v34, %v2710_v8 }
  0x40   :  { %4699 = vst [vmem:[#allocation59_spill] sm:$0xff] %v2913_v2  ;;  %v2937_v2 = vrot.slane %v2788_v62, %v2667_v60  ;;  %v2969_v60 = vrot.slane %v2546_v29, %v2909_v63  ;;  %v2989_v29 = vrot.slane %v2518_v23, %v2909_v63  ;;  %v3007_v23 = vrot.slane %v2757_v14, %v2549_v30 }
  0x41   :  { %4709 = vst [vmem:[#allocation69_spill] sm:$0xff] %v2957_v21  ;;  %v2977_v21 = vrot.slane %v2566_v34, %v2909_v63  ;;  %v2995_v34 = vrot.slane %v2523_v24, %v2909_v63  ;;  %v3015_v24 = vrot.slane %v2752_v6, %v2549_v30 }
  0x42   :  { %4705 = vst [vmem:[#allocation65_spill] sm:$0xff] %v2937_v2  ;;  %v2961_v2 = vrot.slane %v2536_v27, %v2710_v8  ;;  %4711 = vst [vmem:[#allocation71_spill] sm:$0xff] %v2969_v60 }
  0x43   :  { %4713 = vst [vmem:[#allocation73_spill] sm:$0xff] %v2977_v21  ;;  %4716 = vst [vmem:[#allocation76_spill] sm:$0xff] %v2989_v29 }
  0x44   :  { %4710 = vst [vmem:[#allocation70_spill] sm:$0xff] %v2961_v2  ;;  %v2981_v2 = vrot.slane %v2513_v22, %v2909_v63  ;;  %4717 = vst [vmem:[#allocation77_spill] sm:$0xff] %v2995_v34  ;;  %v2999_v22 = vrot.slane %v2536_v27, %v2909_v63  ;;  %v3019_v27 = vrot.slane %v2762_v19, %v2549_v30 }
  0x45   :  { %4720 = vst [vmem:[#allocation80_spill] sm:$0xff] %v3007_v23  ;;  %4722 = vst [vmem:[#allocation82_spill] sm:$0xff] %v3015_v24  ;;  %v3037_v24 = vrot.slane %v2793_v58, %v2549_v30  ;;  %v3047_v23 = vrot.slane %v2731_v15, %v2569_v35 }
  0x46   :  { %4714 = vst [vmem:[#allocation74_spill] sm:$0xff] %v2981_v2  ;;  %4718 = vst [vmem:[#allocation78_spill] sm:$0xff] %v2999_v22  ;;  %v3029_v22 = vrot.slane %v2783_v1, %v2549_v30 }
  0x47   :  { %4723 = vst [vmem:[#allocation83_spill] sm:$0xff] %v3019_v27  ;;  %4727 = vst [vmem:[#allocation87_spill] sm:$0xff] %v3037_v24  ;;  %v3056_v24 = vrot.slane %v2752_v6, %v2569_v35 }
  0x48   :  { %4725 = vst [vmem:[#allocation85_spill] sm:$0xff] %v3029_v22  ;;  %4729 = vst [vmem:[#allocation89_spill] sm:$0xff] %v3047_v23  ;;  %v3051_v22 = vrot.slane %v2798_v57, %v2549_v30  ;;  %v3068_v23 = vrot.slane %v2788_v62, %v2569_v35 }
  0x49   :  { %4731 = vst [vmem:[#allocation91_spill] sm:$0xff] %v3056_v24  ;;  %v3126_v24 = vrot.slane %v2752_v6, %v2909_v63 }
  0x4a   :  { %4730 = vst [vmem:[#allocation90_spill] sm:$0xff] %v3051_v22  ;;  %4734 = vst [vmem:[#allocation94_spill] sm:$0xff] %v3068_v23  ;;  %v3081_v22 = vrot.slane %v2793_v58, %v2569_v35 }
  0x4b   :  { %4748 = vst [vmem:[#allocation108_spill] sm:$0xff] %v3126_v24 }
  0x4c   :  { %4737 = vst [vmem:[#allocation97_spill] sm:$0xff] %v3081_v22 }
  0x84   :  { %v2943_v25 = vpop.permute.xlu0 %169  ;;  %v2945_v48 = vpop.permute.xlu1 %352 }
  0x85   :  { %v182_v3 = vmul.f32 %v2943_v25, %v2553_v31  ;;  %v180_v61 = vmul.f32 %v2943_v25, %v2557_v32  ;;  %v181_v28 = vmul.f32 %v2943_v25, %v2561_v33  ;;  %v183_v23 = vmul.f32 %v2943_v25, %v2577_v37 }
  0x86   :  { %v3205_v56 = vmul.f32 %v2718_v10, %v2945_v48  ;;  %v3209_v24 = vmul.f32 %v2722_v11, %v2945_v48  ;;  %v4769_v11 = vld [vmem:[#allocation29_spill] sm:$0xff] }
  0x87   :  { %192 = vrot.lane.b32.xlu0 %v182_v3, %s2437_s0  ;;  %188 = vrot.lane.b32.xlu1 %v180_v61, %s2437_s0  ;;  %v3011_v3 = vrot.slane %v2731_v15, %v2549_v30  ;;  %v3073_v30 = vrot.slane %v2731_v15, %v2710_v8 }
  0x88   :  { %4759 = vst [vmem:[#allocation119_spill] sm:$0xff] %v3205_v56  ;;  %4760 = vst [vmem:[#allocation120_spill] sm:$0xff] %v3209_v24 }
  0x89   :  { %4721 = vst [vmem:[#allocation81_spill] sm:$0xff] %v3011_v3  ;;  %v3021_v61 = vpop.permute.xlu0 %209  ;;  %v3025_v26 = vpop.permute.xlu1 %391  ;;  %v3043_v3 = vrot.slane %v2762_v19, %v2569_v35  ;;  %4735 = vst [vmem:[#allocation95_spill] sm:$0xff] %v3073_v30  ;;  %v3095_v30 = vrot.slane %v2762_v19, %v2710_v8 }
  0x8a   :  { %4724 = vst [vmem:[#allocation84_spill] sm:$0xff] %v3025_v26  ;;  %v220_v27 = vmul.f32 %v3021_v61, %v2573_v36  ;;  %v222_v22 = vmul.f32 %v3021_v61, %v2581_v38  ;;  %v3221_v34 = vmul.f32 %v2613_v46, %v3021_v61  ;;  %v3225_v29 = vmul.f32 %v3021_v61, %v2624_v49  ;;  %v4779_v49 = vld [vmem:[#allocation38_spill] sm:$0xff] }
  0x8b   :  { %4728 = vst [vmem:[#allocation88_spill] sm:$0xff] %v3043_v3  ;;  %190 = vrot.lane.b32.xlu1 %v181_v28, %s2437_s0  ;;  %v3064_v3 = vrot.slane %v2783_v1, %v2569_v35  ;;  %v3077_v28 = vrot.slane %v2752_v6, %v2710_v8  ;;  %4740 = vst [vmem:[#allocation100_spill] sm:$0xff] %v3095_v30  ;;  %v3117_v30 = vrot.slane %v2798_v57, %v2710_v8 }
  0x8c   :  { %228 = vrot.lane.b32.xlu0 %v220_v27, %s2437_s0  ;;  %v3091_v27 = vrot.slane %v2757_v14, %v2710_v8  ;;  %v3147_v6 = vrot.slane %v2793_v58, %v2909_v63  ;;  %v3151_v14 = vrot.slane %v2798_v57, %v2909_v63  ;;  %v3229_v21 = vmul.f32 %v2628_v50, %v3021_v61 }
  0x8d   :  { %4733 = vst [vmem:[#allocation93_spill] sm:$0xff] %v3064_v3  ;;  %4736 = vst [vmem:[#allocation96_spill] sm:$0xff] %v3077_v28  ;;  %v3085_v3 = vrot.slane %v2798_v57, %v2569_v35  ;;  %v3099_v28 = vrot.slane %v2783_v1, %v2710_v8  ;;  %v3167_v57 = vmul.f32 %v2945_v48, %v2683_v0 }
  0x8e   :  { %4739 = vst [vmem:[#allocation99_spill] sm:$0xff] %v3091_v27  ;;  %v3103_v35 = vpop.permute.xlu1 %534  ;;  %v3113_v27 = vrot.slane %v2793_v58, %v2710_v8  ;;  %4746 = vst [vmem:[#allocation106_spill] sm:$0xff] %v3117_v30  ;;  %v3139_v8 = vrot.slane %v2783_v1, %v2909_v63  ;;  %v950_v1 = vmul.f32 %v2597_v42, %v2943_v25 }
  0x8f   :  { %4738 = vst [vmem:[#allocation98_spill] sm:$0xff] %v3085_v3  ;;  %4741 = vst [vmem:[#allocation101_spill] sm:$0xff] %v3099_v28  ;;  %v3105_v3 = vpop.permute.xlu0 %573  ;;  %194 = vrot.lane.b32.xlu1 %v183_v23, %s2437_s0  ;;  %v3122_v28 = vrot.slane %v2731_v15, %v2909_v63  ;;  %v3143_v15 = vrot.slane %v2788_v62, %v2909_v63  ;;  %v947_v62 = vmul.f32 %v2601_v43, %v2943_v25 }
  0x90   :  { %4742 = vst [vmem:[#allocation102_spill] sm:$0xff] %v3103_v35  ;;  %4743 = vst [vmem:[#allocation103_spill] sm:$0xff] %v3105_v3  ;;  %232 = vrot.lane.b32.xlu0 %v222_v22, %s2437_s0  ;;  %v949_v22 = vmul.f32 %v2589_v40, %v2943_v25  ;;  %v3163_v58 = vmul.f32 %v2609_v45, %v2943_v25  ;;  %v3175_v23 = vmul.f32 %v2945_v48, %v2699_v4 }
  0x91   :  { %4745 = vst [vmem:[#allocation105_spill] sm:$0xff] %v3113_v27  ;;  %4747 = vst [vmem:[#allocation107_spill] sm:$0xff] %v3122_v28  ;;  %v3134_v27 = vrot.slane %v2762_v19, %v2909_v63  ;;  %v221_v19 = vmul.f32 %v3021_v61, %v2585_v39  ;;  %v3171_v63 = vmul.f32 %v2943_v25, %v2617_v47 }
  0x92   :  { %4751 = vst [vmem:[#allocation111_spill] sm:$0xff] %v3139_v8  ;;  %4752 = vst [vmem:[#allocation112_spill] sm:$0xff] %v3143_v15  ;;  %v3184_v15 = vmul.f32 %v2945_v48, %v2703_v5  ;;  %v3188_v8 = vmul.f32 %v2943_v25, %v2632_v51  ;;  %v3192_v30 = vmul.f32 %v2945_v48, %v2707_v7 }
  0x93   :  { %4750 = vst [vmem:[#allocation110_spill] sm:$0xff] %v3134_v27  ;;  %4753 = vst [vmem:[#allocation113_spill] sm:$0xff] %v3147_v6  ;;  %230 = vrot.lane.b32.xlu1 %v221_v19, %s2437_s0  ;;  %v3180_v6 = vpop.permute.xlu0 %300  ;;  %v3196_v27 = vmul.f32 %v2943_v25, %v2644_v54  ;;  %v3201_v19 = vmul.f32 %v2714_v9, %v2945_v48  ;;  %v3213_v28 = vmul.f32 %v2726_v12, %v2945_v48  ;;  %v4771_v9 = vld [vmem:[#allocation30_spill] sm:$0xff] }
  0x94   :  { %4754 = vst [vmem:[#allocation114_spill] sm:$0xff] %v3151_v14  ;;  %v3178_v14 = vpop.permute.xlu1 %716  ;;  %4756 = vst [vmem:[#allocation116_spill] sm:$0xff] %v3180_v6  ;;  %959 = vrot.lane.b32.xlu0 %v949_v22, %s2437_s0  ;;  %v983_v22 = vmul.f32 %v2605_v44, %v3021_v61  ;;  %v3233_v20 = vmul.f32 %v3021_v61, %v2636_v52  ;;  %v3237_v60 = vmul.f32 %v3025_v26, %v2735_v16 }
  0x95   :  { %4755 = vst [vmem:[#allocation115_spill] sm:$0xff] %v3178_v14  ;;  %4757 = vst [vmem:[#allocation117_spill] sm:$0xff] %v3192_v30  ;;  %v223_v14 = vmul.f32 %v3021_v61, %v2593_v41  ;;  %v3241_v2 = vmul.f32 %v2640_v53, %v3021_v61  ;;  %v3250_v24 = vmul.f32 %v3021_v61, %v2648_v55 }
  0x96   :  { %4758 = vst [vmem:[#allocation118_spill] sm:$0xff] %v3201_v19  ;;  %4761 = vst [vmem:[#allocation121_spill] sm:$0xff] %v3213_v28  ;;  %v3246_v28 = vmul.f32 %v3025_v26, %v2739_v17  ;;  %v3254_v56 = vmul.f32 %v3025_v26, %v2743_v18  ;;  %v3258_v19 = vmul.f32 %v3025_v26, %v2747_v13 }
  0x97   :  { %4762 = vst [vmem:[#allocation122_spill] sm:$0xff] %v3237_v60  ;;  %4763 = vst [vmem:[#allocation123_spill] sm:$0xff] %v3241_v2  ;;  %234 = vrot.lane.b32.xlu1 %v223_v14, %s2437_s0  ;;  %v3267_v10 = vmul.f32 %v4769_v11, %v3025_v26  ;;  %v3287_v41 = vmul.f32 %v3103_v35, %v4779_v49 }
  0x98   :  { %4764 = vst [vmem:[#allocation124_spill] sm:$0xff] %v3246_v28  ;;  %4765 = vst [vmem:[#allocation125_spill] sm:$0xff] %v3254_v56  ;;  %961 = vrot.lane.b32.xlu0 %v950_v1, %s2437_s0  ;;  %v3261_v12 = vpop.permute.xlu1 %755  ;;  %v3263_v14 = vpop.permute.xlu0 %430  ;;  %v3271_v28 = vmul.f32 %v4771_v9, %v3025_v26  ;;  %v4773_v56 = vld [vmem:[#allocation31_spill] sm:$0xff]  ;;  %v4777_v1 = vld [vmem:[#allocation37_spill] sm:$0xff] }
  0x99   :  { %4766 = vst [vmem:[#allocation126_spill] sm:$0xff] %v3258_v19  ;;  %4767 = vst [vmem:[#allocation127_spill] sm:$0xff] %v3261_v12  ;;  %v3275_v2 = vmul.f32 %v4773_v56, %v3025_v26  ;;  %v4775_v19 = vld [vmem:[#allocation32_spill] sm:$0xff]  ;;  %v3283_v12 = vmul.f32 %v3103_v35, %v4777_v1 }
  0x9a   :  { %4768 = vst [vmem:[#allocation128_spill] sm:$0xff] %v3263_v14  ;;  %4770 = vst [vmem:[#allocation29_spill] sm:$0xff] %v3267_v10  ;;  %v3279_v5 = vmul.f32 %v4775_v19, %v3025_v26  ;;  %v4781_v10 = vld [vmem:[#allocation39_spill] sm:$0xff] }
  0x9b   :  { %4772 = vst [vmem:[#allocation30_spill] sm:$0xff] %v3271_v28  ;;  %4774 = vst [vmem:[#allocation31_spill] sm:$0xff] %v3275_v2  ;;  %v3291_v60 = vmul.f32 %v3103_v35, %v4781_v10  ;;  %v4783_v28 = vld [vmem:[#allocation14_spill] sm:$0xff]  ;;  %v4785_v2 = vld [vmem:[#allocation40_spill] sm:$0xff]  ;;  %955 = vrot.lane.b32.xlu1 %v947_v62, %s2437_s0 }
  0x9c   :  { %4776 = vst [vmem:[#allocation32_spill] sm:$0xff] %v3279_v5  ;;  %4778 = vst [vmem:[#allocation37_spill] sm:$0xff] %v3283_v12  ;;  %v3295_v47 = vmul.f32 %v2943_v25, %v4783_v28  ;;  %v3299_v26 = vmul.f32 %v3103_v35, %v4785_v2  ;;  %v4787_v5 = vld [vmem:[#allocation41_spill] sm:$0xff]  ;;  %v4789_v12 = vld [vmem:[#allocation42_spill] sm:$0xff]  ;;  %992 = vrot.lane.b32.xlu0 %v983_v22, %s2437_s0  ;;  %v320_v22 = vmul.f32 %v2735_v16, %v3180_v6 }
  0x9d   :  { %4780 = vst [vmem:[#allocation38_spill] sm:$0xff] %v3287_v41  ;;  %4782 = vst [vmem:[#allocation129_spill] sm:$0xff] %v3291_v60  ;;  %v3303_v37 = vmul.f32 %v3105_v3, %v4787_v5  ;;  %v3307_v30 = vmul.f32 %v3105_v3, %v4789_v12  ;;  %v4791_v41 = vld [vmem:[#allocation45_spill] sm:$0xff]  ;;  %v4793_v60 = vld [vmem:[#allocation46_spill] sm:$0xff]  ;;  %v3347_v12 = vpop.permute.xlu1 %117 }
  0x9e   :  { %4784 = vst [vmem:[#allocation130_spill] sm:$0xff] %v3295_v47  ;;  %4786 = vst [vmem:[#allocation40_spill] sm:$0xff] %v3299_v26  ;;  %v3311_v10 = vmul.f32 %v3105_v3, %v4791_v41  ;;  %v3316_v47 = vmul.f32 %v3105_v3, %v4793_v60  ;;  %v4795_v26 = vld [vmem:[#allocation43_spill] sm:$0xff]  ;;  %v4802_v3 = vld [vmem:[#allocation18_spill] sm:$0xff] }
  0x9f   :  { %4788 = vst [vmem:[#allocation131_spill] sm:$0xff] %v3303_v37  ;;  %4790 = vst [vmem:[#allocation132_spill] sm:$0xff] %v3307_v30  ;;  %v3320_v28 = vmul.f32 %v4795_v26, %v3103_v35  ;;  %v4797_v37 = vld [vmem:[#allocation44_spill] sm:$0xff]  ;;  %v3328_v30 = vmul.f32 %v2858_v59, %v3103_v35  ;;  %v4800_v62 = vld [vmem:[#allocation47_spill] sm:$0xff]  ;;  %957 = vrot.lane.b32.xlu1 %v3163_v58, %s2437_s0 }
  0xa0   :  { %4792 = vst [vmem:[#allocation133_spill] sm:$0xff] %v3311_v10  ;;  %4794 = vst [vmem:[#allocation134_spill] sm:$0xff] %v3316_v47  ;;  %v3324_v5 = vmul.f32 %v4797_v37, %v3103_v35  ;;  %v3333_v10 = vmul.f32 %v4800_v62, %v3103_v35  ;;  %v3337_v47 = vmul.f32 %v3021_v61, %v4802_v3  ;;  %v4803_v60 = vld [vmem:[#allocation33_spill] sm:$0xff]  ;;  %v4805_v41 = vld [vmem:[#allocation34_spill] sm:$0xff]  ;;  %371 = vrot.lane.b32.xlu0 %v3167_v57, %s2437_s0 }
  0xa1   :  { %4796 = vst [vmem:[#allocation43_spill] sm:$0xff] %v3320_v28  ;;  %4799 = vst [vmem:[#allocation135_spill] sm:$0xff] %v3328_v30  ;;  %v3341_v28 = vmul.f32 %v2945_v48, %v4803_v60  ;;  %v3349_v30 = vpop.permute.xlu0 %65  ;;  %v3359_v35 = vmul.f32 %v2743_v18, %v3180_v6  ;;  %v4807_v60 = vld [vmem:[#allocation35_spill] sm:$0xff]  ;;  %v138_v18 = vmul.f32 %v2581_v38, %v3347_v12 }
  0xa2   :  { %4798 = vst [vmem:[#allocation44_spill] sm:$0xff] %v3324_v5  ;;  %4801 = vst [vmem:[#allocation47_spill] sm:$0xff] %v3333_v10  ;;  %v3345_v5 = vmul.f32 %v2945_v48, %v4805_v41  ;;  %v3355_v10 = vmul.f32 %v2739_v17, %v3180_v6  ;;  %v860_v41 = vmul.f32 %v2609_v45, %v3349_v30 }
  0xa3   :  { %4804 = vst [vmem:[#allocation18_spill] sm:$0xff] %v3341_v28  ;;  %v3363_v28 = vmul.f32 %v2945_v48, %v4807_v60  ;;  %v859_v16 = vmul.f32 %v2601_v43, %v3349_v30  ;;  %v907_v17 = vmul.f32 %v2613_v46, %v3347_v12  ;;  %v86_v60 = vmul.f32 %v2553_v31, %v3349_v30 }
  0xa4   :  { %4806 = vst [vmem:[#allocation136_spill] sm:$0xff] %v3345_v5  ;;  %v908_v5 = vmul.f32 %v2605_v44, %v3347_v12  ;;  %v861_v45 = vmul.f32 %v2589_v40, %v3349_v30  ;;  %v909_v44 = vmul.f32 %v2628_v50, %v3347_v12  ;;  %v85_v46 = vmul.f32 %v2561_v33, %v3349_v30  ;;  %v3399_v50 = vpop.permute.xlu1 %248 }
  0xa5   :  { %4808 = vst [vmem:[#allocation137_spill] sm:$0xff] %v3363_v28  ;;  %v3387_v43 = vadd.f32 %v907_v17, %v859_v16  ;;  %v137_v38 = vmul.f32 %v2585_v39, %v3347_v12  ;;  %v142_v31 = vadd.f32 %v138_v18, %v86_v60  ;;  %v862_v40 = vmul.f32 %v2597_v42, %v3349_v30  ;;  %v4810_v16 = vld [vmem:[#allocation36_spill] sm:$0xff] }
  0xa6   :  { %v3383_v28 = vadd.f32 %v908_v5, %v860_v41  ;;  %v3393_v58 = vadd.f32 %v909_v44, %v861_v45  ;;  %v910_v41 = vmul.f32 %v2640_v53, %v3347_v12  ;;  %4809 = vst [vmem:[#allocation138_spill] sm:$0xff] %v3399_v50  ;;  %v136_v57 = vmul.f32 %v2573_v36, %v3347_v12 }
  0xa7   :  { %v141_v5 = vadd.f32 %v137_v38, %v85_v46  ;;  %v84_v33 = vmul.f32 %v2557_v32, %v3349_v30  ;;  %v321_v39 = vmul.f32 %v2747_v13, %v3180_v6  ;;  %990 = vrot.lane.b32.xlu1 %v3221_v34, %s2437_s0  ;;  %v269_v42 = vmul.f32 %v2699_v4, %v3399_v50 }
  0xa8   :  { %v178_v53 = vadd.f32 %v3171_v63, %v142_v31  ;;  %v3414_v60 = vmul.f32 %v4769_v11, %v3180_v6  ;;  %v3418_v36 = vmul.f32 %v4771_v9, %v3180_v6  ;;  %375 = vrot.lane.b32.xlu0 %v3175_v23, %s2437_s0  ;;  %v268_v32 = vmul.f32 %v2707_v7, %v3399_v50  ;;  %v4814_v31 = vld [vmem:[#allocation39_spill] sm:$0xff] }
  0xa9   :  { %v177_v13 = vadd.f32 %v3188_v8, %v141_v5  ;;  %v3425_v34 = vadd.f32 %v910_v41, %v862_v40  ;;  %v140_v4 = vadd.f32 %v136_v57, %v84_v33  ;;  %v3430_v11 = vmul.f32 %v4773_v56, %v3180_v6  ;;  %v4818_v57 = vld [vmem:[#allocation10_spill] sm:$0xff]  ;;  %v4819_v33 = vld [vmem:[#allocation12_spill] sm:$0xff] }
  0xaa   :  { %v218_v63 = vadd.f32 %v3225_v29, %v178_v53  ;;  %v3434_v9 = vmul.f32 %v4775_v19, %v3180_v6  ;;  %v3438_v23 = vmul.f32 %v2945_v48, %v4810_v16  ;;  %v267_v7 = vmul.f32 %v2683_v0, %v3399_v50  ;;  %v3497_v53 = vpop.permute.xlu1 %482 }
  0xab   :  { %v217_v8 = vadd.f32 %v3233_v20, %v177_v13  ;;  %v176_v17 = vadd.f32 %v3196_v27, %v140_v4  ;;  %v108_v29 = vmul.f32 %v2644_v54, %v3349_v30  ;;  %994 = vrot.lane.b32.xlu1 %v3229_v21, %s2437_s0  ;;  %v109_v19 = vmul.f32 %v2632_v51, %v3349_v30  ;;  %v4811_v54 = vld [vmem:[#allocation15_spill] sm:$0xff]  ;;  %v4812_v21 = vld [vmem:[#allocation16_spill] sm:$0xff] }
  0xac   :  { %v273_v56 = vadd.f32 %v269_v42, %v218_v63  ;;  %v160_v18 = vmul.f32 %v2648_v55, %v3347_v12  ;;  %v161_v20 = vmul.f32 %v2636_v52, %v3347_v12  ;;  %377 = vrot.lane.b32.xlu0 %v3184_v15, %s2437_s0  ;;  %v941_v45 = vmul.f32 %v4811_v54, %v2943_v25  ;;  %v4813_v55 = vld [vmem:[#allocation19_spill] sm:$0xff]  ;;  %v4820_v42 = vld [vmem:[#allocation122_spill] sm:$0xff]  ;;  %v4823_v63 = vld [vmem:[#allocation13_spill] sm:$0xff] }
  0xad   :  { %v272_v0 = vadd.f32 %v268_v32, %v217_v8  ;;  %v216_v27 = vadd.f32 %v3250_v24, %v176_v17  ;;  %v942_v44 = vmul.f32 %v4812_v21, %v2943_v25  ;;  %v3465_v51 = vmul.f32 %v4777_v1, %v3263_v14  ;;  %v4815_v1 = vld [vmem:[#allocation117_spill] sm:$0xff]  ;;  %4821 = vst [vmem:[#allocation19_spill] sm:$0xff] %v3497_v53  ;;  %v4822_v32 = vld [vmem:[#allocation11_spill] sm:$0xff] }
  0xae   :  { %v3461_v46 = vadd.f32 %v321_v39, %v273_v56  ;;  %v3469_v52 = vmul.f32 %v4779_v49, %v3263_v14  ;;  %v3473_v15 = vmul.f32 %v4813_v55, %v3021_v61  ;;  %v3479_v40 = vmul.f32 %v4814_v31, %v3263_v14  ;;  %v4825_v56 = vld [vmem:[#allocation21_spill] sm:$0xff]  ;;  %v3561_v6 = vpop.permute.xlu1 %612 }
  0xaf   :  { %v3475_v24 = vadd.f32 %v320_v22, %v272_v0  ;;  %v271_v38 = vadd.f32 %v267_v7, %v216_v27  ;;  %v3483_v41 = vmul.f32 %v4785_v2, %v3263_v14  ;;  %373 = vrot.lane.b32.xlu1 %v4815_v1, %s2437_s0  ;;  %v3487_v49 = vadd.f32 %v160_v18, %v108_v29  ;;  %v4826_v18 = vld [vmem:[#allocation17_spill] sm:$0xff]  ;;  %v4828_v27 = vld [vmem:[#allocation22_spill] sm:$0xff] }
  0xb0   :  { %v3489_v5 = vadd.f32 %v161_v20, %v109_v19  ;;  %v87_v22 = vmul.f32 %v4818_v57, %v3349_v30  ;;  %v110_v39 = vmul.f32 %v4819_v33, %v3349_v30  ;;  %412 = vrot.lane.b32.xlu0 %v4820_v42, %s2437_s0  ;;  %v3504_v13 = vmul.f32 %v4795_v26, %v3263_v14  ;;  %v4824_v26 = vld [vmem:[#allocation14_spill] sm:$0xff]  ;;  %v4832_v42 = vld [vmem:[#allocation124_spill] sm:$0xff] }
  0xb1   :  { %4816 = vst [vmem:[#allocation15_spill] sm:$0xff] %v3487_v49  ;;  %v3500_v2 = vadd.f32 %v3359_v35, %v271_v38  ;;  %v139_v4 = vmul.f32 %v4822_v32, %v3347_v12  ;;  %v162_v8 = vmul.f32 %v4823_v63, %v3347_v12  ;;  %v3512_v7 = vmul.f32 %v4797_v37, %v3263_v14  ;;  %v4827_v37 = vld [vmem:[#allocation20_spill] sm:$0xff]  ;;  %v4834_v63 = vld [vmem:[#allocation26_spill] sm:$0xff] }
  0xb2   :  { %4817 = vst [vmem:[#allocation16_spill] sm:$0xff] %v3489_v5  ;;  %v3516_v17 = vmul.f32 %v2858_v59, %v3263_v14  ;;  %v3520_v35 = vmul.f32 %v4800_v62, %v3263_v14  ;;  %v111_v29 = vmul.f32 %v4824_v26, %v3349_v30  ;;  %v977_v19 = vmul.f32 %v4825_v56, %v3021_v61  ;;  %v4829_v38 = vld [vmem:[#allocation24_spill] sm:$0xff]  ;;  %v4830_v62 = vld [vmem:[#allocation123_spill] sm:$0xff] }
  0xb3   :  { %v939_v20 = vmul.f32 %v4826_v18, %v2943_v25  ;;  %v940_v0 = vmul.f32 %v4827_v37, %v2943_v25  ;;  %v974_v59 = vmul.f32 %v4828_v27, %v3021_v61  ;;  %v270_v31 = vmul.f32 %v4829_v38, %v3399_v50  ;;  %996 = vrot.lane.b32.xlu1 %v4830_v62, %s2437_s0  ;;  %v4833_v25 = vld [vmem:[#allocation25_spill] sm:$0xff]  ;;  %v4835_v38 = vld [vmem:[#allocation27_spill] sm:$0xff]  ;;  %v4836_v62 = vld [vmem:[#allocation28_spill] sm:$0xff] }
  0xb4   :  { %v143_v1 = vadd.f32 %v139_v4, %v87_v22  ;;  %v163_v57 = vmul.f32 %v4802_v3, %v3347_v12  ;;  %v3538_v33 = vadd.f32 %v162_v8, %v110_v39  ;;  %416 = vrot.lane.b32.xlu0 %v4832_v42, %s2437_s0  ;;  %v1025_v32 = vmul.f32 %v4833_v25, %v3399_v50  ;;  %v4837_v4 = vld [vmem:[#allocation41_spill] sm:$0xff]  ;;  %v4838_v39 = vld [vmem:[#allocation42_spill] sm:$0xff] }
  0xb5   :  { %v1027_v26 = vmul.f32 %v4834_v63, %v3399_v50  ;;  %v1026_v14 = vmul.f32 %v4835_v38, %v3399_v50  ;;  %v1028_v22 = vmul.f32 %v4836_v62, %v3399_v50  ;;  %v3552_v3 = vmul.f32 %v4837_v4, %v3497_v53  ;;  %v4840_v25 = vld [vmem:[#allocation130_spill] sm:$0xff]  ;;  %4841 = vst [vmem:[#allocation10_spill] sm:$0xff] %v3561_v6  ;;  %v4842_v63 = vld [vmem:[#allocation45_spill] sm:$0xff]  ;;  %v4844_v4 = vld [vmem:[#allocation48_spill] sm:$0xff] }
  0xb6   :  { %4831 = vst [vmem:[#allocation39_spill] sm:$0xff] %v3538_v33  ;;  %v3556_v8 = vmul.f32 %v4838_v39, %v3497_v53  ;;  %v3558_v42 = vadd.f32 %v163_v57, %v111_v29  ;;  %v179_v16 = vadd.f32 %v4840_v25, %v143_v1  ;;  %v3565_v38 = vmul.f32 %v4842_v63, %v3497_v53  ;;  %v4843_v62 = vld [vmem:[#allocation46_spill] sm:$0xff]  ;;  %v4845_v39 = vld [vmem:[#allocation49_spill] sm:$0xff]  ;;  %v4848_v63 = vld [vmem:[#allocation52_spill] sm:$0xff] }
  0xb7   :  { %v3569_v50 = vmul.f32 %v4843_v62, %v3497_v53  ;;  %v3573_v49 = vmul.f32 %v4844_v4, %v3497_v53  ;;  %v3577_v29 = vmul.f32 %v4845_v39, %v3497_v53  ;;  %v4846_v1 = vld [vmem:[#allocation125_spill] sm:$0xff]  ;;  %v4847_v57 = vld [vmem:[#allocation50_spill] sm:$0xff]  ;;  %v4850_v62 = vld [vmem:[#allocation51_spill] sm:$0xff] }
  0xb8   :  { %4839 = vst [vmem:[#allocation117_spill] sm:$0xff] %v3558_v42  ;;  %410 = vrot.lane.b32.xlu1 %v4846_v1, %s2437_s0  ;;  %v3583_v25 = vmul.f32 %v4847_v57, %v3497_v53  ;;  %v3587_v42 = vmul.f32 %v4848_v63, %v3561_v6  ;;  %v3591_v33 = vmul.f32 %v4850_v62, %v3497_v53  ;;  %v4851_v39 = vld [vmem:[#allocation118_spill] sm:$0xff]  ;;  %v4852_v4 = vld [vmem:[#allocation53_spill] sm:$0xff] }
  0xb9   :  { %v219_v5 = vadd.f32 %v3337_v47, %v179_v16  ;;  %1121 = vrot.lane.b32.xlu0 %v4851_v39, %s2437_s0  ;;  %v3598_v1 = vmul.f32 %v4852_v4, %v3561_v6  ;;  %v885_v57 = vmul.f32 %v4811_v54, %v3349_v30  ;;  %v886_v63 = vmul.f32 %v4812_v21, %v3349_v30 }
  0xba   :  { %4849 = vst [vmem:[#allocation12_spill] sm:$0xff] %v3587_v42  ;;  %v933_v42 = vmul.f32 %v4813_v55, %v3347_v12  ;;  %v934_v47 = vmul.f32 %v4825_v56, %v3347_v12  ;;  %v945_v16 = vadd.f32 %v941_v45, %v3393_v58  ;;  %v946_v39 = vadd.f32 %v942_v44, %v3425_v34  ;;  %v4853_v55 = vld [vmem:[#allocation126_spill] sm:$0xff]  ;;  %v4854_v45 = vld [vmem:[#allocation119_spill] sm:$0xff] }
  0xbb   :  { %v274_v53 = vadd.f32 %v270_v31, %v219_v5  ;;  %v883_v4 = vmul.f32 %v4826_v18, %v3349_v30  ;;  %v884_v54 = vmul.f32 %v4827_v37, %v3349_v30  ;;  %v931_v21 = vmul.f32 %v4828_v27, %v3347_v12  ;;  %v4855_v44 = vld [vmem:[#allocation23_spill] sm:$0xff]  ;;  %v4857_v31 = vld [vmem:[#allocation54_spill] sm:$0xff] }
  0xbc   :  { %v3610_v62 = vadd.f32 %v933_v42, %v885_v57  ;;  %414 = vrot.lane.b32.xlu1 %v4853_v55, %s2437_s0  ;;  %v3621_v56 = vadd.f32 %v934_v47, %v886_v63  ;;  %v980_v58 = vadd.f32 %v3473_v15, %v945_v16  ;;  %v981_v34 = vadd.f32 %v977_v19, %v946_v39  ;;  %v3638_v19 = vpop.permute.xlu1 %664  ;;  %v4858_v57 = vld [vmem:[#allocation55_spill] sm:$0xff]  ;;  %v4863_v16 = vld [vmem:[#allocation121_spill] sm:$0xff]  ;;  %v4864_v39 = vld [vmem:[#allocation136_spill] sm:$0xff] }
  0xbd   :  { %v326_v5 = vadd.f32 %v3355_v10, %v274_v53  ;;  %1125 = vrot.lane.b32.xlu0 %v4854_v45, %s2437_s0  ;;  %v932_v18 = vmul.f32 %v4855_v44, %v3347_v12  ;;  %v3628_v30 = vadd.f32 %v931_v21, %v883_v4  ;;  %v943_v37 = vadd.f32 %v939_v20, %v3387_v43  ;;  %v4859_v4 = vld [vmem:[#allocation56_spill] sm:$0xff] }
  0xbe   :  { %v944_v27 = vadd.f32 %v940_v0, %v3383_v28  ;;  %v3634_v10 = vmul.f32 %v4857_v31, %v3561_v6  ;;  %v1031_v53 = vadd.f32 %v1027_v26, %v980_v58  ;;  %v1032_v42 = vadd.f32 %v1028_v22, %v981_v34  ;;  %v4861_v0 = vld [vmem:[#allocation120_spill] sm:$0xff]  ;;  %v4862_v26 = vld [vmem:[#allocation137_spill] sm:$0xff]  ;;  %v4866_v34 = vld [vmem:[#allocation59_spill] sm:$0xff] }
  0xbf   :  { %4856 = vst [vmem:[#allocation122_spill] sm:$0xff] %v3628_v30  ;;  %v975_v15 = vmul.f32 %v4855_v44, %v3021_v61  ;;  %v3642_v12 = vmul.f32 %v4858_v57, %v3561_v6  ;;  %v3646_v43 = vmul.f32 %v4859_v4, %v3561_v6  ;;  %v3648_v28 = vadd.f32 %v932_v18, %v884_v54  ;;  %v4865_v54 = vld [vmem:[#allocation18_spill] sm:$0xff]  ;;  %v4869_v18 = vld [vmem:[#allocation84_spill] sm:$0xff]  ;;  %v4881_v30 = vld [vmem:[#allocation81_spill] sm:$0xff] }
  0xc0   :  { %v978_v20 = vadd.f32 %v974_v59, %v943_v37  ;;  %1123 = vrot.lane.b32.xlu1 %v4861_v0, %s2437_s0  ;;  %v361_v22 = vadd.f32 %v4862_v26, %v3461_v46  ;;  %v1079_v61 = vadd.f32 %v3430_v11, %v1031_v53  ;;  %v1080_v63 = vadd.f32 %v3434_v9, %v1032_v42  ;;  %v4867_v9 = vld [vmem:[#allocation68_spill] sm:$0xff]  ;;  %v4868_v44 = vld [vmem:[#allocation74_spill] sm:$0xff]  ;;  %v4873_v42 = vld [vmem:[#allocation29_spill] sm:$0xff] }
  0xc1   :  { %4860 = vst [vmem:[#allocation11_spill] sm:$0xff] %v3648_v28  ;;  %v979_v47 = vadd.f32 %v975_v15, %v944_v27  ;;  %1127 = vrot.lane.b32.xlu0 %v4863_v16, %s2437_s0  ;;  %v360_v21 = vadd.f32 %v4864_v39, %v3475_v24  ;;  %v359_v59 = vadd.f32 %v4865_v54, %v3500_v2  ;;  %v4870_v24 = vld [vmem:[#allocation71_spill] sm:$0xff]  ;;  %v4871_v2 = vld [vmem:[#allocation69_spill] sm:$0xff]  ;;  %v4875_v26 = vld [vmem:[#allocation76_spill] sm:$0xff] }
  0xc2   :  { %v362_v55 = vadd.f32 %v3438_v23, %v326_v5  ;;  %v1029_v58 = vadd.f32 %v1025_v32, %v978_v20  ;;  %v3665_v46 = vmul.f32 %v4866_v34, %v3638_v19  ;;  %v1105_v45 = vmul.f32 %v4867_v9, %v2945_v48  ;;  %v4872_v32 = vld [vmem:[#allocation75_spill] sm:$0xff]  ;;  %v4874_v15 = vld [vmem:[#allocation73_spill] sm:$0xff]  ;;  %v4877_v16 = vld [vmem:[#allocation60_spill] sm:$0xff] }
  0xc3   :  { %v1030_v11 = vadd.f32 %v1026_v14, %v979_v47  ;;  %v396_v37 = vmul.f32 %v4869_v18, %v4868_v44  ;;  %v1140_v53 = vmul.f32 %v4870_v24, %v4869_v18  ;;  %v1106_v23 = vmul.f32 %v4871_v2, %v2945_v48  ;;  %v4876_v47 = vld [vmem:[#allocation30_spill] sm:$0xff]  ;;  %v4878_v2 = vld [vmem:[#allocation77_spill] sm:$0xff] }
  0xc4   :  { %v1077_v27 = vadd.f32 %v3414_v60, %v1029_v58  ;;  %v397_v5 = vmul.f32 %v4869_v18, %v4872_v32  ;;  %1156 = vrot.lane.b32.xlu1 %v4873_v42, %s2437_s0  ;;  %v1141_v20 = vmul.f32 %v4874_v15, %v4869_v18  ;;  %v394_v60 = vmul.f32 %v4869_v18, %v4875_v26  ;;  %v4880_v24 = vld [vmem:[#allocation102_spill] sm:$0xff] }
  0xc5   :  { %v1078_v14 = vadd.f32 %v3418_v36, %v1030_v11  ;;  %v400_v0 = vadd.f32 %v396_v37, %v361_v22  ;;  %1158 = vrot.lane.b32.xlu0 %v4876_v47, %s2437_s0  ;;  %v3689_v39 = vmul.f32 %v4877_v16, %v3638_v19  ;;  %v395_v42 = vmul.f32 %v4869_v18, %v4878_v2  ;;  %v4879_v11 = vld [vmem:[#allocation80_spill] sm:$0xff] }
  0xc6   :  { %v1109_v54 = vadd.f32 %v1105_v45, %v1077_v27  ;;  %v401_v58 = vadd.f32 %v397_v5, %v362_v55  ;;  %v539_v15 = vmul.f32 %v4880_v24, %v4879_v11  ;;  %v398_v37 = vadd.f32 %v394_v60, %v359_v59  ;;  %v4882_v45 = vld [vmem:[#allocation31_spill] sm:$0xff] }
  0xc7   :  { %v1110_v36 = vadd.f32 %v1106_v23, %v1078_v14  ;;  %v455_v22 = vadd.f32 %v3479_v40, %v400_v0  ;;  %v399_v47 = vadd.f32 %v395_v42, %v360_v21  ;;  %v537_v44 = vmul.f32 %v4880_v24, %v4881_v30  ;;  %v4883_v23 = vld [vmem:[#allocation82_spill] sm:$0xff]  ;;  %v4884_v40 = vld [vmem:[#allocation37_spill] sm:$0xff] }
  0xc8   :  { %v1144_v9 = vadd.f32 %v1140_v53, %v1109_v54  ;;  %v456_v28 = vadd.f32 %v3483_v41, %v401_v58  ;;  %1160 = vrot.lane.b32.xlu1 %v4882_v45, %s2437_s0  ;;  %v538_v5 = vmul.f32 %v4880_v24, %v4883_v23  ;;  %v453_v14 = vadd.f32 %v3465_v51, %v398_v37  ;;  %v4885_v53 = vld [vmem:[#allocation70_spill] sm:$0xff]  ;;  %v4886_v54 = vld [vmem:[#allocation72_spill] sm:$0xff]  ;;  %v4892_v37 = vld [vmem:[#allocation83_spill] sm:$0xff] }
  0xc9   :  { %v1145_v55 = vadd.f32 %v1141_v20, %v1110_v36  ;;  %v507_v27 = vadd.f32 %v3565_v38, %v455_v22  ;;  %553 = vrot.lane.b32.xlu0 %v4884_v40, %s2437_s0  ;;  %v454_v59 = vadd.f32 %v3469_v52, %v399_v47  ;;  %v1107_v0 = vmul.f32 %v4885_v53, %v2945_v48  ;;  %v4888_v52 = vld [vmem:[#allocation38_spill] sm:$0xff]  ;;  %v4897_v40 = vld [vmem:[#allocation63_spill] sm:$0xff] }
  0xca   :  { %v1195_v41 = vadd.f32 %v3504_v13, %v1144_v9  ;;  %v508_v21 = vadd.f32 %v3569_v50, %v456_v28  ;;  %v505_v60 = vadd.f32 %v3552_v3, %v453_v14  ;;  %v1108_v51 = vmul.f32 %v4886_v54, %v2945_v48  ;;  %v4887_v50 = vld [vmem:[#allocation78_spill] sm:$0xff]  ;;  %v4889_v3 = vld [vmem:[#allocation79_spill] sm:$0xff]  ;;  %v4890_v48 = vld [vmem:[#allocation129_spill] sm:$0xff] }
  0xcb   :  { %v1196_v20 = vadd.f32 %v3512_v7, %v1145_v55  ;;  %v543_v38 = vadd.f32 %v539_v15, %v507_v27  ;;  %v506_v42 = vadd.f32 %v3556_v8, %v454_v59  ;;  %v1111_v13 = vadd.f32 %v1107_v0, %v1079_v61  ;;  %v4893_v55 = vld [vmem:[#allocation88_spill] sm:$0xff]  ;;  %v4894_v27 = vld [vmem:[#allocation103_spill] sm:$0xff] }
  0xcc   :  { %v1243_v58 = vadd.f32 %v3573_v49, %v1195_v41  ;;  %v1142_v28 = vmul.f32 %v4887_v50, %v4869_v18  ;;  %555 = vrot.lane.b32.xlu1 %v4888_v52, %s2437_s0  ;;  %v541_v7 = vadd.f32 %v537_v44, %v505_v60  ;;  %v1112_v15 = vadd.f32 %v1108_v51, %v1080_v63  ;;  %v4891_v49 = vld [vmem:[#allocation61_spill] sm:$0xff]  ;;  %v4896_v14 = vld [vmem:[#allocation91_spill] sm:$0xff]  ;;  %v4898_v0 = vld [vmem:[#allocation92_spill] sm:$0xff] }
  0xcd   :  { %v1244_v9 = vadd.f32 %v3577_v29, %v1196_v20  ;;  %v1143_v36 = vmul.f32 %v4889_v3, %v4869_v18  ;;  %557 = vrot.lane.b32.xlu0 %v4890_v48, %s2437_s0  ;;  %v685_v8 = vmul.f32 %v4891_v49, %v3638_v19  ;;  %v542_v61 = vadd.f32 %v538_v5, %v506_v42  ;;  %v4895_v44 = vld [vmem:[#allocation89_spill] sm:$0xff]  ;;  %v4899_v60 = vld [vmem:[#allocation32_spill] sm:$0xff]  ;;  %v4901_v52 = vld [vmem:[#allocation115_spill] sm:$0xff] }
  0xce   :  { %v1146_v22 = vadd.f32 %v1142_v28, %v1111_v13  ;;  %v540_v47 = vmul.f32 %v4880_v24, %v4892_v37  ;;  %v579_v29 = vmul.f32 %v4894_v27, %v4893_v55  ;;  %v576_v63 = vmul.f32 %v4894_v27, %v4895_v44  ;;  %v4900_v28 = vld [vmem:[#allocation95_spill] sm:$0xff] }
  0xcf   :  { %v1147_v45 = vadd.f32 %v1143_v36, %v1112_v15  ;;  %v577_v18 = vmul.f32 %v4894_v27, %v4896_v14  ;;  %v686_v41 = vmul.f32 %v4897_v40, %v3638_v19  ;;  %v578_v20 = vmul.f32 %v4894_v27, %v4898_v0  ;;  %v4902_v36 = vld [vmem:[#allocation40_spill] sm:$0xff] }
  0xd0   :  { %v1197_v59 = vadd.f32 %v3516_v17, %v1146_v22  ;;  %v544_v5 = vadd.f32 %v540_v47, %v508_v21  ;;  %1162 = vrot.lane.b32.xlu1 %v4899_v60, %s2437_s0  ;;  %v580_v42 = vadd.f32 %v576_v63, %v541_v7  ;;  %v719_v15 = vmul.f32 %v4901_v52, %v4900_v28  ;;  %v4903_v22 = vld [vmem:[#allocation96_spill] sm:$0xff]  ;;  %v4905_v7 = vld [vmem:[#allocation99_spill] sm:$0xff] }
  0xd1   :  { %v1198_v51 = vadd.f32 %v3520_v35, %v1147_v45  ;;  %v581_v13 = vadd.f32 %v577_v18, %v542_v61  ;;  %559 = vrot.lane.b32.xlu0 %v4902_v36, %s2437_s0  ;;  %v582_v21 = vadd.f32 %v578_v20, %v543_v38  ;;  %v720_v47 = vmul.f32 %v4901_v52, %v4903_v22  ;;  %v4904_v60 = vld [vmem:[#allocation12_spill] sm:$0xff]  ;;  %v4907_v38 = vld [vmem:[#allocation107_spill] sm:$0xff] }
  0xd2   :  { %v1245_v48 = vadd.f32 %v3583_v25, %v1197_v59  ;;  %v583_v17 = vadd.f32 %v579_v29, %v544_v5  ;;  %v635_v14 = vadd.f32 %v4904_v60, %v580_v42  ;;  %v721_v61 = vmul.f32 %v4901_v52, %v4905_v7  ;;  %v4906_v18 = vld [vmem:[#allocation100_spill] sm:$0xff]  ;;  %v4908_v29 = vld [vmem:[#allocation127_spill] sm:$0xff]  ;;  %v4911_v42 = vld [vmem:[#allocation109_spill] sm:$0xff] }
  0xd3   :  { %v1246_v0 = vadd.f32 %v3591_v33, %v1198_v51  ;;  %v636_v35 = vadd.f32 %v3598_v1, %v581_v13  ;;  %v637_v45 = vadd.f32 %v3634_v10, %v582_v21  ;;  %v722_v25 = vmul.f32 %v4901_v52, %v4906_v18  ;;  %v4909_v5 = vld [vmem:[#allocation131_spill] sm:$0xff]  ;;  %v4910_v20 = vld [vmem:[#allocation108_spill] sm:$0xff]  ;;  %v4914_v60 = vld [vmem:[#allocation85_spill] sm:$0xff] }
  0xd4   :  { %v638_v63 = vadd.f32 %v3642_v12, %v583_v17  ;;  %v758_v59 = vmul.f32 %v4908_v29, %v4907_v38  ;;  %592 = vrot.lane.b32.xlu1 %v4909_v5, %s2437_s0  ;;  %v687_v33 = vadd.f32 %v3665_v46, %v635_v14  ;;  %v759_v51 = vmul.f32 %v4908_v29, %v4910_v20  ;;  %v4912_v12 = vld [vmem:[#allocation132_spill] sm:$0xff]  ;;  %v4913_v17 = vld [vmem:[#allocation110_spill] sm:$0xff]  ;;  %v4916_v20 = vld [vmem:[#allocation87_spill] sm:$0xff] }
  0xd5   :  { %v688_v1 = vadd.f32 %v3689_v39, %v636_v35  ;;  %v760_v10 = vmul.f32 %v4908_v29, %v4911_v42  ;;  %594 = vrot.lane.b32.xlu0 %v4912_v12, %s2437_s0  ;;  %v689_v13 = vadd.f32 %v685_v8, %v637_v45  ;;  %v761_v21 = vmul.f32 %v4908_v29, %v4913_v17  ;;  %v4915_v39 = vld [vmem:[#allocation86_spill] sm:$0xff]  ;;  %v4918_v45 = vld [vmem:[#allocation133_spill] sm:$0xff] }
  0xd6   :  { %v690_v36 = vadd.f32 %v686_v41, %v638_v63  ;;  %v1271_v5 = vmul.f32 %v4914_v60, %v4880_v24  ;;  %v723_v46 = vadd.f32 %v719_v15, %v687_v33  ;;  %v1272_v35 = vmul.f32 %v4915_v39, %v4880_v24  ;;  %v4917_v12 = vld [vmem:[#allocation90_spill] sm:$0xff]  ;;  %v4934_v39 = vld [vmem:[#allocation104_spill] sm:$0xff] }
  0xd7   :  { %v724_v14 = vadd.f32 %v720_v47, %v688_v1  ;;  %v1273_v7 = vmul.f32 %v4916_v20, %v4880_v24  ;;  %v725_v42 = vadd.f32 %v721_v61, %v689_v13  ;;  %v1274_v8 = vmul.f32 %v4917_v12, %v4880_v24  ;;  %v4919_v33 = vld [vmem:[#allocation134_spill] sm:$0xff]  ;;  %v4920_v24 = vld [vmem:[#allocation93_spill] sm:$0xff] }
  0xd8   :  { %v726_v18 = vadd.f32 %v722_v25, %v690_v36  ;;  %v1275_v41 = vadd.f32 %v1271_v5, %v1243_v58  ;;  %596 = vrot.lane.b32.xlu1 %v4918_v45, %s2437_s0  ;;  %v3785_v63 = vadd.f32 %v758_v59, %v723_v46  ;;  %v1276_v15 = vadd.f32 %v1272_v35, %v1244_v9  ;;  %v4921_v13 = vld [vmem:[#allocation57_spill] sm:$0xff]  ;;  %v4922_v59 = vld [vmem:[#allocation58_spill] sm:$0xff]  ;;  %v4928_v35 = vld [vmem:[#allocation43_spill] sm:$0xff] }
  0xd9   :  { %v3787_v17 = vadd.f32 %v759_v51, %v724_v14  ;;  %v1277_v47 = vadd.f32 %v1273_v7, %v1245_v48  ;;  %598 = vrot.lane.b32.xlu0 %v4919_v33, %s2437_s0  ;;  %v3791_v1 = vadd.f32 %v760_v10, %v725_v42  ;;  %v1278_v25 = vadd.f32 %v1274_v8, %v1246_v0  ;;  %v4923_v9 = vld [vmem:[#allocation94_spill] sm:$0xff]  ;;  %v4924_v7 = vld [vmem:[#allocation97_spill] sm:$0xff]  ;;  %v4926_v0 = vld [vmem:[#allocation64_spill] sm:$0xff] }
  0xda   :  { %v3793_v61 = vadd.f32 %v761_v21, %v726_v18  ;;  %v1306_v58 = vmul.f32 %v4920_v24, %v4894_v27  ;;  %v1358_v36 = vmul.f32 %v4921_v13, %v3561_v6  ;;  %v1359_v51 = vmul.f32 %v4922_v59, %v3561_v6  ;;  %v4925_v42 = vld [vmem:[#allocation62_spill] sm:$0xff]  ;;  %v4929_v8 = vld [vmem:[#allocation65_spill] sm:$0xff] }
  0xdb   :  { %v1307_v48 = vmul.f32 %v4923_v9, %v4894_v27  ;;  %v1308_v5 = vmul.f32 %v4924_v7, %v4894_v27  ;;  %v1360_v18 = vmul.f32 %v4925_v42, %v3561_v6  ;;  %v1405_v10 = vmul.f32 %v4926_v0, %v3638_v19  ;;  %v4927_v21 = vld [vmem:[#allocation98_spill] sm:$0xff]  ;;  %v4931_v6 = vld [vmem:[#allocation44_spill] sm:$0xff]  ;;  %v4932_v7 = vld [vmem:[#allocation67_spill] sm:$0xff] }
  0xdc   :  { %v1309_v46 = vmul.f32 %v4927_v21, %v4894_v27  ;;  %v1310_v14 = vadd.f32 %v1306_v58, %v1275_v41  ;;  %1287 = vrot.lane.b32.xlu1 %v4928_v35, %s2437_s0  ;;  %v1406_v45 = vmul.f32 %v4929_v8, %v3638_v19  ;;  %v4930_v33 = vld [vmem:[#allocation66_spill] sm:$0xff]  ;;  %v1408_v20 = vmul.f32 %v4932_v7, %v3638_v19  ;;  %v4933_v58 = vld [vmem:[#allocation101_spill] sm:$0xff] }
  0xdd   :  { %v1407_v38 = vmul.f32 %v4930_v33, %v3638_v19  ;;  %v1311_v22 = vadd.f32 %v1307_v48, %v1276_v15  ;;  %v1312_v28 = vadd.f32 %v1308_v5, %v1277_v47  ;;  %1289 = vrot.lane.b32.xlu0 %v4931_v6, %s2437_s0  ;;  %v1437_v35 = vmul.f32 %v4933_v58, %v4901_v52  ;;  %v4935_v15 = vld [vmem:[#allocation105_spill] sm:$0xff]  ;;  %v4936_v6 = vld [vmem:[#allocation106_spill] sm:$0xff] }
  0xde   :  { %v1313_v12 = vadd.f32 %v1309_v46, %v1278_v25  ;;  %v1361_v41 = vadd.f32 %v3646_v43, %v1310_v14  ;;  %v1438_v24 = vmul.f32 %v4934_v39, %v4901_v52  ;;  %v1439_v47 = vmul.f32 %v4935_v15, %v4901_v52  ;;  %v4937_v25 = vld [vmem:[#allocation111_spill] sm:$0xff]  ;;  %v4943_v39 = vld [vmem:[#allocation48_spill] sm:$0xff] }
  0xdf   :  { %v1362_v21 = vadd.f32 %v1358_v36, %v1311_v22  ;;  %v1363_v9 = vadd.f32 %v1359_v51, %v1312_v28  ;;  %v1440_v60 = vmul.f32 %v4936_v6, %v4901_v52  ;;  %v1472_v46 = vmul.f32 %v4937_v25, %v4908_v29  ;;  %v4938_v43 = vld [vmem:[#allocation135_spill] sm:$0xff]  ;;  %v4939_v28 = vld [vmem:[#allocation112_spill] sm:$0xff] }
  0xe0   :  { %v1364_v48 = vadd.f32 %v1360_v18, %v1313_v12  ;;  %v1409_v5 = vadd.f32 %v1405_v10, %v1361_v41  ;;  %1291 = vrot.lane.b32.xlu1 %v4938_v43, %s2437_s0  ;;  %v1473_v36 = vmul.f32 %v4939_v28, %v4908_v29  ;;  %v4940_v51 = vld [vmem:[#allocation47_spill] sm:$0xff]  ;;  %v4941_v18 = vld [vmem:[#allocation113_spill] sm:$0xff]  ;;  %v4942_v41 = vld [vmem:[#allocation114_spill] sm:$0xff]  ;;  %v1314_v25 = vmul.f32 %v4943_v39, %v4894_v27 }
  0xe1   :  { %v1410_v14 = vadd.f32 %v1406_v45, %v1362_v21  ;;  %v1411_v22 = vadd.f32 %v1407_v38, %v1363_v9  ;;  %1293 = vrot.lane.b32.xlu0 %v4940_v51, %s2437_s0  ;;  %v1474_v10 = vmul.f32 %v4941_v18, %v4908_v29  ;;  %v1475_v6 = vmul.f32 %v4942_v41, %v4908_v29  ;;  %v4944_v38 = vld [vmem:[#allocation49_spill] sm:$0xff]  ;;  %v4945_v39 = vld [vmem:[#allocation50_spill] sm:$0xff] }
  0xe2   :  { %v1412_v15 = vadd.f32 %v1408_v20, %v1364_v48  ;;  %v1441_v12 = vadd.f32 %v1437_v35, %v1409_v5  ;;  %v1315_v9 = vmul.f32 %v4944_v38, %v4894_v27  ;;  %v4949_v38 = vld [vmem:[#allocation16_spill] sm:$0xff] }
  0xe3   :  { %v1442_v43 = vadd.f32 %v1438_v24, %v1410_v14  ;;  %v1443_v21 = vadd.f32 %v1439_v47, %v1411_v22  ;;  %v1316_v24 = vmul.f32 %v4945_v39, %v4894_v27  ;;  %v4946_v47 = vld [vmem:[#allocation52_spill] sm:$0xff]  ;;  %v730_v14 = vmul.f32 %v4901_v52, %v4858_v57 }
  0xe4   :  { %v1444_v45 = vadd.f32 %v1440_v60, %v1412_v15  ;;  %v3846_v28 = vadd.f32 %v1472_v46, %v1441_v12  ;;  %1322 = vrot.lane.b32.xlu1 %v1314_v25, %s2437_s0  ;;  %v727_v5 = vmul.f32 %v4901_v52, %v4946_v47  ;;  %v4947_v60 = vld [vmem:[#allocation53_spill] sm:$0xff]  ;;  %v729_v25 = vmul.f32 %v4901_v52, %v4857_v31  ;;  %v4951_v47 = vld [vmem:[#allocation15_spill] sm:$0xff] }
  0xe5   :  { %v3849_v20 = vadd.f32 %v1473_v36, %v1442_v43  ;;  %v3851_v35 = vadd.f32 %v1474_v10, %v1443_v21  ;;  %1324 = vrot.lane.b32.xlu0 %v1315_v9, %s2437_s0  ;;  %v728_v15 = vmul.f32 %v4901_v52, %v4947_v60  ;;  %v2438_v22 = vmov 0.0  }
  0xe6   :  { %v3854_v48 = vadd.f32 %v1475_v6, %v1444_v45  ;;  %v4948_v6 = vld [vmem:[#allocation51_spill] sm:$0xff]  ;;  %1856 = vst [vmem:[#allocation2] sm:$0xff] %v2438_v22  ;;  %v766_v31 = vmul.f32 %v4908_v29, %v4866_v34  ;;  %v767_v36 = vmul.f32 %v4908_v29, %v4877_v16  ;;  %v768_v57 = vmul.f32 %v4908_v29, %v4891_v49 }
  0xe7   :  { %v1317_v46 = vmul.f32 %v4948_v6, %v4894_v27  ;;  %v769_v27 = vmul.f32 %v4908_v29, %v4897_v40  ;;  %v1445_v34 = vmul.f32 %v4859_v4, %v4901_v52  ;;  %v1446_v16 = vmul.f32 %v4921_v13, %v4901_v52  ;;  %v4952_v6 = vld [vmem:[#allocation138_spill] sm:$0xff] }
  0xe8   :  { %1326 = vrot.lane.b32.xlu1 %v1316_v24, %s2437_s0  ;;  %v1447_v49 = vmul.f32 %v4922_v59, %v4901_v52  ;;  %v1448_v40 = vmul.f32 %v4925_v42, %v4901_v52  ;;  %v1480_v13 = vmul.f32 %v4926_v0, %v4908_v29  ;;  %v1481_v21 = vmul.f32 %v4929_v8, %v4908_v29  ;;  %v4950_v24 = vld [vmem:[#allocation39_spill] sm:$0xff] }
  0xe9   :  { %735 = vrot.lane.b32.xlu0 %v727_v5, %s2437_s0  ;;  %v1482_v42 = vmul.f32 %v4930_v33, %v4908_v29  ;;  %v1483_v39 = vmul.f32 %v4932_v7, %v4908_v29 }
  0xec   :  { %737 = vrot.lane.b32.xlu1 %v728_v15, %s2437_s0 }
  0xed   :  { %739 = vrot.lane.b32.xlu0 %v729_v25, %s2437_s0 }
  0xf0   :  { %1328 = vrot.lane.b32.xlu1 %v1317_v46, %s2437_s0  ;;  %v4953_v46 = vld [vmem:[#allocation33_spill] sm:$0xff] }
  0xf1   :  { %741 = vrot.lane.b32.xlu0 %v730_v14, %s2437_s0  ;;  %v291_v14 = vmul.f32 %v4953_v46, %v4952_v6 }
  0xf4   :  { %774 = vrot.lane.b32.xlu1 %v766_v31, %s2437_s0  ;;  %v4954_v31 = vld [vmem:[#allocation34_spill] sm:$0xff] }
  0xf5   :  { %776 = vrot.lane.b32.xlu0 %v767_v36, %s2437_s0  ;;  %v292_v29 = vmul.f32 %v4954_v31, %v4952_v6  ;;  %v4960_v31 = vld [vmem:[#allocation122_spill] sm:$0xff] }
  0xf8   :  { %778 = vrot.lane.b32.xlu1 %v768_v57, %s2437_s0  ;;  %v4955_v57 = vld [vmem:[#allocation117_spill] sm:$0xff] }
  0xf9   :  { %780 = vrot.lane.b32.xlu0 %v769_v27, %s2437_s0  ;;  %v193_v51 = vpop.permute.xlu0 %192  ;;  %v189_v12 = vpop.permute.xlu1 %188 }
  0xfc   :  { %1453 = vrot.lane.b32.xlu1 %v1445_v34, %s2437_s0 }
  0xfd   :  { %1455 = vrot.lane.b32.xlu0 %v1446_v16, %s2437_s0  ;;  %v191_v4 = vpop.permute.xlu1 %190 }
  0xfe   :  { %v198_v10 = vsel %vm196_vm0, %v191_v4, %v193_v51  ;;  %v229_v43 = vpop.permute.xlu0 %228  ;;  %v197_v9 = vsel %vm196_vm0, %v189_v12, %v191_v4 }
  0xff   :  { %v205_v59 = vadd.f32 %v198_v10, %v4949_v38  ;;  %v204_v5 = vadd.f32 %v197_v9, %v4951_v47 }
 0x100   :  { %1457 = vrot.lane.b32.xlu1 %v1447_v49, %s2437_s0 }
 0x101   :  { %1459 = vrot.lane.b32.xlu0 %v1448_v40, %s2437_s0  ;;  %v195_v52 = vpop.permute.xlu1 %194  ;;  %v4957_v40 = vld [vmem:[#allocation116_spill] sm:$0xff] }
 0x102   :  { %v199_v0 = vsel %vm196_vm0, %v193_v51, %v195_v52  ;;  %v233_v45 = vpop.permute.xlu0 %232  ;;  %v207_v27 = vadd.f32 %v195_v52, %v4955_v57  ;;  %v4956_v51 = vld [vmem:[#allocation35_spill] sm:$0xff]  ;;  %v343_v4 = vmul.f32 %v4875_v26, %v4957_v40  ;;  %v346_v26 = vmul.f32 %v4872_v32, %v4957_v40 }
 0x103   :  { %v206_v8 = vadd.f32 %v199_v0, %v4950_v24  ;;  %v293_v12 = vmul.f32 %v4956_v51, %v4952_v6  ;;  %v4961_v32 = vld [vmem:[#allocation11_spill] sm:$0xff]  ;;  %v812_v57 = vmul.f32 %v3785_v63, %v3785_v63  ;;  %v4962_v51 = vld [vmem:[#allocation68_spill] sm:$0xff] }
 0x104   :  { %1488 = vrot.lane.b32.xlu1 %v1480_v13, %s2437_s0  ;;  %v4958_v13 = vld [vmem:[#allocation36_spill] sm:$0xff] }
 0x105   :  { %1490 = vrot.lane.b32.xlu0 %v1481_v21, %s2437_s0  ;;  %v231_v60 = vpop.permute.xlu1 %230  ;;  %v294_v10 = vmul.f32 %v4958_v13, %v4952_v6 }
 0x106   :  { %v236_v15 = vsel %vm196_vm0, %v229_v43, %v231_v60  ;;  %v237_v33 = vsel %vm196_vm0, %v231_v60, %v233_v45  ;;  %v960_v25 = vpop.permute.xlu0 %959  ;;  %v4959_v60 = vld [vmem:[#allocation74_spill] sm:$0xff] }
 0x107   :  { %v243_v7 = vadd.f32 %v236_v15, %v204_v5  ;;  %v244_v36 = vadd.f32 %v237_v33, %v205_v59  ;;  %v344_v59 = vmul.f32 %v4878_v2, %v4957_v40  ;;  %v345_v15 = vmul.f32 %v4959_v60, %v4957_v40 }
 0x108   :  { %1492 = vrot.lane.b32.xlu1 %v1482_v42, %s2437_s0 }
 0x109   :  { %1494 = vrot.lane.b32.xlu0 %v1483_v39, %s2437_s0  ;;  %v295_v34 = vadd.f32 %v291_v14, %v243_v7  ;;  %v296_v16 = vadd.f32 %v292_v29, %v244_v36  ;;  %v235_v49 = vpop.permute.xlu1 %234 }
 0x10a   :  { %v238_v43 = vsel %vm196_vm0, %v233_v45, %v235_v49  ;;  %v246_v21 = vadd.f32 %v235_v49, %v207_v27  ;;  %v962_v38 = vpop.permute.xlu0 %961  ;;  %v813_v27 = vmul.f32 %v3787_v17, %v3787_v17 }
 0x10b   :  { %v245_v52 = vadd.f32 %v238_v43, %v206_v8  ;;  %v965_v42 = vsel %vm196_vm0, %v960_v25, %v962_v38  ;;  %v973_v9 = vadd.f32 %v962_v38, %v3621_v56  ;;  %v347_v0 = vadd.f32 %v343_v4, %v295_v34 }
 0x10c   :  { %v298_v39 = vadd.f32 %v294_v10, %v246_v21  ;;  %v972_v24 = vadd.f32 %v965_v42, %v3610_v62  ;;  %v3938_v47 = vadd.f32 %v344_v59, %v296_v16  ;;  %v816_v13 = vadd.f32 %v813_v27, %v812_v57  ;;  %v4963_v10 = vld [vmem:[#allocation71_spill] sm:$0xff]  ;;  %v4964_v59 = vld [vmem:[#allocation69_spill] sm:$0xff] }
 0x10d   :  { %v297_v45 = vadd.f32 %v293_v12, %v245_v52  ;;  %v956_v5 = vpop.permute.xlu1 %955  ;;  %v1049_v12 = vmul.f32 %v4962_v51, %v4952_v6  ;;  %v1097_v43 = vmul.f32 %v4963_v10, %v4957_v40  ;;  %v1050_v52 = vmul.f32 %v4964_v59, %v4952_v6 }
 0x10e   :  { %v993_v2 = vpop.permute.xlu0 %992  ;;  %v350_v8 = vadd.f32 %v346_v26, %v298_v39  ;;  %v814_v39 = vmul.f32 %v3791_v1, %v3791_v1  ;;  %v1052_v51 = vmul.f32 %v4886_v54, %v4952_v6  ;;  %v800_v54 = vsel %vm799_vm1, %v3793_v61, 0.0 }
 0x10f   :  { %v3942_v33 = vadd.f32 %v345_v15, %v297_v45  ;;  %v815_v45 = vmul.f32 %v3793_v61, %v3793_v61 }
 0x111   :  { %v958_v46 = vpop.permute.xlu1 %957  ;;  %v818_v57 = vsel %vm799_vm1, %v815_v45, 0.0 }
 0x112   :  { %v963_v56 = vsel %vm196_vm0, %v956_v5, %v958_v46  ;;  %v964_v14 = vsel %vm196_vm0, %v958_v46, %v960_v25  ;;  %v372_v62 = vpop.permute.xlu0 %371  ;;  %v797_v5 = vadd.f32 %v3787_v17, %v3785_v63  ;;  %v817_v46 = vadd.f32 %v816_v13, %v814_v39  ;;  %v4966_v13 = vld [vmem:[#allocation128_spill] sm:$0xff]  ;;  %v4967_v39 = vld [vmem:[#allocation19_spill] sm:$0xff] }
 0x113   :  { %v970_v29 = vadd.f32 %v963_v56, %v4960_v31  ;;  %v971_v7 = vadd.f32 %v964_v14, %v4961_v32  ;;  %v4965_v56 = vld [vmem:[#allocation73_spill] sm:$0xff]  ;;  %v476_v10 = vmul.f32 %v4892_v37, %v4966_v13  ;;  %v1100_v37 = vmul.f32 %v4889_v3, %v4957_v40 }
 0x114   :  { %v1098_v14 = vmul.f32 %v4965_v56, %v4957_v40  ;;  %v798_v27 = vadd.f32 %v797_v5, %v3791_v1  ;;  %v528_v45 = vmul.f32 %v4893_v55, %v4967_v39 }
 0x119   :  { %v991_v36 = vpop.permute.xlu1 %990 }
 0x11a   :  { %v998_v34 = vsel %vm196_vm0, %v991_v36, %v993_v2  ;;  %v376_v16 = vpop.permute.xlu0 %375  ;;  %v1051_v36 = vmul.f32 %v4885_v53, %v4952_v6  ;;  %v473_v53 = vmul.f32 %v4881_v30, %v4966_v13  ;;  %v1099_v6 = vmul.f32 %v4887_v50, %v4957_v40 }
 0x11b   :  { %v1005_v49 = vadd.f32 %v998_v34, %v970_v29 }
 0x11d   :  { %v1053_v25 = vadd.f32 %v1049_v12, %v1005_v49  ;;  %v995_v4 = vpop.permute.xlu1 %994  ;;  %v819_v49 = vadd.f32 %v818_v57, %v817_v46 }
 0x11e   :  { %v999_v21 = vsel %vm196_vm0, %v993_v2, %v995_v4  ;;  %v378_v38 = vpop.permute.xlu0 %377  ;;  %v1511_v2 = vadd.f32 %v3849_v20, %v3846_v28 }
 0x11f   :  { %v1006_v42 = vadd.f32 %v999_v21, %v971_v7  ;;  %v3962_v26 = vadd.f32 %v1097_v43, %v1053_v25  ;;  %v389_v34 = vadd.f32 %v378_v38, %v350_v8  ;;  %v381_v5 = vsel %vm196_vm0, %v376_v16, %v378_v38 }
 0x120   :  { %v388_v40 = vadd.f32 %v381_v5, %v3942_v33  ;;  %v525_v38 = vmul.f32 %v4895_v44, %v4967_v39  ;;  %v4968_v44 = vld [vmem:[#allocation91_spill] sm:$0xff]  ;;  %v4972_v5 = vld [vmem:[#allocation86_spill] sm:$0xff] }
 0x121   :  { %v1054_v60 = vadd.f32 %v1050_v52, %v1006_v42  ;;  %v374_v15 = vpop.permute.xlu1 %373 }
 0x122   :  { %v379_v31 = vsel %vm196_vm0, %v372_v62, %v374_v15  ;;  %v413_v29 = vpop.permute.xlu0 %412  ;;  %v1512_v62 = vadd.f32 %v1511_v2, %v3851_v35 }
 0x123   :  { %v386_v32 = vadd.f32 %v379_v31, %v347_v0  ;;  %v3973_v7 = vadd.f32 %v1098_v14, %v1054_v60  ;;  %v380_v60 = vsel %vm196_vm0, %v374_v15, %v376_v16  ;;  %v474_v16 = vmul.f32 %v4883_v23, %v4966_v13  ;;  %v4969_v23 = vld [vmem:[#allocation92_spill] sm:$0xff] }
 0x124   :  { %v387_v31 = vadd.f32 %v380_v60, %v3938_v47 }
 0x125   :  { %v997_v12 = vpop.permute.xlu1 %996 }
 0x126   :  { %v1000_v0 = vsel %vm196_vm0, %v995_v4, %v997_v12  ;;  %v1008_v25 = vadd.f32 %v997_v12, %v973_v9  ;;  %v417_v43 = vpop.permute.xlu0 %416  ;;  %v1513_v9 = vsel %vm799_vm1, %v3854_v48, 0.0  ;;  %v801_v4 = vadd.f32 %v800_v54, %v798_v27 }
 0x127   :  { %v1007_v21 = vadd.f32 %v1000_v0, %v972_v24  ;;  %v428_v59 = vadd.f32 %v417_v43, %v389_v34  ;;  %v1514_v24 = vadd.f32 %v1513_v9, %v1512_v62  ;;  %v475_v27 = vmul.f32 %v4879_v11, %v4966_v13 }
 0x128   :  { %820 = vadd.xlane.f32.xlu0 %v819_v49  ;;  %v1056_v8 = vadd.f32 %v1052_v51, %v1008_v25  ;;  %v526_v0 = vmul.f32 %v4968_v44, %v4967_v39  ;;  %v527_v25 = vmul.f32 %v4969_v23, %v4967_v39 }
 0x129   :  { %v1055_v52 = vadd.f32 %v1051_v36, %v1007_v21  ;;  %v480_v42 = vadd.f32 %v476_v10, %v428_v59 }
 0x12a   :  { %v411_v30 = vpop.permute.xlu1 %410  ;;  %v1104_v2 = vadd.f32 %v1100_v37, %v1056_v8 }
 0x12b   :  { %v418_v50 = vsel %vm196_vm0, %v411_v30, %v413_v29  ;;  %v1122_v46 = vpop.permute.xlu0 %1121  ;;  %v1103_v14 = vadd.f32 %v1099_v6, %v1055_v52  ;;  %v4000_v3 = vadd.f32 %v528_v45, %v480_v42  ;;  %v4970_v6 = vld [vmem:[#allocation85_spill] sm:$0xff] }
 0x12c   :  { %v425_v56 = vadd.f32 %v418_v50, %v386_v32  ;;  %1515 = vadd.xlane.f32.xlu0 %v1514_v24  ;;  %802 = vadd.xlane.f32.xlu1 %v801_v4  ;;  %v1215_v8 = vmul.f32 %v4970_v6, %v4966_v13  ;;  %v4971_v24 = vld [vmem:[#allocation93_spill] sm:$0xff] }
 0x12d   :  { %v1263_v45 = vmul.f32 %v4971_v24, %v4967_v39 }
 0x12e   :  { %v477_v36 = vadd.f32 %v473_v53, %v425_v56  ;;  %v415_v55 = vpop.permute.xlu1 %414 }
 0x12f   :  { %v419_v15 = vsel %vm196_vm0, %v413_v29, %v415_v55  ;;  %v420_v32 = vsel %vm196_vm0, %v415_v55, %v417_v43  ;;  %v1126_v57 = vpop.permute.xlu0 %1125 }
 0x130   :  { %v426_v34 = vadd.f32 %v419_v15, %v387_v31  ;;  %v427_v33 = vadd.f32 %v420_v32, %v388_v40  ;;  %v529_v51 = vadd.f32 %v525_v38, %v477_v36  ;;  %v4973_v40 = vld [vmem:[#allocation94_spill] sm:$0xff] }
 0x131   :  { %v1264_v31 = vmul.f32 %v4973_v40, %v4967_v39  ;;  %v4974_v32 = vld [vmem:[#allocation90_spill] sm:$0xff]  ;;  %v4982_v40 = vld [vmem:[#allocation100_spill] sm:$0xff] }
 0x132   :  { %v478_v47 = vadd.f32 %v474_v16, %v426_v34  ;;  %v479_v12 = vadd.f32 %v475_v27, %v427_v33  ;;  %v1124_v49 = vpop.permute.xlu1 %1123  ;;  %v1218_v27 = vmul.f32 %v4974_v32, %v4966_v13 }
 0x133   :  { %v1128_v62 = vpop.permute.xlu0 %1127  ;;  %v1129_v29 = vsel %vm196_vm0, %v1122_v46, %v1124_v49  ;;  %v1130_v11 = vsel %vm196_vm0, %v1124_v49, %v1126_v57  ;;  %v4975_v49 = vld [vmem:[#allocation87_spill] sm:$0xff] }
 0x134   :  { %v530_v10 = vadd.f32 %v526_v0, %v478_v47  ;;  %v531_v43 = vadd.f32 %v527_v25, %v479_v12  ;;  %v1136_v21 = vadd.f32 %v1129_v29, %v3962_v26  ;;  %v1137_v4 = vadd.f32 %v1130_v11, %v3973_v7 }
 0x135   :  { %v1216_v26 = vmul.f32 %v4972_v5, %v4966_v13  ;;  %v1131_v7 = vsel %vm196_vm0, %v1126_v57, %v1128_v62  ;;  %v1139_v38 = vadd.f32 %v1128_v62, %v1104_v2  ;;  %v1217_v44 = vmul.f32 %v4975_v49, %v4966_v13  ;;  %v4976_v57 = vld [vmem:[#allocation98_spill] sm:$0xff]  ;;  %v4977_v62 = vld [vmem:[#allocation97_spill] sm:$0xff] }
 0x136   :  { %v1157_v53 = vpop.permute.xlu1 %1156  ;;  %v1138_v16 = vadd.f32 %v1131_v7, %v1103_v14  ;;  %v1266_v25 = vmul.f32 %v4976_v57, %v4967_v39  ;;  %v1265_v29 = vmul.f32 %v4977_v62, %v4967_v39 }
 0x137   :  { %v1159_v59 = vpop.permute.xlu0 %1158 }
 0x138   :  { %v1164_v54 = vsel %vm196_vm0, %v1157_v53, %v1159_v59 }
 0x139   :  { %v1171_v9 = vadd.f32 %v1164_v54, %v1136_v21 }
 0x13a   :  { %v1161_v37 = vpop.permute.xlu1 %1160 }
 0x13b   :  { %v1219_v52 = vadd.f32 %v1215_v8, %v1171_v9  ;;  %v1165_v42 = vsel %vm196_vm0, %v1159_v59, %v1161_v37  ;;  %v554_v30 = vpop.permute.xlu0 %553  ;;  %v4978_v8 = vld [vmem:[#allocation10_spill] sm:$0xff]  ;;  %v4979_v9 = vld [vmem:[#allocation95_spill] sm:$0xff] }
 0x13c   :  { %v1172_v60 = vadd.f32 %v1165_v42, %v1137_v4  ;;  %v655_v4 = vmul.f32 %v4979_v9, %v4978_v8 }
 0x13d   :  { %v1267_v50 = vadd.f32 %v1263_v45, %v1219_v52 }
 0x13e   :  { %v1220_v46 = vadd.f32 %v1216_v26, %v1172_v60  ;;  %v556_v56 = vpop.permute.xlu1 %555  ;;  %v4981_v60 = vld [vmem:[#allocation107_spill] sm:$0xff] }
 0x13f   :  { %v558_v36 = vpop.permute.xlu0 %557  ;;  %v561_v12 = vsel %vm196_vm0, %v554_v30, %v556_v56  ;;  %v4980_v30 = vld [vmem:[#allocation96_spill] sm:$0xff] }
 0x140   :  { %v1268_v55 = vadd.f32 %v1264_v31, %v1220_v46  ;;  %v568_v53 = vadd.f32 %v561_v12, %v529_v51  ;;  %v562_v11 = vsel %vm196_vm0, %v556_v56, %v558_v36  ;;  %v656_v39 = vmul.f32 %v4980_v30, %v4978_v8 }
 0x141   :  { %v569_v52 = vadd.f32 %v562_v11, %v530_v10  ;;  %v707_v46 = vmul.f32 %v4981_v60, %v3638_v19  ;;  %v658_v31 = vmul.f32 %v4982_v40, %v4978_v8  ;;  %v4990_v40 = vlaneseq }
 0x142   :  { %v1163_v15 = vpop.permute.xlu1 %1162 }
 0x143   :  { %v1166_v34 = vsel %vm196_vm0, %v1161_v37, %v1163_v15  ;;  %v1174_v33 = vadd.f32 %v1163_v15, %v1139_v38  ;;  %v560_v47 = vpop.permute.xlu0 %559  ;;  %vm1914_vm4 = vcmp.lt.s32.totalorder %v4990_v40, 498 }
 0x144   :  { %v1173_v0 = vadd.f32 %v1166_v34, %v1138_v16  ;;  %v563_v54 = vsel %vm196_vm0, %v558_v36, %v560_v47  ;;  %v571_v42 = vadd.f32 %v560_v47, %v4000_v3  ;;  %v4983_v3 = vld [vmem:[#allocation99_spill] sm:$0xff] }
 0x145   :  { %v1222_v23 = vadd.f32 %v1218_v27, %v1174_v33  ;;  %v570_v24 = vadd.f32 %v563_v54, %v531_v43  ;;  %v657_v36 = vmul.f32 %v4983_v3, %v4978_v8  ;;  %v4984_v27 = vld [vmem:[#allocation108_spill] sm:$0xff]  ;;  %v4985_v33 = vld [vmem:[#allocation110_spill] sm:$0xff] }
 0x146   :  { %v1221_v2 = vadd.f32 %v1217_v44, %v1173_v0  ;;  %v593_v14 = vpop.permute.xlu1 %592  ;;  %v708_v34 = vmul.f32 %v4984_v27, %v3638_v19  ;;  %v710_v47 = vmul.f32 %v4985_v33, %v3638_v19  ;;  %v4986_v44 = vld [vmem:[#allocation109_spill] sm:$0xff] }
 0x147   :  { %v595_v21 = vpop.permute.xlu0 %594  ;;  %v1270_v59 = vadd.f32 %v1266_v25, %v1222_v23  ;;  %v709_v0 = vmul.f32 %v4986_v44, %v3638_v19  ;;  %v1432_v44 = vmul.f32 %v4942_v41, %v3638_v19  ;;  %v1525_v41 = vmul.f32 %v3846_v28, %v3846_v28 }
 0x148   :  { %v600_v6 = vsel %vm196_vm0, %v593_v14, %v595_v21  ;;  %v1269_v13 = vadd.f32 %v1265_v29, %v1221_v2 }
 0x149   :  { %v607_v37 = vadd.f32 %v600_v6, %v568_v53  ;;  %v1381_v6 = vmul.f32 %v4933_v58, %v4978_v8  ;;  %v4989_v58 = vld [vmem:[#allocation112_spill] sm:$0xff] }
 0x14a   :  { %v597_v51 = vpop.permute.xlu1 %596 }
 0x14b   :  { %v659_v45 = vadd.f32 %v655_v4, %v607_v37  ;;  %v601_v5 = vsel %vm196_vm0, %v595_v21, %v597_v51  ;;  %v599_v26 = vpop.permute.xlu0 %598 }
 0x14c   :  { %v608_v56 = vadd.f32 %v601_v5, %v569_v52  ;;  %v602_v10 = vsel %vm196_vm0, %v597_v51, %v599_v26  ;;  %v610_v7 = vadd.f32 %v599_v26, %v571_v42 }
 0x14d   :  { %v609_v38 = vadd.f32 %v602_v10, %v570_v24  ;;  %v711_v16 = vadd.f32 %v707_v46, %v659_v45  ;;  %v1430_v46 = vmul.f32 %v4989_v58, %v3638_v19 }
 0x14e   :  { %v660_v43 = vadd.f32 %v656_v39, %v608_v56  ;;  %v662_v15 = vadd.f32 %v658_v31, %v610_v7  ;;  %v1288_v32 = vpop.permute.xlu1 %1287  ;;  %v4987_v39 = vld [vmem:[#allocation111_spill] sm:$0xff]  ;;  %v38_v31 = vand.u32 127, %v4990_v40 }
 0x14f   :  { %v661_v12 = vadd.f32 %v657_v36, %v609_v38  ;;  %v1290_v49 = vpop.permute.xlu0 %1289  ;;  %v1429_v51 = vmul.f32 %v4987_v39, %v3638_v19  ;;  %v4991_v38 = vld [vmem:[#allocation106_spill] sm:$0xff] }
 0x150   :  { %v712_v23 = vadd.f32 %v708_v34, %v660_v43  ;;  %v714_v57 = vadd.f32 %v710_v47, %v662_v15  ;;  %v1295_v62 = vsel %vm196_vm0, %v1288_v32, %v1290_v49  ;;  %v1384_v43 = vmul.f32 %v4991_v38, %v4978_v8  ;;  %v4992_v34 = vld [vmem:[#allocation105_spill] sm:$0xff] }
 0x151   :  { %v713_v25 = vadd.f32 %v709_v0, %v661_v12  ;;  %v1302_v53 = vadd.f32 %v1295_v62, %v1267_v50  ;;  %v4988_v50 = vld [vmem:[#allocation104_spill] sm:$0xff]  ;;  %v1383_v33 = vmul.f32 %v4992_v34, %v4978_v8  ;;  %v41_v12 = vadd.s32 384, %v38_v31 }
 0x152   :  { %v1292_v2 = vpop.permute.xlu1 %1291  ;;  %v1382_v24 = vmul.f32 %v4988_v50, %v4978_v8 }
 0x153   :  { %v1294_v14 = vpop.permute.xlu0 %1293  ;;  %v1296_v11 = vsel %vm196_vm0, %v1290_v49, %v1292_v2  ;;  %vm45_vm2 = vcmp.lt.s32.totalorder %v41_v12, 499 }
 0x154   :  { %v1303_v4 = vadd.f32 %v1296_v11, %v1268_v55  ;;  %v1297_v55 = vsel %vm196_vm0, %v1292_v2, %v1294_v14  ;;  %v1305_v7 = vadd.f32 %v1294_v14, %v1270_v59 }
 0x155   :  { %v1304_v3 = vadd.f32 %v1297_v55, %v1269_v13  ;;  %v1431_v13 = vmul.f32 %v4941_v18, %v3638_v19  ;;  %v1526_v19 = vmul.f32 %v3849_v20, %v3849_v20 }
 0x156   :  { %v1323_v29 = vpop.permute.xlu1 %1322 }
 0x157   :  { %v1325_v21 = vpop.permute.xlu0 %1324  ;;  %v1529_v50 = vadd.f32 %v1526_v19, %v1525_v41 }
 0x158   :  { %v1330_v54 = vsel %vm196_vm0, %v1323_v29, %v1325_v21 }
 0x159   :  { %v1337_v9 = vadd.f32 %v1330_v54, %v1302_v53 }
 0x15a   :  { %v1327_v37 = vpop.permute.xlu1 %1326 }
 0x15b   :  { %v1385_v52 = vadd.f32 %v1381_v6, %v1337_v9  ;;  %v1331_v42 = vsel %vm196_vm0, %v1325_v21, %v1327_v37  ;;  %v736_v30 = vpop.permute.xlu0 %735 }
 0x15c   :  { %v1338_v45 = vadd.f32 %v1331_v42, %v1303_v4 }
 0x15d   :  { %v4073_v5 = vadd.f32 %v1429_v51, %v1385_v52  ;;  %v2205_v52 = vsel %vm45_vm2, 1.0, %v2438_v22 }
 0x15e   :  { %v1386_v26 = vadd.f32 %v1382_v24, %v1338_v45  ;;  %v738_v60 = vpop.permute.xlu1 %737 }
 0x15f   :  { %v740_v56 = vpop.permute.xlu0 %739  ;;  %v743_v2 = vsel %vm196_vm0, %v736_v30, %v738_v60 }
 0x160   :  { %v4079_v10 = vadd.f32 %v1430_v46, %v1386_v26  ;;  %v744_v14 = vsel %vm196_vm0, %v738_v60, %v740_v56  ;;  %v750_v21 = vadd.f32 %v743_v2, %v711_v16  ;;  %v1527_v26 = vmul.f32 %v3851_v35, %v3851_v35 }
 0x161   :  { %v751_v54 = vadd.f32 %v744_v14, %v712_v23  ;;  %v1528_v60 = vmul.f32 %v3854_v48, %v3854_v48 }
 0x162   :  { %v1329_v36 = vpop.permute.xlu1 %1328  ;;  %v1530_v55 = vadd.f32 %v1529_v50, %v1527_v26  ;;  %v1584_v50 = vld [vmem:[%s4510_s2] sm:$0xff] }
 0x163   :  { %v1332_v15 = vsel %vm196_vm0, %v1327_v37, %v1329_v36  ;;  %v1340_v32 = vadd.f32 %v1329_v36, %v1305_v7  ;;  %v742_v27 = vpop.permute.xlu0 %741  ;;  %v1531_v31 = vsel %vm799_vm1, %v1528_v60, 0.0 }
 0x164   :  { %v1339_v47 = vadd.f32 %v1332_v15, %v1304_v3  ;;  %v745_v53 = vsel %vm196_vm0, %v740_v56, %v742_v27  ;;  %v753_v6 = vadd.f32 %v742_v27, %v714_v57  ;;  %v1532_v3 = vadd.f32 %v1531_v31, %v1530_v55 }
 0x165   :  { %v1388_v49 = vadd.f32 %v1384_v43, %v1340_v32  ;;  %v752_v18 = vadd.f32 %v745_v53, %v713_v25 }
 0x166   :  { %v1387_v0 = vadd.f32 %v1383_v33, %v1339_v47  ;;  %v775_v59 = vpop.permute.xlu1 %774 }
 0x167   :  { %v777_v62 = vpop.permute.xlu0 %776  ;;  %v1436_v29 = vadd.f32 %v1432_v44, %v1388_v49 }
 0x168   :  { %v1435_v8 = vadd.f32 %v1431_v13, %v1387_v0  ;;  %v782_v11 = vsel %vm196_vm0, %v775_v59, %v777_v62 }
 0x169   :  { %v4100_v42 = vadd.f32 %v782_v11, %v750_v21 }
 0x16a   :  { %v779_v9 = vpop.permute.xlu1 %778 }
 0x16b   :  { %v783_v4 = vsel %vm196_vm0, %v777_v62, %v779_v9  ;;  %v781_v37 = vpop.permute.xlu0 %780  ;;  %v823_v49 = vmul.f32 %v4100_v42, %v4100_v42 }
 0x16c   :  { %v4102_v30 = vadd.f32 %v783_v4, %v751_v54  ;;  %v784_v39 = vsel %vm196_vm0, %v779_v9, %v781_v37  ;;  %v792_v51 = vadd.f32 %v781_v37, %v753_v6 }
 0x16d   :  { %v4105_v16 = vadd.f32 %v784_v39, %v752_v18 }
 0x16e   :  { %v4107_v23 = vmul.f32 %v2205_v52, %v792_v51  ;;  %v1454_v57 = vpop.permute.xlu1 %1453  ;;  %v805_v25 = vadd.f32 %v4102_v30, %v4100_v42  ;;  %v824_v27 = vmul.f32 %v4102_v30, %v4102_v30 }
 0x16f   :  { %v1456_v24 = vpop.permute.xlu0 %1455 }
 0x170   :  { %v806_v45 = vadd.f32 %v805_v25, %v4105_v16  ;;  %v807_v22 = vsel %vm799_vm1, %v4107_v23, 0.0  ;;  %v1461_v36 = vsel %vm196_vm0, %v1454_v57, %v1456_v24  ;;  %v827_v11 = vadd.f32 %v824_v27, %v823_v49 }
 0x171   :  { %v1468_v34 = vadd.f32 %v1461_v36, %v4073_v5  ;;  %v825_v5 = vmul.f32 %v4105_v16, %v4105_v16  ;;  %v826_v41 = vmul.f32 %v4107_v23, %v4107_v23 }
 0x172   :  { %v1458_v58 = vpop.permute.xlu1 %1457  ;;  %v808_v46 = vadd.f32 %v807_v22, %v806_v45 }
 0x173   :  { %v1460_v56 = vpop.permute.xlu0 %1459  ;;  %v1462_v38 = vsel %vm196_vm0, %v1456_v24, %v1458_v58  ;;  %v828_v19 = vadd.f32 %v827_v11, %v825_v5  ;;  %v829_v37 = vsel %vm799_vm1, %v826_v41, 0.0  ;;  %v4993_v24 = vmov 0  }
 0x174   :  { %809 = vadd.xlane.f32.xlu0 %v808_v46  ;;  %v1463_v15 = vsel %vm196_vm0, %v1458_v58, %v1460_v56  ;;  %v1469_v33 = vadd.f32 %v1462_v38, %v4079_v10  ;;  %v1471_v47 = vadd.f32 %v1460_v56, %v1436_v29 }
 0x175   :  { %v1470_v44 = vadd.f32 %v1463_v15, %v1435_v8  ;;  %v830_v39 = vadd.f32 %v829_v37, %v828_v19 }
 0x176   :  { %v1489_v7 = vpop.permute.xlu1 %1488 }
 0x177   :  { %v1491_v43 = vpop.permute.xlu0 %1490 }
 0x178   :  { %1533 = vadd.xlane.f32.xlu0 %v1532_v3  ;;  %v1496_v32 = vsel %vm196_vm0, %v1489_v7, %v1491_v43 }
 0x179   :  { %v4130_v13 = vadd.f32 %v1496_v32, %v1468_v34 }
 0x17a   :  { %v1493_v12 = vpop.permute.xlu1 %1492 }
 0x17b   :  { %v1497_v0 = vsel %vm196_vm0, %v1491_v43, %v1493_v12  ;;  %v1495_v59 = vpop.permute.xlu0 %1494  ;;  %v1536_v21 = vmul.f32 %v4130_v13, %v4130_v13 }
 0x17c   :  { %v4132_v2 = vadd.f32 %v1497_v0, %v1469_v33  ;;  %v1498_v14 = vsel %vm196_vm0, %v1493_v12, %v1495_v59  ;;  %v1506_v62 = vadd.f32 %v1495_v59, %v1471_v47  ;;  %v1551_v47 = vld [vmem:[%s4511_s3] sm:$0xff] }
 0x17d   :  { %v4135_v53 = vadd.f32 %v1498_v14, %v1470_v44  ;;  %v1555_v44 = vld [vmem:[%s4512_s4] sm:$0xff]  ;;  %v4994_v14 = vmov 3  }
 0x17e   :  { %v1537_v10 = vmul.f32 %v4132_v2, %v4132_v2  ;;  %v4141_v29 = vmul.f32 %v2205_v52, %v1506_v62  ;;  %v1518_v8 = vadd.f32 %v4132_v2, %v4130_v13  ;;  %v4995_v62 = vmov 1  }
 0x17f   :  { %v1538_v18 = vmul.f32 %v4135_v53, %v4135_v53 }
 0x180   :  { %v1519_v54 = vadd.f32 %v1518_v8, %v4135_v53  ;;  %v1520_v6 = vsel %vm799_vm1, %v4141_v29, 0.0  ;;  %v1540_v4 = vadd.f32 %v1537_v10, %v1536_v21  ;;  %v1539_v52 = vmul.f32 %v4141_v29, %v4141_v29 }
 0x182   :  { %v1521_v9 = vadd.f32 %v1520_v6, %v1519_v54  ;;  %v1541_v51 = vadd.f32 %v1540_v4, %v1538_v18  ;;  %v1542_v57 = vsel %vm799_vm1, %v1539_v52, 0.0 }
 0x184   :  { %1522 = vadd.xlane.f32.xlu1 %v1521_v9  ;;  %v1543_v25 = vadd.f32 %v1542_v57, %v1541_v51 }
 0x188   :  { %831 = vadd.xlane.f32.xlu1 %v830_v39 }
 0x18c   :  { %1544 = vadd.xlane.f32.xlu1 %v1543_v25 }
 0x19d   :  { %1611 = vperm.xlu1 %2386, %v1584_v50  }
 0x1a1   :  { %2387 = vset.pattern.permute.xlu1 %v4993_v24 }
 0x1b5   :  { %v821_v45 = vpop.xlane.xlu0 %820 }
 0x1b9   :  { %v1516_v22 = vpop.xlane.xlu0 %1515  ;;  %v803_v60 = vpop.xlane.xlu1 %802 }
 0x201   :  { %v810_v26 = vpop.xlane.xlu0 %809 }
 0x202   :  { %v811_v58 = vadd.f32 %v810_v26, %v803_v60 }
 0x204   :  { %v1517_v55 = vadd.f32 %v1516_v22, %v811_v58 }
 0x205   :  { %v1534_v3 = vpop.xlane.xlu0 %1533 }
 0x211   :  { %v1523_v46 = vpop.xlane.xlu1 %1522 }
 0x212   :  { %v1524_v56 = vadd.f32 %v1523_v46, %v1517_v55 }
 0x214   :  { %v1547_v36 = vmul.f32 0.0005005005, %v1524_v56 }
 0x215   :  { %v832_v31 = vpop.xlane.xlu1 %831 }
 0x216   :  { %v833_v7 = vadd.f32 %v832_v31, %v821_v45  ;;  %v1549_v32 = vmul.f32 %v1547_v36, %v1547_v36 }
 0x218   :  { %v1535_v38 = vadd.f32 %v1534_v3, %v833_v7 }
 0x219   :  { %v1545_v43 = vpop.xlane.xlu1 %1544 }
 0x21a   :  { %v1546_v15 = vadd.f32 %v1545_v43, %v1535_v38 }
 0x21c   :  { %v1548_v27 = vmul.f32 0.0005005005, %v1546_v15 }
 0x21d   :  { %v4172_v5 = vpop.permute.xlu1 %1611 }
 0x21e   :  { %v1550_v34 = vsub.f32 %v1548_v27, %v1549_v32 }
 0x220   :  { %v1552_v33 = vadd.f32 1e-05, %v1550_v34 }
 0x222   :  { %2393 = vrsqrt.f32 %v1552_v33 }
 0x22c   :  { %v2394_v12 = vpop.eup %2393 }
 0x22d   :  { %v1554_v49 = vmul.f32 %v2394_v12, %v1551_v47 }
 0x22f   :  { %1560 = vperm.xlu0 %2382, %v1554_v49   ;;  %v1556_v0 = vmul.f32 %v1554_v49, %v1547_v36 }
 0x231   :  { %v1557_v59 = vsub.f32 %v1555_v44, %v1556_v0 }
 0x233   :  { %1569 = vperm.xlu1 %2387, %v1557_v59  }
 0x237   :  { %2388 = vset.pattern.permute.xlu1 %v4994_v14 }
 0x238   :  { %1642 = vperm.xlu1 %2388, %v1584_v50  }
 0x23c   :  { %2389 = vset.pattern.permute.xlu1 %v4993_v24 }
 0x23d   :  { %1587 = vperm.xlu1 %2389, %v1584_v50  }
 0x241   :  { %2390 = vset.pattern.permute.xlu1 %v4995_v62 }
 0x242   :  { %1599 = vperm.xlu1 %2390, %v1584_v50  }
 0x246   :  { %2391 = vset.pattern.permute.xlu1 %v4993_v24 }
 0x2ae   :  { %v1561_v10 = vpop.permute.xlu0 %1560 }
 0x2af   :  { %v1563_v8 = vmul.f32 %v1561_v10, %v3785_v63  ;;  %v1716_v11 = vmul.f32 %v1561_v10, %v3846_v28  ;;  %v1564_v6 = vmul.f32 %v1561_v10, %v3787_v17  ;;  %v1718_v9 = vmul.f32 %v1561_v10, %v3851_v35 }
 0x2b0   :  { %v1565_v52 = vmul.f32 %v1561_v10, %v3791_v1  ;;  %v1717_v28 = vmul.f32 %v1561_v10, %v3849_v20  ;;  %v1576_v17 = vmul.f32 %v1561_v10, %v4100_v42  ;;  %v1578_v35 = vmul.f32 %v1561_v10, %v4105_v16 }
 0x2b1   :  { %v1566_v51 = vmul.f32 %v1561_v10, %v3793_v61  ;;  %v1724_v50 = vmul.f32 %v1561_v10, %v4130_v13  ;;  %v1577_v45 = vmul.f32 %v1561_v10, %v4102_v30  ;;  %v1726_v22 = vmul.f32 %v1561_v10, %v4135_v53 }
 0x2b2   :  { %v1570_v41 = vpop.permute.xlu1 %1569  ;;  %v1719_v20 = vmul.f32 %v1561_v10, %v3854_v48  ;;  %v1727_v61 = vmul.f32 %v1561_v10, %v4141_v29  ;;  %v1725_v16 = vmul.f32 %v1561_v10, %v4132_v2  ;;  %v1579_v30 = vmul.f32 %v1561_v10, %v4107_v23 }
 0x2b3   :  { %v1572_v21 = vadd.f32 %v1570_v41, %v1563_v8  ;;  %v1720_v54 = vadd.f32 %v1716_v11, %v1570_v41  ;;  %v1573_v4 = vadd.f32 %v1570_v41, %v1564_v6  ;;  %v1722_v37 = vadd.f32 %v1718_v9, %v1570_v41 }
 0x2b4   :  { %v1574_v39 = vadd.f32 %v1570_v41, %v1565_v52  ;;  %v1721_v1 = vadd.f32 %v1717_v28, %v1570_v41  ;;  %v1575_v24 = vadd.f32 %v1570_v41, %v1566_v51  ;;  %v1580_v42 = vadd.f32 %v1576_v17, %v1570_v41 }
 0x2b5   :  { %v1614_v19 = vmul.f32 %v4172_v5, %v1572_v21  ;;  %v1748_v18 = vmul.f32 %v1720_v54, %v4172_v5  ;;  %v1615_v57 = vmul.f32 %v4172_v5, %v1573_v4  ;;  %v1750_v25 = vmul.f32 %v1722_v37, %v4172_v5 }
 0x2b6   :  { %v1616_v60 = vmul.f32 %v4172_v5, %v1574_v39  ;;  %v1582_v13 = vadd.f32 %v1578_v35, %v1570_v41  ;;  %v1728_v58 = vadd.f32 %v1724_v50, %v1570_v41  ;;  %v1749_v48 = vmul.f32 %v1721_v1, %v4172_v5 }
 0x2b7   :  { %1622 = vrot.lane.b32.xlu1 %v1614_v19, %s2437_s0  ;;  %1756 = vrot.lane.b32.xlu0 %v1748_v18, %s2437_s0  ;;  %v4183_v63 = vpop.permute.xlu1 %1642  ;;  %v1581_v46 = vadd.f32 %v1577_v45, %v1570_v41  ;;  %v1730_v55 = vadd.f32 %v1726_v22, %v1570_v41  ;;  %v1617_v31 = vmul.f32 %v4172_v5, %v1575_v24 }
 0x2b8   :  { %v1645_v53 = vmul.f32 %v4183_v63, %v1580_v42  ;;  %v1647_v56 = vmul.f32 %v4183_v63, %v1582_v13  ;;  %v1775_v29 = vmul.f32 %v1728_v58, %v4183_v63  ;;  %v1723_v2 = vadd.f32 %v1719_v20, %v1570_v41 }
 0x2b9   :  { %v1731_v7 = vadd.f32 %v1727_v61, %v1570_v41  ;;  %v1729_v3 = vadd.f32 %v1725_v16, %v1570_v41  ;;  %v1583_v23 = vadd.f32 %v1579_v30, %v1570_v41  ;;  %v1646_v18 = vmul.f32 %v4183_v63, %v1581_v46 }
 0x2bb   :  { %1624 = vrot.lane.b32.xlu1 %v1615_v57, %s2437_s0  ;;  %1760 = vrot.lane.b32.xlu0 %v1750_v25, %s2437_s0  ;;  %v1778_v52 = vmul.f32 %v1731_v7, %v4183_v63  ;;  %v1776_v28 = vmul.f32 %v1729_v3, %v4183_v63 }
 0x2bc   :  { %v1588_v26 = vpop.permute.xlu1 %1587 }
 0x2bd   :  { %v1590_v36 = vmul.f32 %v1588_v26, %v1572_v21  ;;  %v1591_v38 = vmul.f32 %v1588_v26, %v1573_v4  ;;  %v1732_v43 = vmul.f32 %v1720_v54, %v1588_v26  ;;  %v1733_v15 = vmul.f32 %v1721_v1, %v1588_v26 }
 0x2be   :  { %v1592_v27 = vmul.f32 %v1588_v26, %v1574_v39  ;;  %v1593_v34 = vmul.f32 %v1588_v26, %v1575_v24  ;;  %v1734_v33 = vmul.f32 %v1722_v37, %v1588_v26  ;;  %v1735_v47 = vmul.f32 %v1723_v2, %v1588_v26 }
 0x2bf   :  { %1626 = vrot.lane.b32.xlu1 %v1616_v60, %s2437_s0  ;;  %1653 = vrot.lane.b32.xlu0 %v1645_v53, %s2437_s0  ;;  %v1777_v4 = vmul.f32 %v1730_v55, %v4183_v63  ;;  %v1751_v37 = vmul.f32 %v1723_v2, %v4172_v5  ;;  %v1648_v39 = vmul.f32 %v4183_v63, %v1583_v23 }
 0x2c1   :  { %v1600_v32 = vpop.permute.xlu1 %1599 }
 0x2c2   :  { %v1602_v12 = vmul.f32 %v1600_v32, %v1580_v42  ;;  %v1603_v49 = vmul.f32 %v1600_v32, %v1581_v46  ;;  %v1740_v44 = vmul.f32 %v1728_v58, %v1600_v32  ;;  %v1741_v0 = vmul.f32 %v1729_v3, %v1600_v32 }
 0x2c3   :  { %1758 = vrot.lane.b32.xlu1 %v1749_v48, %s2437_s0  ;;  %1657 = vrot.lane.b32.xlu0 %v1647_v56, %s2437_s0  ;;  %v1604_v59 = vmul.f32 %v1600_v32, %v1582_v13  ;;  %v1605_v14 = vmul.f32 %v1600_v32, %v1583_v23  ;;  %v1742_v62 = vmul.f32 %v1730_v55, %v1600_v32 }
 0x2c4   :  { %v1606_v10 = vadd.f32 %v1602_v12, %v1590_v36  ;;  %v1607_v8 = vadd.f32 %v1603_v49, %v1591_v38  ;;  %v1744_v11 = vadd.f32 %v1740_v44, %v1732_v43  ;;  %v1745_v41 = vadd.f32 %v1741_v0, %v1733_v15 }
 0x2c5   :  { %v4210_v21 = vadd.f32 %v1604_v59, %v1592_v27  ;;  %v4212_v54 = vadd.f32 %v1605_v14, %v1593_v34  ;;  %v1743_v6 = vmul.f32 %v1731_v7, %v1600_v32  ;;  %v1746_v9 = vadd.f32 %v1742_v62, %v1734_v33 }
 0x2c7   :  { %1628 = vrot.lane.b32.xlu1 %v1617_v31, %s2437_s0  ;;  %1783 = vrot.lane.b32.xlu0 %v1775_v29, %s2437_s0  ;;  %v1747_v19 = vadd.f32 %v1743_v6, %v1735_v47 }
 0x2cb   :  { %1655 = vrot.lane.b32.xlu1 %v1646_v18, %s2437_s0  ;;  %1787 = vrot.lane.b32.xlu0 %v1777_v4, %s2437_s0 }
 0x2cf   :  { %1762 = vrot.lane.b32.xlu1 %v1751_v37, %s2437_s0  ;;  %1789 = vrot.lane.b32.xlu0 %v1778_v52, %s2437_s0 }
 0x2d3   :  { %1785 = vrot.lane.b32.xlu1 %v1776_v28, %s2437_s0 }
 0x2d7   :  { %1659 = vrot.lane.b32.xlu1 %v1648_v39, %s2437_s0 }
 0x329   :  { %v1757_v17 = vpop.permute.xlu0 %1756  ;;  %v1623_v35 = vpop.permute.xlu1 %1622 }
 0x32d   :  { %v1761_v51 = vpop.permute.xlu0 %1760  ;;  %v1625_v57 = vpop.permute.xlu1 %1624 }
 0x32e   :  { %v1630_v22 = vsel %vm196_vm0, %v1623_v35, %v1625_v57 }
 0x32f   :  { %v1637_v42 = vadd.f32 %v1630_v22, %v1606_v10 }
 0x331   :  { %v1654_v25 = vpop.permute.xlu0 %1653  ;;  %v1627_v5 = vpop.permute.xlu1 %1626 }
 0x332   :  { %v1631_v20 = vsel %vm196_vm0, %v1625_v57, %v1627_v5 }
 0x333   :  { %v1638_v61 = vadd.f32 %v1631_v20, %v1607_v8 }
 0x335   :  { %v1658_v1 = vpop.permute.xlu0 %1657  ;;  %v1759_v50 = vpop.permute.xlu1 %1758 }
 0x336   :  { %v1764_v30 = vsel %vm196_vm0, %v1757_v17, %v1759_v50  ;;  %v1765_v56 = vsel %vm196_vm0, %v1759_v50, %v1761_v51 }
 0x337   :  { %v1771_v23 = vadd.f32 %v1764_v30, %v1744_v11  ;;  %v1772_v43 = vadd.f32 %v1765_v56, %v1745_v41 }
 0x339   :  { %v1784_v24 = vpop.permute.xlu0 %1783  ;;  %v1629_v45 = vpop.permute.xlu1 %1628 }
 0x33a   :  { %v1632_v33 = vsel %vm196_vm0, %v1627_v5, %v1629_v45  ;;  %v1640_v14 = vadd.f32 %v1629_v45, %v4212_v54 }
 0x33b   :  { %v1639_v8 = vadd.f32 %v1632_v33, %v4210_v21 }
 0x33d   :  { %v1788_v16 = vpop.permute.xlu0 %1787  ;;  %v1656_v63 = vpop.permute.xlu1 %1655 }
 0x33e   :  { %v1661_v26 = vsel %vm196_vm0, %v1654_v25, %v1656_v63  ;;  %v1662_v60 = vsel %vm196_vm0, %v1656_v63, %v1658_v1 }
 0x33f   :  { %v1668_v13 = vadd.f32 %v1661_v26, %v1637_v42  ;;  %v1669_v58 = vadd.f32 %v1662_v60, %v1638_v61 }
 0x341   :  { %v1672_v53 = vrot.slane %v1668_v13, 4  ;;  %v1678_v48 = vrot.slane %v1669_v58, 4  ;;  %v1790_v46 = vpop.permute.xlu0 %1789  ;;  %v1763_v55 = vpop.permute.xlu1 %1762 }
 0x342   :  { %v1766_v31 = vsel %vm196_vm0, %v1761_v51, %v1763_v55  ;;  %v1774_v29 = vadd.f32 %v1763_v55, %v1747_v19  ;;  %v1793_v36 = vsel %vm196_vm0, %v1788_v16, %v1790_v46 }
 0x343   :  { %v1673_v2 = vadd.f32 %v1672_v53, %v1668_v13  ;;  %v1679_v7 = vadd.f32 %v1678_v48, %v1669_v58  ;;  %v1773_v3 = vadd.f32 %v1766_v31, %v1746_v9 }
 0x344   :  { %v1801_v38 = vadd.f32 %v1790_v46, %v1774_v29 }
 0x345   :  { %v1674_v15 = vrot.slane %v1673_v2, 2  ;;  %v1680_v32 = vrot.slane %v1679_v7, 2  ;;  %v1800_v27 = vadd.f32 %v1793_v36, %v1773_v3  ;;  %v1786_v34 = vpop.permute.xlu1 %1785 }
 0x346   :  { %v1820_v47 = vsel %vm1690_vm3, %v1801_v38, 0.0  ;;  %v1791_v12 = vsel %vm196_vm0, %v1784_v24, %v1786_v34  ;;  %v1792_v49 = vsel %vm196_vm0, %v1786_v34, %v1788_v16 }
 0x347   :  { %v1675_v44 = vadd.f32 %v1674_v15, %v1673_v2  ;;  %v1814_v0 = vrot.slane %v1800_v27, 4  ;;  %v1821_v59 = vrot.slane %v1820_v47, 4  ;;  %v1798_v62 = vadd.f32 %v1791_v12, %v1771_v23 }
 0x348   :  { %v1799_v10 = vadd.f32 %v1792_v49, %v1772_v43  ;;  %v1681_v11 = vadd.f32 %v1680_v32, %v1679_v7 }
 0x349   :  { %v1815_v41 = vadd.f32 %v1814_v0, %v1800_v27  ;;  %v1822_v6 = vadd.f32 %v1821_v59, %v1820_v47  ;;  %v1660_v9 = vpop.permute.xlu1 %1659  ;;  %v1802_v19 = vrot.slane %v1798_v62, 4  ;;  %v1676_v52 = vrot.slane %v1675_v44, 1 }
 0x34a   :  { %v1808_v18 = vrot.slane %v1799_v10, 4  ;;  %v1663_v4 = vsel %vm196_vm0, %v1658_v1, %v1660_v9  ;;  %v1671_v37 = vadd.f32 %v1660_v9, %v1640_v14  ;;  %v1682_v57 = vrot.slane %v1681_v11, 1 }
 0x34b   :  { %v1816_v28 = vrot.slane %v1815_v41, 2  ;;  %v1823_v39 = vrot.slane %v1822_v6, 2  ;;  %v1803_v17 = vadd.f32 %v1802_v19, %v1798_v62  ;;  %v1670_v51 = vadd.f32 %v1663_v4, %v1639_v8  ;;  %v1974_v4 = vld [vmem:[%s4514_s7 + $0x88] sm:$0xff] }
 0x34c   :  { %v1809_v35 = vadd.f32 %v1808_v18, %v1799_v10  ;;  %v1691_v54 = vsel %vm1690_vm3, %v1671_v37, 0.0  ;;  %v4244_v20 = vadd.f32 %v1676_v52, %v1675_v44  ;;  %v4246_v16 = vadd.f32 %v1682_v57, %v1681_v11  ;;  %v1973_v18 = vld [vmem:[%s4514_s7 + $0x80] sm:$0xff] }
 0x34d   :  { %v1817_v25 = vadd.f32 %v1816_v28, %v1815_v41  ;;  %v1824_v21 = vadd.f32 %v1823_v39, %v1822_v6  ;;  %v1692_v5 = vrot.slane %v1691_v54, 4  ;;  %v1804_v50 = vrot.slane %v1803_v17, 2  ;;  %v1957_v37 = vld [vmem:[%s4514_s7] sm:$0xff]  ;;  %v1958_v28 = vld [vmem:[%s4514_s7 + $0x8] sm:$0xff] }
 0x34e   :  { %v1810_v24 = vrot.slane %v1809_v35, 2  ;;  %v1684_v45 = vrot.slane %v1670_v51, 4  ;;  %v1705_v56 = vmul.f32 %v4244_v20, %v4244_v20  ;;  %v1706_v7 = vmul.f32 %v4246_v16, %v4246_v16  ;;  %v2005_v39 = vld [vmem:[%s4514_s7 + $0x180] sm:$0xff] }
 0x34f   :  { %v1693_v22 = vadd.f32 %v1692_v5, %v1691_v54  ;;  %v1805_v1 = vadd.f32 %v1804_v50, %v1803_v17  ;;  %v1818_v63 = vrot.slane %v1817_v25, 1  ;;  %v1825_v26 = vrot.slane %v1824_v21, 1  ;;  %v2006_v17 = vld [vmem:[%s4514_s7 + $0x188] sm:$0xff] }
 0x350   :  { %v1811_v42 = vadd.f32 %v1810_v24, %v1809_v35  ;;  %v1685_v61 = vadd.f32 %v1684_v45, %v1670_v51  ;;  %v1698_v27 = vadd.f32 %v4246_v16, %v4244_v20  ;;  %v1709_v49 = vadd.f32 %v1706_v7, %v1705_v56  ;;  %v1959_v7 = vld [vmem:[%s4514_s7 + $0x10] sm:$0xff] }
 0x351   :  { %v1694_v60 = vrot.slane %v1693_v22, 2  ;;  %v1806_v13 = vrot.slane %v1805_v1, 1  ;;  %v4254_v29 = vadd.f32 %v1818_v63, %v1817_v25  ;;  %v4256_v2 = vadd.f32 %v1825_v26, %v1824_v21 }
 0x352   :  { %v1812_v58 = vrot.slane %v1811_v42, 1  ;;  %v1686_v30 = vrot.slane %v1685_v61, 2  ;;  %v2285_v52 = vpack.c.bf16 %v1974_v4, %v1973_v18  ;;  %v2287_v35 = vpack.c.bf16 %v1958_v28, %v1957_v37  ;;  %v1963_v4 = vld [vmem:[%s4514_s7 + $0x30] sm:$0xff]  ;;  %v1964_v37 = vld [vmem:[%s4514_s7 + $0x38] sm:$0xff] }
 0x353   :  { %v1695_v53 = vadd.f32 %v1694_v60, %v1693_v22  ;;  %v4248_v48 = vadd.f32 %v1806_v13, %v1805_v1  ;;  %v1829_v33 = vsel %vm1690_vm3, %v4256_v2, 0.0  ;;  %v1836_v14 = vmul.f32 %v4254_v29, %v4254_v29  ;;  %v1853_v60 = vld [vmem:[#allocation4] sm:$0x1] }
 0x354   :  { %v4250_v46 = vadd.f32 %v1812_v58, %v1811_v42  ;;  %v1687_v55 = vadd.f32 %v1686_v30, %v1685_v61  ;;  %v1837_v10 = vmul.f32 %v4256_v2, %v4256_v2  ;;  %v2317_v51 = vpack.c.bf16 %v2006_v17, %v2005_v39  ;;  %2286 = vmatprep.subr.bf16.mxu0 %v2285_v52  ;;  %v1849_v61 = vld [vmem:[#allocation3] sm:$0x1]  ;;  %v1989_v30 = vld [vmem:[%s4514_s7 + $0x100] sm:$0xff]  ;;  %v2011_v52 = vld [vmem:[%s4514_s7 + $0x1b0] sm:$0xff] }
 0x355   :  { %v1696_v31 = vrot.slane %v1695_v53, 1  ;;  %v1834_v36 = vmul.f32 %v4248_v48, %v4248_v48  ;;  %2288 = vmatpush3.bf16.msra.mxu0 %v2287_v35  ;;  %v2299_v28 = vpack.c.bf16 %v1964_v37, %v1963_v4  ;;  %v2012_v39 = vld [vmem:[%s4514_s7 + $0x1b8] sm:$0xff]  ;;  %v1995_v17 = vld [vmem:[%s4514_s7 + $0x130] sm:$0xff] }
 0x356   :  { %v1688_v3 = vrot.slane %v1687_v55, 1  ;;  %v1827_v23 = vadd.f32 %v4250_v46, %v4248_v48  ;;  %v1835_v38 = vmul.f32 %v4250_v46, %v4250_v46  ;;  %v1840_v9 = vsel %vm1690_vm3, %v1837_v10, 0.0  ;;  %2318 = vmatprep.subr.bf16.mxu1 %v2317_v51  ;;  %v2010_v10 = vld [vmem:[%s4514_s7 + $0x1a8] sm:$0xff]  ;;  %v1996_v35 = vld [vmem:[%s4514_s7 + $0x138] sm:$0xff] }
 0x357   :  { %v4266_v43 = vadd.f32 %v1696_v31, %v1695_v53  ;;  %v1990_v53 = vld [vmem:[%s4514_s7 + $0x108] sm:$0xff]  ;;  %v1976_v31 = vld [vmem:[%s4514_s7 + $0x98] sm:$0xff]  ;;  %v2329_v51 = vpack.c.bf16 %v2012_v39, %v2011_v52  ;;  %v2439_v52 = vmov 1966171168  }
 0x358   :  { %v4268_v15 = vadd.f32 %v1688_v3, %v1687_v55  ;;  %v1828_v32 = vadd.f32 %v1827_v23, %v4254_v29  ;;  %v1838_v34 = vadd.f32 %v1835_v38, %v1834_v36  ;;  %v1975_v55 = vld [vmem:[%s4514_s7 + $0x90] sm:$0xff]  ;;  %v2319_v56 = vpack.c.bf16 %v1990_v53, %v1989_v30  ;;  %v1960_v3 = vld [vmem:[%s4514_s7 + $0x18] sm:$0xff] }
 0x359   :  { %v1700_v47 = vsel %vm1690_vm3, %v4266_v43, 0.0  ;;  %v1708_v12 = vmul.f32 %v4266_v43, %v4266_v43  ;;  %v2289_v23 = vpack.c.bf16 %v1976_v31, %v1975_v55  ;;  %v2291_v36 = vpack.c.bf16 %v1960_v3, %v1959_v7  ;;  %v2007_v38 = vld [vmem:[%s4514_s7 + $0x190] sm:$0xff]  ;;  %v2016_v53 = vld [vmem:[%s4514_s7 + $0x1d8] sm:$0xff]  ;;  %v1986_v31 = vld [vmem:[%s4514_s7 + $0xe8] sm:$0xff] }
 0x35a   :  { %v1830_v44 = vadd.f32 %v1829_v33, %v1828_v32  ;;  %v1699_v0 = vadd.f32 %v1698_v27, %v4268_v15  ;;  %v1707_v59 = vmul.f32 %v4268_v15, %v4268_v15  ;;  %v1839_v41 = vadd.f32 %v1838_v34, %v1836_v14  ;;  %v2008_v32 = vld [vmem:[%s4514_s7 + $0x198] sm:$0xff]  ;;  %2320 = vmatpush3.bf16.msra.mxu1 %v2319_v56  ;;  %v1991_v34 = vld [vmem:[%s4514_s7 + $0x110] sm:$0xff]  ;;  %v1985_v56 = vld [vmem:[%s4514_s7 + $0xe0] sm:$0xff] }
 0x35b   :  { %v1711_v62 = vsel %vm1690_vm3, %v1708_v12, 0.0  ;;  %v2321_v27 = vpack.c.bf16 %v2008_v32, %v2007_v38  ;;  %2290 = vmatprep.subr.bf16.mxu0 %v2289_v23  ;;  %v1992_v33 = vld [vmem:[%s4514_s7 + $0x118] sm:$0xff]  ;;  %v2015_v30 = vld [vmem:[%s4514_s7 + $0x1d0] sm:$0xff]  ;;  %v2017_v38 = vld [vmem:[%s4514_s7 + $0x1e0] sm:$0xff] }
 0x35c   :  { %1831 = vadd.xlane.f32.xlu0 %v1830_v44  ;;  %v1701_v8 = vadd.f32 %v1700_v47, %v1699_v0  ;;  %v1710_v11 = vadd.f32 %v1709_v49, %v1707_v59  ;;  %v1841_v19 = vadd.f32 %v1840_v9, %v1839_v41  ;;  %2292 = vmatpush3.bf16.msra.mxu0 %v2291_v36  ;;  %v1977_v47 = vld [vmem:[%s4514_s7 + $0xa0] sm:$0xff]  ;;  %v1978_v49 = vld [vmem:[%s4514_s7 + $0xa8] sm:$0xff]  ;;  %v1980_v9 = vld [vmem:[%s4514_s7 + $0xb8] sm:$0xff] }
 0x35d   :  { %2322 = vmatprep.subr.bf16.mxu1 %v2321_v27  ;;  %v2323_v12 = vpack.c.bf16 %v1992_v33, %v1991_v34  ;;  %v1961_v44 = vld [vmem:[%s4514_s7 + $0x20] sm:$0xff]  ;;  %v1962_v0 = vld [vmem:[%s4514_s7 + $0x28] sm:$0xff]  ;;  %v2293_v59 = vpack.c.bf16 %v1978_v49, %v1977_v47  ;;  %v2337_v7 = vpack.c.bf16 %v2016_v53, %v2015_v30  ;;  %v1999_v3 = vld [vmem:[%s4514_s7 + $0x150] sm:$0xff]  ;;  %v2309_v27 = vpack.c.bf16 %v1986_v31, %v1985_v56 }
 0x35e   :  { %1702 = vadd.xlane.f32.xlu1 %v1701_v8  ;;  %v1712_v6 = vadd.f32 %v1711_v62, %v1710_v11  ;;  %v2295_v14 = vpack.c.bf16 %v1962_v0, %v1961_v44  ;;  %v2009_v62 = vld [vmem:[%s4514_s7 + $0x1a0] sm:$0xff]  ;;  %v1994_v41 = vld [vmem:[%s4514_s7 + $0x128] sm:$0xff]  ;;  %v2000_v23 = vld [vmem:[%s4514_s7 + $0x158] sm:$0xff] }
 0x35f   :  { %v1993_v8 = vld [vmem:[%s4514_s7 + $0x120] sm:$0xff]  ;;  %2324 = vmatpush3.bf16.msra.mxu1 %v2323_v12  ;;  %v2325_v11 = vpack.c.bf16 %v2010_v10, %v2009_v62  ;;  %2294 = vmatprep.subr.bf16.mxu0 %v2293_v59  ;;  %v2018_v32 = vld [vmem:[%s4514_s7 + $0x1e8] sm:$0xff]  ;;  %v2339_v47 = vpack.c.bf16 %v2000_v23, %v1999_v3  ;;  %v1987_v12 = vld [vmem:[%s4514_s7 + $0xf0] sm:$0xff] }
 0x360   :  { %1713 = vadd.xlane.f32.xlu0 %v1712_v6  ;;  %v1979_v6 = vld [vmem:[%s4514_s7 + $0xb0] sm:$0xff]  ;;  %2296 = vmatpush3.bf16.msra.mxu0 %v2295_v14  ;;  %v1969_v34 = vld [vmem:[%s4514_s7 + $0x60] sm:$0xff]  ;;  %v1970_v33 = vld [vmem:[%s4514_s7 + $0x68] sm:$0xff]  ;;  %v2341_v44 = vpack.c.bf16 %v2018_v32, %v2017_v38 }
 0x361   :  { %v2297_v18 = vpack.c.bf16 %v1980_v9, %v1979_v6  ;;  %2326 = vmatprep.subr.bf16.mxu1 %v2325_v11  ;;  %v1988_v49 = vld [vmem:[%s4514_s7 + $0xf8] sm:$0xff]  ;;  %v2001_v0 = vld [vmem:[%s4514_s7 + $0x160] sm:$0xff]  ;;  %v2002_v59 = vld [vmem:[%s4514_s7 + $0x168] sm:$0xff]  ;;  %v2311_v14 = vpack.c.bf16 %v1970_v33, %v1969_v34 }
 0x362   :  { %1842 = vadd.xlane.f32.xlu1 %v1841_v19  ;;  %v2327_v19 = vpack.c.bf16 %v1994_v41, %v1993_v8  ;;  %v2019_v62 = vld [vmem:[%s4514_s7 + $0x1f0] sm:$0xff]  ;;  %v2020_v10 = vld [vmem:[%s4514_s7 + $0x1f8] sm:$0xff]  ;;  %v2313_v8 = vpack.c.bf16 %v1988_v49, %v1987_v12  ;;  %v2343_v6 = vpack.c.bf16 %v2002_v59, %v2001_v0 }
 0x363   :  { %2298 = vmatprep.subr.bf16.mxu0 %v2297_v18  ;;  %v1971_v11 = vld [vmem:[%s4514_s7 + $0x70] sm:$0xff]  ;;  %v1972_v41 = vld [vmem:[%s4514_s7 + $0x78] sm:$0xff]  ;;  %v2345_v9 = vpack.c.bf16 %v2020_v10, %v2019_v62 }
 0x364   :  { %2328 = vmatpush3.bf16.msra.mxu1 %v2327_v19  ;;  %2300 = vmatpush3.bf16.msra.mxu0 %v2299_v28  ;;  %v2003_v19 = vld [vmem:[%s4514_s7 + $0x170] sm:$0xff]  ;;  %v2004_v18 = vld [vmem:[%s4514_s7 + $0x178] sm:$0xff]  ;;  %v2315_v4 = vpack.c.bf16 %v1972_v41, %v1971_v11  ;;  %v1890_v28 = vunpack.c.l.s4 %v2439_v52 }
 0x365   :  { %2330 = vmatprep.subr.bf16.mxu1 %v2329_v51  ;;  %v2347_v37 = vpack.c.bf16 %v2004_v18, %v2003_v19 }
 0x3e9   :  { %v1832_v54 = vpop.xlane.xlu0 %1831 }
 0x3eb   :  { %v1703_v57 = vpop.xlane.xlu1 %1702 }
 0x3ec   :  { %v1833_v25 = vadd.f32 %v1832_v54, %v1703_v57  ;;  %v1981_v54 = vld [vmem:[%s4514_s7 + $0xc0] sm:$0xff]  ;;  %v1982_v57 = vld [vmem:[%s4514_s7 + $0xc8] sm:$0xff] }
 0x3ed   :  { %v1714_v5 = vpop.xlane.xlu0 %1713 }
 0x3ee   :  { %v1845_v21 = vmul.f32 0.001004016, %v1833_v25  ;;  %v1965_v25 = vld [vmem:[%s4514_s7 + $0x40] sm:$0xff] }
 0x3ef   :  { %v1843_v50 = vpop.xlane.xlu1 %1842 }
 0x3f0   :  { %v1844_v24 = vadd.f32 %v1843_v50, %v1714_v5  ;;  %v1847_v45 = vmul.f32 %v1845_v21, %v1845_v21  ;;  %v2301_v5 = vpack.c.bf16 %v1982_v57, %v1981_v54  ;;  %v1966_v50 = vld [vmem:[%s4514_s7 + $0x48] sm:$0xff] }
 0x3f1   :  { %v4997_v57 = vld [vmem:[#allocation8_spill] sm:$0xff] }
 0x3f2   :  { %v1846_v22 = vmul.f32 0.001004016, %v1844_v24  ;;  %v2013_v24 = vld [vmem:[%s4514_s7 + $0x1c0] sm:$0xff]  ;;  %2302 = vmatprep.subr.bf16.mxu0 %v2301_v5 }
 0x3f4   :  { %v1848_v1 = vsub.f32 %v1846_v22, %v1847_v45  ;;  %v2014_v45 = vld [vmem:[%s4514_s7 + $0x1c8] sm:$0xff] }
 0x3f5   :  { %v2333_v22 = vpack.c.bf16 %v2014_v45, %v2013_v24 }
 0x3f6   :  { %v1850_v42 = vadd.f32 1e-05, %v1848_v1  ;;  %v1997_v1 = vld [vmem:[%s4514_s7 + $0x140] sm:$0xff] }
 0x3f8   :  { %2395 = vrsqrt.f32 %v1850_v42  ;;  %v1998_v42 = vld [vmem:[%s4514_s7 + $0x148] sm:$0xff] }
 0x3f9   :  { %v2335_v55 = vpack.c.bf16 %v1998_v42, %v1997_v1 }
 0x402   :  { %v2396_v63 = vpop.eup %2395 }
 0x403   :  { %v1852_v26 = vmul.f32 %v2396_v63, %v1849_v61  ;;  %v1983_v61 = vld [vmem:[%s4514_s7 + $0xd0] sm:$0xff]  ;;  %v2303_v63 = vpack.c.bf16 %v1966_v50, %v1965_v25 }
 0x405   :  { %1859 = vperm.xlu0 %2382, %v1852_v26   ;;  %v1854_v13 = vmul.f32 %v1852_v26, %v1845_v21  ;;  %v2331_v21 = vpack.c.bf16 %v1996_v35, %v1995_v17  ;;  %v1984_v26 = vld [vmem:[%s4514_s7 + $0xd8] sm:$0xff]  ;;  %2304 = vmatpush3.bf16.msra.mxu0 %v2303_v63  ;;  %v1891_v17 = vunpack.c.0.s8 %v1890_v28 }
 0x406   :  { %v4996_v35 = vld [vmem:[#allocation9_spill] sm:$0xff] }
 0x407   :  { %v1855_v58 = vsub.f32 %v1853_v60, %v1854_v13  ;;  %v1967_v60 = vld [vmem:[%s4514_s7 + $0x50] sm:$0xff]  ;;  %v2305_v13 = vpack.c.bf16 %v1984_v26, %v1983_v61  ;;  %2332 = vmatpush3.bf16.msra.mxu1 %v2331_v21  ;;  %v1894_v25 = vsub.s32 %v1891_v17, %v4997_v57 }
 0x408   :  { %2334 = vmatprep.subr.bf16.mxu1 %v2333_v22 }
 0x409   :  { %1872 = vperm.xlu1 %2391, %v1855_v58   ;;  %v1968_v58 = vld [vmem:[%s4514_s7 + $0x58] sm:$0xff]  ;;  %2306 = vmatprep.subr.bf16.mxu0 %v2305_v13 }
 0x40a   :  { %v2307_v36 = vpack.c.bf16 %v1968_v58, %v1967_v60 }
 0x40b   :  { %2336 = vmatpush3.bf16.msra.mxu1 %v2335_v55 }
 0x40c   :  { %2338 = vmatprep.subr.bf16.mxu1 %v2337_v7  ;;  %2308 = vmatpush3.bf16.msra.mxu0 %v2307_v36 }
 0x40d   :  { %2310 = vmatprep.subr.bf16.mxu0 %v2309_v27 }
 0x40f   :  { %2340 = vmatpush3.bf16.msra.mxu1 %v2339_v47 }
 0x410   :  { %2342 = vmatprep.subr.bf16.mxu1 %v2341_v44  ;;  %2312 = vmatpush3.bf16.msra.mxu0 %v2311_v14  ;;  %v2214_v44 = vld [vmem:[%s4515_s8] ss:$0 sm:$0xff] }
 0x411   :  { %2314 = vmatprep.subr.bf16.mxu0 %v2313_v8 }
 0x413   :  { %2344 = vmatpush3.bf16.msra.mxu1 %v2343_v6 }
 0x414   :  { %2346 = vmatprep.subr.bf16.mxu1 %v2345_v9  ;;  %2316 = vmatpush3.bf16.msra.mxu0 %v2315_v4 }
 0x417   :  { %2348 = vmatpush3.bf16.msra.mxu1 %v2347_v37 }
 0x484   :  { %v1860_v39 = vpop.permute.xlu0 %1859 }
 0x485   :  { %v1865_v51 = vrot.slane %v1860_v39, %v4996_v35 }
 0x487   :  { %v1866_v54 = vmul.f32 %v1865_v51, %v4244_v20  ;;  %v1867_v5 = vmul.f32 %v1865_v51, %v4246_v16  ;;  %v1868_v50 = vmul.f32 %v1865_v51, %v4268_v15  ;;  %v1869_v24 = vmul.f32 %v1865_v51, %v4266_v43 }
 0x488   :  { %v1873_v21 = vpop.permute.xlu1 %1872  ;;  %v1917_v22 = vmul.f32 %v1865_v51, %v4248_v48  ;;  %v1918_v1 = vmul.f32 %v1865_v51, %v4250_v46  ;;  %v1919_v42 = vmul.f32 %v1865_v51, %v4254_v29  ;;  %v1920_v61 = vmul.f32 %v1865_v51, %v4256_v2 }
 0x489   :  { %v1878_v45 = vrot.slane %v1873_v21, %v4996_v35  ;;  %v2440_v2 = vmov 1983009808  }
 0x48a   :  { %v2031_v3 = vunpack.c.l.s4 %v2440_v2 }
 0x48b   :  { %v1879_v20 = vadd.f32 %v1878_v45, %v1866_v54  ;;  %v1880_v63 = vadd.f32 %v1878_v45, %v1867_v5  ;;  %v1881_v26 = vadd.f32 %v1878_v45, %v1868_v50  ;;  %v1882_v60 = vadd.f32 %v1878_v45, %v1869_v24 }
 0x48c   :  { %v1921_v13 = vadd.f32 %v1917_v22, %v1878_v45  ;;  %v1922_v16 = vadd.f32 %v1918_v1, %v1878_v45  ;;  %v1923_v58 = vadd.f32 %v1919_v42, %v1878_v45  ;;  %v1924_v15 = vadd.f32 %v1920_v61, %v1878_v45 }
 0x48d   :  { %v1887_v30 = vcombine.low %v1879_v20, %v1880_v63  ;;  %v1888_v43 = vcombine.low %v1881_v26, %v1882_v60  ;;  %v2032_v38 = vunpack.c.0.s8 %v2031_v3 }
 0x48e   :  { %v1929_v53 = vcombine.low %v1921_v13, %v1922_v16  ;;  %v1930_v55 = vcombine.low %v1923_v58, %v1924_v15 }
 0x48f   :  { %v1895_v56 = vrot.slane %v1887_v30, %v1894_v25  ;;  %v1902_v48 = vrot.slane %v1888_v43, %v1894_v25  ;;  %v2035_v32 = vsub.s32 %v2032_v38, %v4997_v57 }
 0x490   :  { %v1937_v31 = vrot.slane %v1929_v53, %v1894_v25  ;;  %v1944_v46 = vrot.slane %v1930_v55, %v1894_v25 }
 0x491   :  { %v1903_v7 = vcombine.low %v1895_v56, %v1902_v48 }
 0x492   :  { %v1945_v29 = vcombine.low %v1937_v31, %v1944_v46 }
 0x493   :  { %v1910_v23 = vrot.slane %v1903_v7, %v1894_v25 }
 0x494   :  { %v1952_v36 = vrot.slane %v1945_v29, %v1894_v25 }
 0x495   :  { %1916 = vst.msk [vmem:[#allocation2] ss:$2 sm:$0xf] %vm1914_vm4, %v1910_v23 }
 0x496   :  { %1955 = vst.msk [vmem:[#allocation2 + $0x1] ss:$2 sm:$0xf] %vm1914_vm4, %v1952_v36 }
 0x49d   :  { %v1956_v27 = vld [vmem:[#allocation2] sm:$0xff] }
 0x49e   :  { %v2036_v34 = vrot.slane %v1956_v27, %v2035_v32  ;;  %v2029_v33 = vcombine.high %v1956_v27, %v1956_v27 }
 0x4a0   :  { %v2044_v47 = vcombine.high %v2036_v34, %v2036_v34  ;;  %v2043_v12 = vrot.slane %v2029_v33, %v2035_v32 }
 0x4a2   :  { %2114 = vmatprep.mubr.f32.mxu0 %v2044_v47  ;;  %v2045_v49 = vcombine.high %v2043_v12, %v2043_v12 }
 0x4a3   :  { %2115 = vmatmul.mubr.f32.vlgmr.msra.gmra.mrb[0].mxu0 %v2036_v34 }
 0x4a4   :  { %2184 = vmatprep.mubr.f32.mxu1 %v2045_v49 }
 0x4a5   :  { %2185 = vmatmul.mubr.f32.vlgmr.msra.gmra.mrb[0].mxu1 %v2043_v12 }
 0x576   :  { %v2247_v40 = vpop.f32.mrb[0].mxu0 }
 0x577   :  { %v2248_v0 = vpop.f32.mrb[1].mxu0 }
 0x578   :  { %v2249_v59 = vadd.f32 %v2248_v0, %v2247_v40  ;;  %v2282_v14 = vpop.f32.mrb[0].mxu1 }
 0x579   :  { %v2283_v62 = vpop.f32.mrb[1].mxu1 }
 0x57a   :  { %v2117_v10 = vadd.f32 %v2249_v59, %v2214_v44  ;;  %v2284_v8 = vadd.f32 %v2283_v62, %v2282_v14 }
 0x57c   :  { %v2187_v11 = vadd.f32 %v2284_v8, %v2117_v10 }
 0x57e   :  { %2190 = vst [vmem:[#allocation5] sm:$0x3] %v2187_v11 }
 0x57f   :  { %2408 = shalt.err (!%p2405_p4)
}
 0x580   :  { %s2409_s0 = scalar_lea.hbm %s4516_s9, 32 }
 0x581   :  { %p2410_p5 = scmp.ne.s32.totalorder %s4516_s9, %s2409_s0  ;;  %p2413_p6 = scmp.lt.u32.totalorder %s2409_s0, %s4516_s9 }
 0x583   :  { %p2415_p7 = pnand %p2413_p6, %p2410_p5 }
 0x585   :  { %2418 = shalt.err (!%p2415_p7)
}
 0x586   :  { %2200 = dma.vmem_to_hbm [thread:$0]  %s2198_s17, 32, %s4516_s9, [#allocation6]  }
 0x587   :  { %2419 = dma.done.wait [#allocation6], 32  }
 0x588   :  { %2420 = vsyncadd [#allocation6], 4294967264 }
 0x589   :  { %2204 = vsyncpa [#allocation6], 1 }

</bundles_post_ra>
